<compile_context>
chip_gen: v7x
topology: tpu7x:2x2x1
jax: 0.10.0
libtpu: 0.0.40
codegen_flags: <defaults>
</compile_context>

<pallas_src>
import numpy as np

import jax
import jax.numpy as jnp
from jax import lax
from jax.experimental import pallas as pl
from jax.experimental.pallas import tpu as pltpu


# ---------------------------------------------------------------------------
# Structural 0/1 matrices (im2col / shift / upsample), built once in numpy.
# ---------------------------------------------------------------------------
def _conv1_gather_matrices(h, w):
    """s1t[t, p_in, p_out] = 1 iff input pixel p_in is tap t of output p_out
    for a 3x3 / stride-2 / pad-1 conv on an (h, w) single-channel image."""
    ho, wo = h // 2, w // 2
    n_out = ho * wo
    po = np.arange(n_out)
    io, jo = po // wo, po % wo
    s1t = np.zeros((9, h * w, n_out), np.float32)
    for dy in range(3):
        for dx in range(3):
            r = 2 * io + dy - 1
            c = 2 * jo + dx - 1
            ok = (r >= 0) & (r < h) & (c >= 0) & (c < w)
            s1t[dy * 3 + dx, (r * w + c)[ok], po[ok]] = 1.0
    return s1t


def _shift_matrices(ho, wo):
    """st[t, p_in, p_out] = 1 iff input position p_in is tap t of output p_out
    for a 3x3 / stride-1 / pad-1 conv on an (ho, wo) grid."""
    n = ho * wo
    po = np.arange(n)
    io, jo = po // wo, po % wo
    st = np.zeros((9, n, n), np.float32)
    for dy in range(3):
        for dx in range(3):
            ii = io + dy - 1
            jj = jo + dx - 1
            ok = (ii >= 0) & (ii < ho) & (jj >= 0) & (jj < wo)
            st[dy * 3 + dx, (ii * wo + jj)[ok], po[ok]] = 1.0
    return st


def _upsample_matrix(ho, wo):
    """v[q, p] = 1 iff low-res pixel q is the nearest source of hi-res pixel p
    (2x nearest-neighbour upsample), row-major flattening."""
    hu, wu = 2 * ho, 2 * wo
    p = np.arange(hu * wu)
    r, s = p // wu, p % wu
    v = np.zeros((ho * wo, hu * wu), np.float32)
    v[(r // 2) * wo + (s // 2), p] = 1.0
    return v


# ---------------------------------------------------------------------------
# Weight / constant preparation (done once, outside the forward path).
# Folds conv weights (and the final 2x upsample) into per-layer fused
# matrices so every layer is a single matmul on a flattened activation.
# ---------------------------------------------------------------------------
_VMEM_CONST_BUDGET = 24 * 1024 * 1024  # conservative across v5e/v6e/v7x


def prepare_params(params, h, w):
    assert h % 2 == 0 and w % 2 == 0
    ho, wo = h // 2, w // 2
    p = ho * wo

    s1t = _conv1_gather_matrices(h, w)          # (9, H*W, P)
    st = _shift_matrices(ho, wo)                # (9, P, P)
    v = _upsample_matrix(ho, wo)                # (P, 4P)

    def fuse(wt, shifts):
        # wt: (Cout, Cin, 3, 3) f32, shifts: (9, Pin, Pout)
        # K[ci*Pin + pi, co*Pout + q] = sum_t W[co, ci, t] * S_t[pi, q]
        # Each entry is at most ONE weight value (taps never collide), so the
        # bf16 cast of K is exactly the bf16 cast of the weights.
        co, ci, _, _ = wt.shape
        w9 = np.transpose(np.asarray(wt, np.float32), (2, 3, 0, 1)).reshape(9, co, ci)
        k = np.einsum("toi,tpq->ipoq", w9, shifts)          # (ci, Pin, co, Pout)
        return k.reshape(ci * shifts.shape[1], co * shifts.shape[2])

    k1 = fuse(np.asarray(params["w1"]), s1t)                # (H*W, 16*P)
    k2 = fuse(np.asarray(params["w2"]), st)                 # (16*P, 8*P)
    k3 = fuse(np.asarray(params["w3"]), st)                 # (8*P, 16*P)
    k4 = fuse(np.asarray(params["w4"]), st) @ v             # (16*P, 4*P)  upsample folded

    const_bytes = 2 * (k1.size + k2.size + k3.size + k4.size)   # bf16
    assert const_bytes < _VMEM_CONST_BUDGET, (
        f"fused selection matrices ({const_bytes/2**20:.1f} MiB) exceed VMEM budget; "
        "use a row-tiled shifted-window kernel for large images")

    def bias_row(b, reps):
        # lane-dense (1, Cout*reps) f32 row; index = co*reps + q
        return jnp.asarray(np.repeat(np.asarray(b, np.float32), reps)[None, :])

    return dict(
        k1=jnp.asarray(k1, jnp.bfloat16),
        k2=jnp.asarray(k2, jnp.bfloat16),
        k3=jnp.asarray(k3, jnp.bfloat16),
        k4=jnp.asarray(k4, jnp.bfloat16),
        b1=bias_row(params["b1"], p),
        b2=bias_row(params["b2"], p),
        b3=bias_row(params["b3"], p),
        b4=bias_row(params["b4"], 4 * p),
    )


# ---------------------------------------------------------------------------
# Fused Pallas kernel: whole network for a batch tile per grid step.
# ---------------------------------------------------------------------------
def _fused_autoencoder_kernel(x_ref, k1_ref, k2_ref, k3_ref, k4_ref,
                              b1_ref, b2_ref, b3_ref, b4_ref, o_ref):
    f32, bf16 = jnp.float32, jnp.bfloat16

    x = x_ref[...]                                                  # (B, H*W) bf16

    # conv1 (1->16, s2, p1) + ReLU    (MaxPool2d(1,1) is the identity)
    a = jnp.maximum(
        jnp.dot(x, k1_ref[...], preferred_element_type=f32) + b1_ref[...], 0.0)
    # conv2 (16->8, s1, p1) + ReLU
    a = jnp.maximum(
        jnp.dot(a.astype(bf16), k2_ref[...], preferred_element_type=f32)
        + b2_ref[...], 0.0)
    # conv3 (8->16, s1, p1) + ReLU
    a = jnp.maximum(
        jnp.dot(a.astype(bf16), k3_ref[...], preferred_element_type=f32)
        + b3_ref[...], 0.0)
    # conv4 (16->1, s1, p1) + ReLU, with 2x nearest upsample folded into K4
    o_ref[...] = jnp.maximum(
        jnp.dot(a.astype(bf16), k4_ref[...], preferred_element_type=f32)
        + b4_ref[...], 0.0)                                         # (B, 4P) f32


# ---------------------------------------------------------------------------
# Wrapper: single pallas_call, grid over batch tiles.
# ---------------------------------------------------------------------------
def _round_up(x, m):
    return (x + m - 1) // m * m


@jax.jit
def autoencoder_forward(x_nchw, prep):
    n, c, h, w = x_nchw.shape
    assert c == 1 and h % 2 == 0 and w % 2 == 0
    p_in = h * w
    ho, wo = h // 2, w // 2
    p_up = (2 * ho) * (2 * wo)

    # Batch tile: multiple of 8 sublanes, up to 64 images per grid step.
    b_tile = min(64, _round_up(n, 8))
    n_blocks = _round_up(n, b_tile) // b_tile
    if n_blocks > 1 and n_blocks % 2:       # keep grid even for v7x's 2 TCs
        n_blocks += 1
    n_pad = n_blocks * b_tile

    x_flat = x_nchw.reshape(n, p_in).astype(jnp.bfloat16)
    if n_pad != n:
        x_flat = jnp.pad(x_flat, ((0, n_pad - n), (0, 0)))

    out = pl.pallas_call(
        _fused_autoencoder_kernel,
        out_shape=jax.ShapeDtypeStruct((n_pad, p_up), jnp.float32),
        grid=(n_blocks,),
        in_specs=[
            pl.BlockSpec((b_tile, p_in), lambda i: (i, 0)),          # x batch tile
            pl.BlockSpec(prep["k1"].shape, lambda i: (0, 0)),        # fused conv1
            pl.BlockSpec(prep["k2"].shape, lambda i: (0, 0)),        # fused conv2
            pl.BlockSpec(prep["k3"].shape, lambda i: (0, 0)),        # fused conv3
            pl.BlockSpec(prep["k4"].shape, lambda i: (0, 0)),        # fused conv4+upsample
            pl.BlockSpec(prep["b1"].shape, lambda i: (0, 0)),
            pl.BlockSpec(prep["b2"].shape, lambda i: (0, 0)),
            pl.BlockSpec(prep["b3"].shape, lambda i: (0, 0)),
            pl.BlockSpec(prep["b4"].shape, lambda i: (0, 0)),
        ],
        out_specs=pl.BlockSpec((b_tile, p_up), lambda i: (i, 0)),
        compiler_params=pltpu.CompilerParams(
            dimension_semantics=("parallel",),
            vmem_limit_bytes=32 * 1024 * 1024),
    )(x_flat, prep["k1"], prep["k2"], prep["k3"], prep["k4"],
      prep["b1"], prep["b2"], prep["b3"], prep["b4"])

    return out[:n].reshape(n, 1, 2 * ho, 2 * wo)


# ---------------------------------------------------------------------------
# Pure-JAX f32 reference (silent correctness check).
# ---------------------------------------------------------------------------
def _ref_forward(x, p):
    def conv(x, w, b, stride):
        out = lax.conv_general_dilated(
            x, w, window_strides=(stride, stride), padding=((1, 1), (1, 1)),
            dimension_numbers=("NCHW", "OIHW", "NCHW"))
        return jnp.maximum(out + b.reshape(1, -1, 1, 1), 0.0)

    y = conv(x, p["w1"], p["b1"], 2)
    y = conv(y, p["w2"], p["b2"], 1)
    y = conv(y, p["w3"], p["b3"], 1)
    y = conv(y, p["w4"], p["b4"], 1)
    return jnp.repeat(jnp.repeat(y, 2, axis=2), 2, axis=3)


# ---------------------------------------------------------------------------
# Deterministic parameter init (PyTorch Conv2d weight layout: OIHW)
# ---------------------------------------------------------------------------
def init_params(key):
    shapes = {
        "w1": (16, 1, 3, 3),  "b1": (16,),
        "w2": (8, 16, 3, 3),  "b2": (8,),
        "w3": (16, 8, 3, 3),  "b3": (16,),
        "w4": (1, 16, 3, 3),  "b4": (1,),
    }
    params = {}
    keys = jax.random.split(key, len(shapes))
    for k, (name, shape) in zip(keys, sorted(shapes.items())):
        scale = 0.1 if name.startswith("w") else 0.01
        params[name] = scale * jax.random.normal(k, shape, dtype=jnp.float32)
    return params


if __name__ == "__main__":
    key = jax.random.PRNGKey(0)
    pkey, xkey = jax.random.split(key)
    params = init_params(pkey)

    # small input consistent with the module: NCHW, 1 input channel
    x = jax.random.normal(xkey, (2, 1, 16, 16), dtype=jnp.float32)

    prep = prepare_params(params, 16, 16)   # weight folding done once

    out = jax.block_until_ready(autoencoder_forward(x, prep))
    assert out.shape == (2, 1, 16, 16), out.shape

    # silent check vs f32 reference (kernel uses bf16 MXU operands -> loose tol)
    ref = jax.block_until_ready(_ref_forward(x, params))
    assert jnp.allclose(out, ref, atol=3e-2, rtol=3e-2), \
        float(jnp.max(jnp.abs(out - ref)))

    print("KERNEL_OK")
</pallas_src>

<mosaic_0001>
module attributes {stable_mosaic.version = 11 : i64} {
  func.func @_fused_autoencoder_kernel(%arg0: i32, %arg1: memref<8x256xbf16, #tpu.memory_space<vmem>>, %arg2: memref<256x1024xbf16, #tpu.memory_space<vmem>>, %arg3: memref<1024x512xbf16, #tpu.memory_space<vmem>>, %arg4: memref<512x1024xbf16, #tpu.memory_space<vmem>>, %arg5: memref<1024x256xbf16, #tpu.memory_space<vmem>>, %arg6: memref<1x1024xf32, #tpu.memory_space<vmem>>, %arg7: memref<1x512xf32, #tpu.memory_space<vmem>>, %arg8: memref<1x1024xf32, #tpu.memory_space<vmem>>, %arg9: memref<1x256xf32, #tpu.memory_space<vmem>>, %arg10: memref<8x256xf32, #tpu.memory_space<vmem>>) attributes {dimension_semantics = [#tpu.dimension_semantics<parallel>], iteration_bounds = array<i64: 1>, scalar_prefetch = 0 : i64, scratch_operands = 0 : i64, tpu.core_type = #tpu.core_type<tc>, window_params = [{transform_indices = @transform_0, window_bounds = array<i64: 8, 256>}, {pipeline_mode = #tpu.pipeline_mode<synchronous>, transform_indices = @transform_1, window_bounds = array<i64: 256, 1024>}, {pipeline_mode = #tpu.pipeline_mode<synchronous>, transform_indices = @transform_2, window_bounds = array<i64: 1024, 512>}, {pipeline_mode = #tpu.pipeline_mode<synchronous>, transform_indices = @transform_3, window_bounds = array<i64: 512, 1024>}, {pipeline_mode = #tpu.pipeline_mode<synchronous>, transform_indices = @transform_4, window_bounds = array<i64: 1024, 256>}, {pipeline_mode = #tpu.pipeline_mode<synchronous>, transform_indices = @transform_5, window_bounds = array<i64: 1, 1024>}, {pipeline_mode = #tpu.pipeline_mode<synchronous>, transform_indices = @transform_6, window_bounds = array<i64: 1, 512>}, {pipeline_mode = #tpu.pipeline_mode<synchronous>, transform_indices = @transform_7, window_bounds = array<i64: 1, 1024>}, {pipeline_mode = #tpu.pipeline_mode<synchronous>, transform_indices = @transform_8, window_bounds = array<i64: 1, 256>}, {transform_indices = @transform_9, window_bounds = array<i64: 8, 256>}]} {
    %c0 = arith.constant 0 : index
    %c0_0 = arith.constant 0 : index
    %0 = vector.load %arg1[%c0, %c0_0] : memref<8x256xbf16, #tpu.memory_space<vmem>>, vector<8x256xbf16>
    %c0_1 = arith.constant 0 : index
    %c0_2 = arith.constant 0 : index
    %1 = vector.load %arg2[%c0_1, %c0_2] : memref<256x1024xbf16, #tpu.memory_space<vmem>>, vector<256x1024xbf16>
    %cst = arith.constant dense<0.000000e+00> : vector<8x1024xf32>
    %2 = tpu.matmul %0, %1, %cst {dimension_numbers = #tpu.dot_dimension_numbers<[1], [0], [0], [1], [0, 0, 1, 1], [], []>} : vector<8x256xbf16>, vector<256x1024xbf16>, vector<8x1024xf32> -> vector<8x1024xf32>
    %c0_3 = arith.constant 0 : index
    %c0_4 = arith.constant 0 : index
    %3 = vector.load %arg6[%c0_3, %c0_4] : memref<1x1024xf32, #tpu.memory_space<vmem>>, vector<1x1024xf32>
    %4 = vector.broadcast %3 : vector<1x1024xf32> to vector<8x1024xf32>
    %5 = arith.addf %2, %4 : vector<8x1024xf32>
    %cst_5 = arith.constant 0.000000e+00 : f32
    %6 = vector.broadcast %cst_5 : f32 to vector<8x1024xf32>
    %7 = arith.maximumf %5, %6 : vector<8x1024xf32>
    %8 = arith.truncf %7 : vector<8x1024xf32> to vector<8x1024xbf16>
    %c0_6 = arith.constant 0 : index
    %c0_7 = arith.constant 0 : index
    %9 = vector.load %arg3[%c0_6, %c0_7] : memref<1024x512xbf16, #tpu.memory_space<vmem>>, vector<1024x512xbf16>
    %cst_8 = arith.constant dense<0.000000e+00> : vector<8x512xf32>
    %10 = tpu.matmul %8, %9, %cst_8 {dimension_numbers = #tpu.dot_dimension_numbers<[1], [0], [0], [1], [0, 0, 1, 1], [], []>} : vector<8x1024xbf16>, vector<1024x512xbf16>, vector<8x512xf32> -> vector<8x512xf32>
    %c0_9 = arith.constant 0 : index
    %c0_10 = arith.constant 0 : index
    %11 = vector.load %arg7[%c0_9, %c0_10] : memref<1x512xf32, #tpu.memory_space<vmem>>, vector<1x512xf32>
    %12 = vector.broadcast %11 : vector<1x512xf32> to vector<8x512xf32>
    %13 = arith.addf %10, %12 : vector<8x512xf32>
    %cst_11 = arith.constant 0.000000e+00 : f32
    %14 = vector.broadcast %cst_11 : f32 to vector<8x512xf32>
    %15 = arith.maximumf %13, %14 : vector<8x512xf32>
    %16 = arith.truncf %15 : vector<8x512xf32> to vector<8x512xbf16>
    %c0_12 = arith.constant 0 : index
    %c0_13 = arith.constant 0 : index
    %17 = vector.load %arg4[%c0_12, %c0_13] : memref<512x1024xbf16, #tpu.memory_space<vmem>>, vector<512x1024xbf16>
    %cst_14 = arith.constant dense<0.000000e+00> : vector<8x1024xf32>
    %18 = tpu.matmul %16, %17, %cst_14 {dimension_numbers = #tpu.dot_dimension_numbers<[1], [0], [0], [1], [0, 0, 1, 1], [], []>} : vector<8x512xbf16>, vector<512x1024xbf16>, vector<8x1024xf32> -> vector<8x1024xf32>
    %c0_15 = arith.constant 0 : index
    %c0_16 = arith.constant 0 : index
    %19 = vector.load %arg8[%c0_15, %c0_16] : memref<1x1024xf32, #tpu.memory_space<vmem>>, vector<1x1024xf32>
    %20 = vector.broadcast %19 : vector<1x1024xf32> to vector<8x1024xf32>
    %21 = arith.addf %18, %20 : vector<8x1024xf32>
    %cst_17 = arith.constant 0.000000e+00 : f32
    %22 = vector.broadcast %cst_17 : f32 to vector<8x1024xf32>
    %23 = arith.maximumf %21, %22 : vector<8x1024xf32>
    %24 = arith.truncf %23 : vector<8x1024xf32> to vector<8x1024xbf16>
    %c0_18 = arith.constant 0 : index
    %c0_19 = arith.constant 0 : index
    %25 = vector.load %arg5[%c0_18, %c0_19] : memref<1024x256xbf16, #tpu.memory_space<vmem>>, vector<1024x256xbf16>
    %cst_20 = arith.constant dense<0.000000e+00> : vector<8x256xf32>
    %26 = tpu.matmul %24, %25, %cst_20 {dimension_numbers = #tpu.dot_dimension_numbers<[1], [0], [0], [1], [0, 0, 1, 1], [], []>} : vector<8x1024xbf16>, vector<1024x256xbf16>, vector<8x256xf32> -> vector<8x256xf32>
    %c0_21 = arith.constant 0 : index
    %c0_22 = arith.constant 0 : index
    %27 = vector.load %arg9[%c0_21, %c0_22] : memref<1x256xf32, #tpu.memory_space<vmem>>, vector<1x256xf32>
    %28 = vector.broadcast %27 : vector<1x256xf32> to vector<8x256xf32>
    %29 = arith.addf %26, %28 : vector<8x256xf32>
    %cst_23 = arith.constant 0.000000e+00 : f32
    %30 = vector.broadcast %cst_23 : f32 to vector<8x256xf32>
    %31 = arith.maximumf %29, %30 : vector<8x256xf32>
    %c0_24 = arith.constant 0 : index
    %c0_25 = arith.constant 0 : index
    %32 = vector.load %arg10[%c0_24, %c0_25] : memref<8x256xf32, #tpu.memory_space<vmem>>, vector<8x256xf32>
    tpu.vector_store %arg10[%c0_24, %c0_25], %31 {strides = array<i32>} : memref<8x256xf32, #tpu.memory_space<vmem>>, vector<8x256xf32>,
    return
  }
  func.func @transform_0(%arg0: i32) -> (i32, i32) {
    %c0_i32 = arith.constant 0 : i32
    %c0_i32_0 = arith.constant 0 : i32
    return %arg0, %c0_i32 : i32, i32
  }
  func.func @transform_1(%arg0: i32) -> (i32, i32) {
    %c0_i32 = arith.constant 0 : i32
    %c0_i32_0 = arith.constant 0 : i32
    %c0_i32_1 = arith.constant 0 : i32
    return %c0_i32, %c0_i32_0 : i32, i32
  }
  func.func @transform_2(%arg0: i32) -> (i32, i32) {
    %c0_i32 = arith.constant 0 : i32
    %c0_i32_0 = arith.constant 0 : i32
    %c0_i32_1 = arith.constant 0 : i32
    return %c0_i32, %c0_i32_0 : i32, i32
  }
  func.func @transform_3(%arg0: i32) -> (i32, i32) {
    %c0_i32 = arith.constant 0 : i32
    %c0_i32_0 = arith.constant 0 : i32
    %c0_i32_1 = arith.constant 0 : i32
    return %c0_i32, %c0_i32_0 : i32, i32
  }
  func.func @transform_4(%arg0: i32) -> (i32, i32) {
    %c0_i32 = arith.constant 0 : i32
    %c0_i32_0 = arith.constant 0 : i32
    %c0_i32_1 = arith.constant 0 : i32
    return %c0_i32, %c0_i32_0 : i32, i32
  }
  func.func @transform_5(%arg0: i32) -> (i32, i32) {
    %c0_i32 = arith.constant 0 : i32
    %c0_i32_0 = arith.constant 0 : i32
    %c0_i32_1 = arith.constant 0 : i32
    return %c0_i32, %c0_i32_0 : i32, i32
  }
  func.func @transform_6(%arg0: i32) -> (i32, i32) {
    %c0_i32 = arith.constant 0 : i32
    %c0_i32_0 = arith.constant 0 : i32
    %c0_i32_1 = arith.constant 0 : i32
    return %c0_i32, %c0_i32_0 : i32, i32
  }
  func.func @transform_7(%arg0: i32) -> (i32, i32) {
    %c0_i32 = arith.constant 0 : i32
    %c0_i32_0 = arith.constant 0 : i32
    %c0_i32_1 = arith.constant 0 : i32
    return %c0_i32, %c0_i32_0 : i32, i32
  }
  func.func @transform_8(%arg0: i32) -> (i32, i32) {
    %c0_i32 = arith.constant 0 : i32
    %c0_i32_0 = arith.constant 0 : i32
    %c0_i32_1 = arith.constant 0 : i32
    return %c0_i32, %c0_i32_0 : i32, i32
  }
  func.func @transform_9(%arg0: i32) -> (i32, i32) {
    %c0_i32 = arith.constant 0 : i32
    %c0_i32_0 = arith.constant 0 : i32
    return %arg0, %c0_i32 : i32, i32
  }
}

</mosaic_0001>

<bundles_post_ra>
// kernel: autoencoder_forward.1
= control target key start
LH: loop header
LB: loop body
LE: loop exit
PB: predicated region body
PF: predicated region fallthrough
CT: control target
= control target key end

     0   :  { %14 = vsyncpa [#allocation3], 0  ;;  %s7651_s0 = inlined_call_operand.vmem [shape: bf16[8,256], index: 0, kind: input, shape index: {}]   ;;  %s7652_s1 = inlined_call_operand.hbm [shape: bf16[256,1024], index: 1, kind: input, shape index: {}]   ;;  %s7653_s2 = inlined_call_operand.hbm [shape: bf16[1024,512], index: 2, kind: input, shape index: {}]   ;;  %s7654_s3 = inlined_call_operand.hbm [shape: bf16[512,1024], index: 3, kind: input, shape index: {}]   ;;  %s7655_s4 = inlined_call_operand.hbm [shape: bf16[1024,256], index: 4, kind: input, shape index: {}]   ;;  %s7656_s5 = inlined_call_operand.vmem [shape: f32[1,1024], index: 5, kind: input, shape index: {}]   ;;  %s7657_s6 = inlined_call_operand.vmem [shape: f32[1,512], index: 6, kind: input, shape index: {}]   ;;  %s7658_s7 = inlined_call_operand.vmem [shape: f32[1,1024], index: 7, kind: input, shape index: {}]   ;;  %s7659_s8 = inlined_call_operand.vmem [shape: f32[1,256], index: 8, kind: input, shape index: {}]   ;;  %s7660_s9 = inlined_call_operand.vmem [shape: f32[8,256], index: 9, kind: output, shape index: {}]  }
   0x1   :  { %15 = vsyncpa [#allocation5], 0 }
   0x2   :  { %16 = vsyncpa [#allocation8], 0  ;;  %s7374_s30 = smov [#allocation4]   ;;  %s7280_s13 = scalar_lea.hbm %s7653_s2, 32768 }
   0x3   :  { %s36_s10 = sshll.u32 %s7374_s30, 4  ;;  %p7281_p0 = scmp.ne.s32.totalorder %s7653_s2, %s7280_s13  ;;  %s37_s10 = int_to_ptr.vmem [resolvable:$true] %s36_s10 }
   0x4   :  { %p7284_p1 = scmp.lt.u32.totalorder %s7280_s13, %s7653_s2 }
   0x6   :  { %p7286_p2 = pnand %p7284_p1, %p7281_p0 }
   0x8   :  { %7289 = shalt.err (!%p7286_p2)
}
   0x9   :  { %s7290_s18 = scalar_lea.vmem %s37_s10, 32768  ;;  %p7295_p4 = scmp.lt.s32.totalorder %s37_s10, %s37_s10 }
   0xa   :  { %p7291_p3 = scmp.ne.s32.totalorder %s37_s10, %s7290_s18  ;;  %p7296_p5 = scmp.lt.s32.totalorder %s7290_s18, %s7290_s18 }
   0xc   :  { %p7297_p6 = por %p7296_p5, %p7295_p4 }
   0xe   :  { %p7298_p7 = pnand %p7297_p6, %p7291_p3 }
  0x10   :  { %7301 = shalt.err (!%p7298_p7)
}
  0x11   :  { %s7375_s19 = smov 256   ;;  %s7376_s20 = smov 16  }
  0x12   :  { %42 = dma.hbm_to_vmem [thread:$0]  %s7653_s2, 32768, %s37_s10, [#allocation5], %s7375_s19, %s7375_s19, %s7376_s20  }
  0x13   :  { %s7377_s23 = smov [#allocation2]   ;;  %s7302_s27 = scalar_lea.hbm %s7652_s1, 16384 }
  0x14   :  { %s24_s24 = sshll.u32 %s7377_s23, 4  ;;  %p7303_p8 = scmp.ne.s32.totalorder %s7652_s1, %s7302_s27  ;;  %s25_s24 = int_to_ptr.vmem [resolvable:$true] %s24_s24 }
  0x15   :  { %p7306_p9 = scmp.lt.u32.totalorder %s7302_s27, %s7652_s1 }
  0x17   :  { %p7308_p10 = pnand %p7306_p9, %p7303_p8 }
  0x19   :  { %7311 = shalt.err (!%p7308_p10)
}
  0x1a   :  { %s7312_s12 = scalar_lea.vmem %s25_s24, 16384  ;;  %p7317_p12 = scmp.lt.s32.totalorder %s25_s24, %s25_s24 }
  0x1b   :  { %p7313_p11 = scmp.ne.s32.totalorder %s25_s24, %s7312_s12  ;;  %p7318_p13 = scmp.lt.s32.totalorder %s7312_s12, %s7312_s12 }
  0x1d   :  { %p7319_p0 = por %p7318_p13, %p7317_p12 }
  0x1f   :  { %p7320_p1 = pnand %p7319_p0, %p7313_p11 }
  0x21   :  { %7323 = shalt.err (!%p7320_p1)
}
  0x22   :  { %s7378_s2 = smov 512   ;;  %s7379_s10 = smov 32  }
  0x23   :  { %30 = dma.hbm_to_vmem [thread:$0]  %s7652_s1, 16384, %s25_s24, [#allocation3], %s7378_s2, %s7378_s2, %s7379_s10  }
  0x24   :  { %s7380_s15 = smov [#allocation6]   ;;  %s7381_s17 = smov [#allocation7]  }
  0x25   :  { %s48_s16 = sshll.u32 %s7380_s15, 4  ;;  %s60_s18 = sshll.u32 %s7381_s17, 4  ;;  %s49_s16 = int_to_ptr.vmem [resolvable:$true] %s48_s16  ;;  %s7458_s18 = int_to_ptr.vmem [resolvable:$true] %s60_s18 }
  0x26   :  { %s7324_s21 = scalar_lea.hbm %s7654_s3, 32768 }
  0x27   :  { %p7325_p2 = scmp.ne.s32.totalorder %s7654_s3, %s7324_s21  ;;  %p7328_p3 = scmp.lt.u32.totalorder %s7324_s21, %s7654_s3 }
  0x29   :  { %p7330_p4 = pnand %p7328_p3, %p7325_p2 }
  0x2b   :  { %7333 = shalt.err (!%p7330_p4)
}
  0x2c   :  { %s7334_s1 = scalar_lea.vmem %s49_s16, 32768  ;;  %p7339_p6 = scmp.lt.s32.totalorder %s49_s16, %s49_s16 }
  0x2d   :  { %p7335_p5 = scmp.ne.s32.totalorder %s49_s16, %s7334_s1  ;;  %p7340_p7 = scmp.lt.s32.totalorder %s7334_s1, %s7334_s1 }
  0x2f   :  { %p7341_p8 = por %p7340_p7, %p7339_p6 }
  0x31   :  { %p7342_p9 = pnand %p7341_p8, %p7335_p5 }
  0x33   :  { %7345 = shalt.err (!%p7342_p9)
}
  0x34   :  { %54 = dma.hbm_to_vmem [thread:$0]  %s7654_s3, 32768, %s49_s16, [#allocation5], %s7378_s2, %s7378_s2, %s7379_s10  }
  0x35   :  { %s7346_s30 = scalar_lea.hbm %s7655_s4, 16384 }
  0x36   :  { %p7347_p10 = scmp.ne.s32.totalorder %s7655_s4, %s7346_s30  ;;  %p7350_p11 = scmp.lt.u32.totalorder %s7346_s30, %s7655_s4 }
  0x38   :  { %p7352_p12 = pnand %p7350_p11, %p7347_p10 }
  0x3a   :  { %7355 = shalt.err (!%p7352_p12)
}
  0x3b   :  { %s7356_s15 = scalar_lea.vmem %s7458_s18, 16384  ;;  %p7361_p0 = scmp.lt.s32.totalorder %s7458_s18, %s7458_s18 }
  0x3c   :  { %p7357_p13 = scmp.ne.s32.totalorder %s7458_s18, %s7356_s15  ;;  %p7362_p1 = scmp.lt.s32.totalorder %s7356_s15, %s7356_s15 }
  0x3e   :  { %p7363_p2 = por %p7362_p1, %p7361_p0 }
  0x40   :  { %p7364_p3 = pnand %p7363_p2, %p7357_p13 }
  0x42   :  { %7367 = shalt.err (!%p7364_p3)
}
  0x43   :  { %s7382_s3 = smov 128   ;;  %s7383_s2 = smov 8  }
  0x44   :  { %66 = dma.hbm_to_vmem [thread:$0]  %s7655_s4, 16384, %s7458_s18, [#allocation8], %s7382_s3, %s7382_s3, %s7383_s2  }
  0x45   :  { %7368 = dma.done.wait [#allocation3], 16384  }
  0x46   :  { %7369 = vsyncadd [#allocation3], 4294950912 }
  0x47   :  { %7370 = dma.done.wait [#allocation5], 65536  }
  0x48   :  { %7371 = vsyncadd [#allocation5], 4294901760 }
  0x49   :  { %7372 = dma.done.wait [#allocation8], 16384  }
  0x4a   :  { %7373 = vsyncadd [#allocation8], 4294950912  ;;  %v88_v0 = vld [vmem:[#allocation2] sm:$0xff] }
  0x4b   :  { %v92_v1 = vld [vmem:[#allocation2 + $0x20] sm:$0xff] }
  0x4c   :  { %v96_v2 = vld [vmem:[#allocation2 + $0x40] sm:$0xff]  ;;  %v5859_v3 = vcombine.high %v88_v0, %v92_v1  ;;  %v5858_v4 = vcombine.low %v88_v0, %v92_v1  ;;  %v89_v0 = vld [vmem:[#allocation2 + $0x8] sm:$0xff] }
  0x4d   :  { %v100_v5 = vld [vmem:[#allocation2 + $0x60] sm:$0xff]  ;;  %v93_v1 = vld [vmem:[#allocation2 + $0x28] sm:$0xff] }
  0x4e   :  { %v5867_v6 = vcombine.high %v96_v2, %v100_v5  ;;  %v104_v7 = vld [vmem:[#allocation2 + $0x80] sm:$0xff]  ;;  %905 = vmatprep.subr.bf16.mxu1 %v5859_v3  ;;  %v5866_v9 = vcombine.low %v96_v2, %v100_v5  ;;  %v101_v5 = vld [vmem:[#allocation2 + $0x68] sm:$0xff] }
  0x4f   :  { %v108_v8 = vld [vmem:[#allocation2 + $0xa0] sm:$0xff]  ;;  %906 = vmatpush1.bf16.msra.mxu1 %v5858_v4  ;;  %v97_v4 = vld [vmem:[#allocation2 + $0x48] sm:$0xff] }
  0x50   :  { %907 = vmatprep.subr.bf16.mxu1 %v5867_v6  ;;  %v5875_v10 = vcombine.high %v104_v7, %v108_v8  ;;  %v112_v11 = vld [vmem:[#allocation2 + $0xc0] sm:$0xff]  ;;  %v5874_v13 = vcombine.low %v104_v7, %v108_v8  ;;  %v5861_v6 = vcombine.high %v89_v0, %v93_v1  ;;  %v5860_v8 = vcombine.low %v89_v0, %v93_v1 }
  0x51   :  { %v116_v12 = vld [vmem:[#allocation2 + $0xe0] sm:$0xff] }
  0x52   :  { %v5883_v14 = vcombine.high %v112_v11, %v116_v12  ;;  %v120_v15 = vld [vmem:[#allocation2 + $0x100] sm:$0xff]  ;;  %v5882_v19 = vcombine.low %v112_v11, %v116_v12  ;;  %v5869_v11 = vcombine.high %v97_v4, %v101_v5  ;;  %v5868_v12 = vcombine.low %v97_v4, %v101_v5  ;;  %v201_v4 = vld [vmem:[#allocation2 + $0x388] sm:$0xff] }
  0x53   :  { %908 = vmatpush1.bf16.msra.mxu1 %v5866_v9  ;;  %v124_v16 = vld [vmem:[#allocation2 + $0x120] sm:$0xff]  ;;  %v105_v9 = vld [vmem:[#allocation2 + $0x88] sm:$0xff] }
  0x54   :  { %909 = vmatprep.subr.bf16.mxu1 %v5875_v10  ;;  %v7492_v17 = vld [vmem:[%s7651_s0] sm:$0xff]  ;;  %v5891_v20 = vcombine.high %v120_v15, %v124_v16  ;;  %v5890_v23 = vcombine.low %v120_v15, %v124_v16  ;;  %v109_v10 = vld [vmem:[#allocation2 + $0xa8] sm:$0xff] }
  0x55   :  { %v7496_v18 = vcombine.high %v7492_v17, %v7492_v17  ;;  %v128_v21 = vld [vmem:[#allocation2 + $0x140] sm:$0xff]  ;;  %v7501_v7 = vcombine.low %v7492_v17, %v7492_v17  ;;  %v5877_v15 = vcombine.high %v105_v9, %v109_v10  ;;  %v5876_v16 = vcombine.low %v105_v9, %v109_v10  ;;  %v121_v17 = vld [vmem:[#allocation2 + $0x108] sm:$0xff] }
  0x56   :  { %v132_v22 = vld [vmem:[#allocation2 + $0x160] sm:$0xff]  ;;  %v205_v5 = vld [vmem:[#allocation2 + $0x3a8] sm:$0xff] }
  0x57   :  { %910 = vmatpush1.bf16.msra.mxu1 %v5874_v13  ;;  %937 = vmatprep.mubr.bf16.mxu1 %v7496_v18  ;;  %v5899_v24 = vcombine.high %v128_v21, %v132_v22  ;;  %v136_v25 = vld [vmem:[#allocation2 + $0x180] sm:$0xff]  ;;  %v5898_v27 = vcombine.low %v128_v21, %v132_v22  ;;  %v113_v13 = vld [vmem:[#allocation2 + $0xc8] sm:$0xff] }
  0x58   :  { %911 = vmatprep.subr.bf16.mxu1 %v5883_v14  ;;  %v140_v26 = vld [vmem:[#allocation2 + $0x1a0] sm:$0xff]  ;;  %v117_v14 = vld [vmem:[#allocation2 + $0xe8] sm:$0xff] }
  0x59   :  { %v5907_v28 = vcombine.high %v136_v25, %v140_v26  ;;  %v144_v29 = vld [vmem:[#allocation2 + $0x1c0] sm:$0xff]  ;;  %v5906_v31 = vcombine.low %v136_v25, %v140_v26  ;;  %v5884_v21 = vcombine.low %v113_v13, %v117_v14  ;;  %v129_v22 = vld [vmem:[#allocation2 + $0x148] sm:$0xff] }
  0x5a   :  { %v148_v30 = vld [vmem:[#allocation2 + $0x1e0] sm:$0xff]  ;;  %v137_v26 = vld [vmem:[#allocation2 + $0x188] sm:$0xff] }
  0x5b   :  { %912 = vmatpush1.bf16.msra.mxu1 %v5882_v19  ;;  %v5915_v32 = vcombine.high %v144_v29, %v148_v30  ;;  %v152_v33 = vld [vmem:[#allocation2 + $0x200] sm:$0xff]  ;;  %v5914_v35 = vcombine.low %v144_v29, %v148_v30  ;;  %v125_v19 = vld [vmem:[#allocation2 + $0x128] sm:$0xff] }
  0x5c   :  { %913 = vmatprep.subr.bf16.mxu1 %v5891_v20  ;;  %v156_v34 = vld [vmem:[#allocation2 + $0x220] sm:$0xff]  ;;  %v5885_v20 = vcombine.high %v113_v13, %v117_v14  ;;  %v5892_v25 = vcombine.low %v121_v17, %v125_v19  ;;  %v145_v30 = vld [vmem:[#allocation2 + $0x1c8] sm:$0xff]  ;;  %v5973_v13 = vcombine.high %v201_v4, %v205_v5 }
  0x5d   :  { %v160_v36 = vld [vmem:[#allocation2 + $0x240] sm:$0xff]  ;;  %v5923_v38 = vcombine.high %v152_v33, %v156_v34  ;;  %v5922_v39 = vcombine.low %v152_v33, %v156_v34  ;;  %v153_v34 = vld [vmem:[#allocation2 + $0x208] sm:$0xff] }
  0x5e   :  { %v164_v37 = vld [vmem:[#allocation2 + $0x260] sm:$0xff] }
  0x5f   :  { %914 = vmatpush1.bf16.msra.mxu1 %v5890_v23  ;;  %v168_v40 = vld [vmem:[#allocation2 + $0x280] sm:$0xff]  ;;  %v5931_v42 = vcombine.high %v160_v36, %v164_v37  ;;  %v5930_v43 = vcombine.low %v160_v36, %v164_v37  ;;  %v133_v23 = vld [vmem:[#allocation2 + $0x168] sm:$0xff] }
  0x60   :  { %915 = vmatprep.subr.bf16.mxu1 %v5899_v24  ;;  %v172_v41 = vld [vmem:[#allocation2 + $0x2a0] sm:$0xff]  ;;  %v5893_v24 = vcombine.high %v121_v17, %v125_v19  ;;  %v5900_v29 = vcombine.low %v129_v22, %v133_v23  ;;  %v90_v17 = vld [vmem:[#allocation2 + $0x10] sm:$0xff] }
  0x61   :  { %v176_v44 = vld [vmem:[#allocation2 + $0x2c0] sm:$0xff]  ;;  %v5939_v46 = vcombine.high %v168_v40, %v172_v41  ;;  %v5938_v47 = vcombine.low %v168_v40, %v172_v41  ;;  %v94_v19 = vld [vmem:[#allocation2 + $0x30] sm:$0xff] }
  0x62   :  { %v180_v45 = vld [vmem:[#allocation2 + $0x2e0] sm:$0xff] }
  0x63   :  { %916 = vmatpush1.bf16.msra.mxu1 %v5898_v27  ;;  %v184_v48 = vld [vmem:[#allocation2 + $0x300] sm:$0xff]  ;;  %v5947_v50 = vcombine.high %v176_v44, %v180_v45  ;;  %v5946_v51 = vcombine.low %v176_v44, %v180_v45  ;;  %v141_v27 = vld [vmem:[#allocation2 + $0x1a8] sm:$0xff] }
  0x64   :  { %917 = vmatprep.subr.bf16.mxu1 %v5907_v28  ;;  %v188_v49 = vld [vmem:[#allocation2 + $0x320] sm:$0xff]  ;;  %v5901_v28 = vcombine.high %v129_v22, %v133_v23  ;;  %v5908_v33 = vcombine.low %v137_v26, %v141_v27  ;;  %v169_v44 = vld [vmem:[#allocation2 + $0x288] sm:$0xff] }
  0x65   :  { %v192_v52 = vld [vmem:[#allocation2 + $0x340] sm:$0xff]  ;;  %v5955_v54 = vcombine.high %v184_v48, %v188_v49  ;;  %v5954_v55 = vcombine.low %v184_v48, %v188_v49  ;;  %v173_v45 = vld [vmem:[#allocation2 + $0x2a8] sm:$0xff] }
  0x66   :  { %v196_v53 = vld [vmem:[#allocation2 + $0x360] sm:$0xff] }
  0x67   :  { %918 = vmatpush1.bf16.msra.mxu1 %v5906_v31  ;;  %v200_v56 = vld [vmem:[#allocation2 + $0x380] sm:$0xff]  ;;  %v5963_v58 = vcombine.high %v192_v52, %v196_v53  ;;  %v5962_v59 = vcombine.low %v192_v52, %v196_v53  ;;  %v149_v31 = vld [vmem:[#allocation2 + $0x1e8] sm:$0xff]  ;;  %v5941_v52 = vcombine.high %v169_v44, %v173_v45 }
  0x68   :  { %919 = vmatprep.subr.bf16.mxu1 %v5915_v32  ;;  %v204_v57 = vld [vmem:[#allocation2 + $0x3a0] sm:$0xff]  ;;  %v5909_v32 = vcombine.high %v137_v26, %v141_v27  ;;  %v5917_v36 = vcombine.high %v145_v30, %v149_v31  ;;  %v5916_v37 = vcombine.low %v145_v30, %v149_v31  ;;  %v5863_v26 = vcombine.high %v90_v17, %v94_v19  ;;  %v106_v31 = vld [vmem:[#allocation2 + $0x90] sm:$0xff] }
  0x69   :  { %v208_v60 = vld [vmem:[#allocation2 + $0x3c0] sm:$0xff]  ;;  %v5971_v62 = vcombine.high %v200_v56, %v204_v57  ;;  %v5970_v63 = vcombine.low %v200_v56, %v204_v57  ;;  %v185_v56 = vld [vmem:[#allocation2 + $0x308] sm:$0xff] }
  0x6a   :  { %v212_v61 = vld [vmem:[#allocation2 + $0x3e0] sm:$0xff]  ;;  %v189_v57 = vld [vmem:[#allocation2 + $0x328] sm:$0xff] }
  0x6b   :  { %920 = vmatpush1.bf16.msra.mxu1 %v5914_v35  ;;  %v5979_v2 = vcombine.high %v208_v60, %v212_v61  ;;  %v5978_v3 = vcombine.low %v208_v60, %v212_v61  ;;  %v157_v35 = vld [vmem:[#allocation2 + $0x228] sm:$0xff]  ;;  %v6704_v41 = vld [vmem:[#allocation4 + $0x4] ss:$16 sps:$4 sm:$0xff]   ;;  %v6709_v48 = vld [vmem:[#allocation4 + $0x20] ss:$16 sps:$4 sm:$0xff]   ;;  %v5957_v0 = vcombine.high %v185_v56, %v189_v57 }
  0x6c   :  { %921 = vmatprep.subr.bf16.mxu1 %v5923_v38  ;;  %v161_v38 = vld [vmem:[#allocation2 + $0x248] sm:$0xff]  ;;  %v5925_v40 = vcombine.high %v153_v34, %v157_v35  ;;  %2643 = vmatprep.subr.bf16.mxu0 %v6704_v41  ;;  %v6710_v53 = vld [vmem:[#allocation4 + $0x44] ss:$16 sps:$4 sm:$0xff]   ;;  %v6715_v60 = vld [vmem:[#allocation4 + $0x60] ss:$16 sps:$4 sm:$0xff]  }
  0x6d   :  { %v6716_v1 = vld [vmem:[#allocation4 + $0x84] ss:$16 sps:$4 sm:$0xff]   ;;  %v6721_v9 = vld [vmem:[#allocation4 + $0xa0] ss:$16 sps:$4 sm:$0xff]  }
  0x6e   :  { %v6722_v14 = vld [vmem:[#allocation4 + $0xc4] ss:$16 sps:$4 sm:$0xff]   ;;  %v6727_v22 = vld [vmem:[#allocation4 + $0xe0] ss:$16 sps:$4 sm:$0xff]  }
  0x6f   :  { %922 = vmatpush1.bf16.msra.mxu1 %v5922_v39  ;;  %v165_v39 = vld [vmem:[#allocation2 + $0x268] sm:$0xff]  ;;  %v6728_v27 = vld [vmem:[#allocation4 + $0x104] ss:$16 sps:$4 sm:$0xff]  }
  0x70   :  { %923 = vmatprep.subr.bf16.mxu1 %v5931_v42  ;;  %v6706_v42 = vld [vmem:[#allocation4] ss:$16 sps:$4 sm:$0xff]   ;;  %v5932_v49 = vcombine.low %v161_v38, %v165_v39 }
  0x71   :  { %2644 = vmatpush1.bf16.msra.mxu0 %v6706_v42  ;;  %v122_v42 = vld [vmem:[#allocation2 + $0x110] sm:$0xff] }
  0x73   :  { %924 = vmatpush1.bf16.msra.mxu1 %v5930_v43  ;;  %v5924_v43 = vcombine.low %v153_v34, %v157_v35  ;;  %v6736_v34 = vld [vmem:[#allocation4 + $0x120] ss:$16 sps:$4 sm:$0xff]  }
  0x74   :  { %925 = vmatprep.subr.bf16.mxu1 %v5939_v46  ;;  %v5933_v46 = vcombine.high %v161_v38, %v165_v39  ;;  %v6737_v38 = vld [vmem:[#allocation4 + $0x144] ss:$16 sps:$4 sm:$0xff]  }
  0x77   :  { %926 = vmatpush1.bf16.msra.mxu1 %v5938_v47  ;;  %v6707_v47 = vld [vmem:[#allocation4 + $0x24] ss:$16 sps:$4 sm:$0xff]  }
  0x78   :  { %927 = vmatprep.subr.bf16.mxu1 %v5947_v50  ;;  %2645 = vmatprep.subr.bf16.mxu0 %v6707_v47  ;;  %v177_v50 = vld [vmem:[#allocation2 + $0x2c8] sm:$0xff] }
  0x79   :  { %2646 = vmatpush1.bf16.msra.mxu0 %v6709_v48  ;;  %v130_v48 = vld [vmem:[#allocation2 + $0x150] sm:$0xff] }
  0x7a   :  { %2647 = vmatprep.subr.bf16.mxu0 %v6710_v53 }
  0x7b   :  { %928 = vmatpush1.bf16.msra.mxu1 %v5946_v51  ;;  %v181_v51 = vld [vmem:[#allocation2 + $0x2e8] sm:$0xff] }
  0x7c   :  { %929 = vmatprep.subr.bf16.mxu1 %v5955_v54  ;;  %v6712_v54 = vld [vmem:[#allocation4 + $0x40] ss:$16 sps:$4 sm:$0xff]   ;;  %v5948_v61 = vcombine.low %v177_v50, %v181_v51 }
  0x7d   :  { %2648 = vmatpush1.bf16.msra.mxu0 %v6712_v54  ;;  %v138_v54 = vld [vmem:[#allocation2 + $0x190] sm:$0xff] }
  0x7f   :  { %930 = vmatpush1.bf16.msra.mxu1 %v5954_v55  ;;  %v5940_v55 = vcombine.low %v169_v44, %v173_v45  ;;  %v6743_v44 = vld [vmem:[#allocation4 + $0x164] ss:$16 sps:$4 sm:$0xff]  }
  0x80   :  { %931 = vmatprep.subr.bf16.mxu1 %v5963_v58  ;;  %v5949_v58 = vcombine.high %v177_v50, %v181_v51  ;;  %v6749_v50 = vld [vmem:[#allocation4 + $0x184] ss:$16 sps:$4 sm:$0xff]  }
  0x83   :  { %932 = vmatpush1.bf16.msra.mxu1 %v5962_v59  ;;  %v6713_v59 = vld [vmem:[#allocation4 + $0x64] ss:$16 sps:$4 sm:$0xff]  }
  0x84   :  { %933 = vmatprep.subr.bf16.mxu1 %v5971_v62  ;;  %2649 = vmatprep.subr.bf16.mxu0 %v6713_v59  ;;  %v193_v62 = vld [vmem:[#allocation2 + $0x348] sm:$0xff] }
  0x85   :  { %2650 = vmatpush1.bf16.msra.mxu0 %v6715_v60 }
  0x86   :  { %2651 = vmatprep.subr.bf16.mxu0 %v6716_v1 }
  0x87   :  { %934 = vmatpush1.bf16.msra.mxu1 %v5970_v63  ;;  %v197_v63 = vld [vmem:[#allocation2 + $0x368] sm:$0xff] }
  0x88   :  { %935 = vmatprep.subr.bf16.mxu1 %v5979_v2  ;;  %v6718_v2 = vld [vmem:[#allocation4 + $0x80] ss:$16 sps:$4 sm:$0xff]   ;;  %v5964_v10 = vcombine.low %v193_v62, %v197_v63 }
  0x89   :  { %2652 = vmatpush1.bf16.msra.mxu0 %v6718_v2 }
  0x8b   :  { %936 = vmatpush1.bf16.msra.mxu1 %v5978_v3  ;;  %v5956_v3 = vcombine.low %v185_v56, %v189_v57  ;;  %v6755_v56 = vld [vmem:[#allocation4 + $0x1a4] ss:$16 sps:$4 sm:$0xff]  }
  0x8c   :  { %946 = vmatprep.subr.bf16.mxu1 %v5861_v6  ;;  %v5965_v6 = vcombine.high %v193_v62, %v197_v63  ;;  %v6761_v62 = vld [vmem:[#allocation4 + $0x1c4] ss:$16 sps:$4 sm:$0xff]  }
  0x8d   :  { %v150_v63 = vld [vmem:[#allocation2 + $0x1f0] sm:$0xff] }
  0x8e   :  { %938 = vmatmul.mubr.bf16.vlgmr.msra.gmra.mrb[0].mxu1 %v7501_v7 }
  0x8f   :  { %947 = vmatpush1.bf16.msra.mxu1 %v5860_v8  ;;  %978 = vmatprep.mubr.bf16.mxu1 %v7496_v18  ;;  %v6719_v8 = vld [vmem:[#allocation4 + $0xa4] ss:$16 sps:$4 sm:$0xff]  }
  0x90   :  { %948 = vmatprep.subr.bf16.mxu1 %v5869_v11  ;;  %2653 = vmatprep.subr.bf16.mxu0 %v6719_v8  ;;  %v209_v11 = vld [vmem:[#allocation2 + $0x3c8] sm:$0xff] }
  0x91   :  { %2654 = vmatpush1.bf16.msra.mxu0 %v6721_v9 }
  0x92   :  { %2655 = vmatprep.subr.bf16.mxu0 %v6722_v14 }
  0x93   :  { %949 = vmatpush1.bf16.msra.mxu1 %v5868_v12  ;;  %v213_v12 = vld [vmem:[#allocation2 + $0x3e8] sm:$0xff] }
  0x94   :  { %950 = vmatprep.subr.bf16.mxu1 %v5877_v15  ;;  %v6724_v15 = vld [vmem:[#allocation4 + $0xc0] ss:$16 sps:$4 sm:$0xff]   ;;  %v5980_v23 = vcombine.low %v209_v11, %v213_v12 }
  0x95   :  { %2656 = vmatpush1.bf16.msra.mxu0 %v6724_v15  ;;  %v170_v15 = vld [vmem:[#allocation2 + $0x290] sm:$0xff] }
  0x97   :  { %951 = vmatpush1.bf16.msra.mxu1 %v5876_v16  ;;  %v5972_v16 = vcombine.low %v201_v4, %v205_v5  ;;  %v6767_v4 = vld [vmem:[#allocation4 + $0x1e4] ss:$16 sps:$4 sm:$0xff]  }
  0x98   :  { %952 = vmatprep.subr.bf16.mxu1 %v5885_v20  ;;  %v5981_v20 = vcombine.high %v209_v11, %v213_v12  ;;  %v158_v5 = vld [vmem:[#allocation2 + $0x230] sm:$0xff] }
  0x99   :  { %v162_v11 = vld [vmem:[#allocation2 + $0x250] sm:$0xff] }
  0x9a   :  { %v166_v12 = vld [vmem:[#allocation2 + $0x270] sm:$0xff] }
  0x9b   :  { %953 = vmatpush1.bf16.msra.mxu1 %v5884_v21  ;;  %v6725_v21 = vld [vmem:[#allocation4 + $0xe4] ss:$16 sps:$4 sm:$0xff]   ;;  %v5935_v14 = vcombine.high %v162_v11, %v166_v12 }
  0x9c   :  { %954 = vmatprep.subr.bf16.mxu1 %v5893_v24  ;;  %2657 = vmatprep.subr.bf16.mxu0 %v6725_v21  ;;  %v98_v24 = vld [vmem:[#allocation2 + $0x50] sm:$0xff] }
  0x9d   :  { %2658 = vmatpush1.bf16.msra.mxu0 %v6727_v22  ;;  %v182_v21 = vld [vmem:[#allocation2 + $0x2f0] sm:$0xff] }
  0x9e   :  { %2659 = vmatprep.subr.bf16.mxu0 %v6728_v27 }
  0x9f   :  { %955 = vmatpush1.bf16.msra.mxu1 %v5892_v25  ;;  %v102_v25 = vld [vmem:[#allocation2 + $0x70] sm:$0xff] }
  0xa0   :  { %956 = vmatprep.subr.bf16.mxu1 %v5901_v28  ;;  %v6730_v28 = vld [vmem:[#allocation4 + $0x100] ss:$16 sps:$4 sm:$0xff]   ;;  %v5871_v30 = vcombine.high %v98_v24, %v102_v25  ;;  %v5870_v35 = vcombine.low %v98_v24, %v102_v25 }
  0xa1   :  { %2660 = vmatpush1.bf16.msra.mxu0 %v6730_v28  ;;  %v186_v24 = vld [vmem:[#allocation2 + $0x310] sm:$0xff] }
  0xa2   :  { %v190_v25 = vld [vmem:[#allocation2 + $0x330] sm:$0xff] }
  0xa3   :  { %957 = vmatpush1.bf16.msra.mxu1 %v5900_v29  ;;  %v5862_v29 = vcombine.low %v90_v17, %v94_v19  ;;  %v5934_v17 = vcombine.low %v162_v11, %v166_v12  ;;  %v5959_v27 = vcombine.high %v186_v24, %v190_v25  ;;  %v194_v28 = vld [vmem:[#allocation2 + $0x350] sm:$0xff]  ;;  %v163_v12 = vld [vmem:[#allocation2 + $0x258] sm:$0xff] }
  0xa4   :  { %958 = vmatprep.subr.bf16.mxu1 %v5909_v32  ;;  %v6731_v32 = vld [vmem:[#allocation4 + $0x124] ss:$16 sps:$4 sm:$0xff]  }
  0xa5   :  { %2661 = vmatprep.subr.bf16.mxu0 %v6731_v32  ;;  %v202_v32 = vld [vmem:[#allocation2 + $0x390] sm:$0xff] }
  0xa6   :  { %2662 = vmatpush1.bf16.msra.mxu0 %v6736_v34 }
  0xa7   :  { %959 = vmatpush1.bf16.msra.mxu1 %v5908_v33  ;;  %v110_v33 = vld [vmem:[#allocation2 + $0xb0] sm:$0xff]  ;;  %2663 = vmatprep.subr.bf16.mxu0 %v6737_v38 }
  0xa8   :  { %960 = vmatprep.subr.bf16.mxu1 %v5917_v36  ;;  %v114_v36 = vld [vmem:[#allocation2 + $0xd0] sm:$0xff]  ;;  %v5879_v39 = vcombine.high %v106_v31, %v110_v33  ;;  %v5878_v41 = vcombine.low %v106_v31, %v110_v33 }
  0xa9   :  { %v206_v33 = vld [vmem:[#allocation2 + $0x3b0] sm:$0xff] }
  0xaa   :  { %v5974_v38 = vcombine.low %v202_v32, %v206_v33 }
  0xab   :  { %961 = vmatpush1.bf16.msra.mxu1 %v5916_v37  ;;  %v118_v37 = vld [vmem:[#allocation2 + $0xf0] sm:$0xff] }
  0xac   :  { %962 = vmatprep.subr.bf16.mxu1 %v5925_v40  ;;  %v6742_v40 = vld [vmem:[#allocation4 + $0x140] ss:$16 sps:$4 sm:$0xff]   ;;  %v5887_v45 = vcombine.high %v114_v36, %v118_v37  ;;  %v5886_v47 = vcombine.low %v114_v36, %v118_v37 }
  0xad   :  { %2664 = vmatpush1.bf16.msra.mxu0 %v6742_v40  ;;  %v210_v36 = vld [vmem:[#allocation2 + $0x3d0] sm:$0xff]  ;;  %v91_v40 = vld [vmem:[#allocation2 + $0x18] sm:$0xff] }
  0xae   :  { %2665 = vmatprep.subr.bf16.mxu0 %v6743_v44  ;;  %v214_v37 = vld [vmem:[#allocation2 + $0x3f0] sm:$0xff]  ;;  %v99_v44 = vld [vmem:[#allocation2 + $0x58] sm:$0xff] }
  0xaf   :  { %963 = vmatpush1.bf16.msra.mxu1 %v5924_v43  ;;  %v126_v43 = vld [vmem:[#allocation2 + $0x130] sm:$0xff] }
  0xb0   :  { %964 = vmatprep.subr.bf16.mxu1 %v5933_v46  ;;  %v6748_v46 = vld [vmem:[#allocation4 + $0x160] ss:$16 sps:$4 sm:$0xff]   ;;  %v5895_v51 = vcombine.high %v122_v42, %v126_v43  ;;  %v5894_v53 = vcombine.low %v122_v42, %v126_v43  ;;  %v5982_v42 = vcombine.low %v210_v36, %v214_v37 }
  0xb1   :  { %2666 = vmatpush1.bf16.msra.mxu0 %v6748_v46 }
  0xb2   :  { %2667 = vmatprep.subr.bf16.mxu0 %v6749_v50 }
  0xb3   :  { %965 = vmatpush1.bf16.msra.mxu1 %v5932_v49  ;;  %v134_v49 = vld [vmem:[#allocation2 + $0x170] sm:$0xff] }
  0xb4   :  { %966 = vmatprep.subr.bf16.mxu1 %v5941_v52  ;;  %v6754_v52 = vld [vmem:[#allocation4 + $0x180] ss:$16 sps:$4 sm:$0xff]   ;;  %v5903_v57 = vcombine.high %v130_v48, %v134_v49  ;;  %v5902_v59 = vcombine.low %v130_v48, %v134_v49  ;;  %v107_v48 = vld [vmem:[#allocation2 + $0x98] sm:$0xff] }
  0xb5   :  { %2668 = vmatpush1.bf16.msra.mxu0 %v6754_v52  ;;  %v111_v49 = vld [vmem:[#allocation2 + $0xb8] sm:$0xff] }
  0xb6   :  { %2669 = vmatprep.subr.bf16.mxu0 %v6755_v56  ;;  %v115_v52 = vld [vmem:[#allocation2 + $0xd8] sm:$0xff] }
  0xb7   :  { %967 = vmatpush1.bf16.msra.mxu1 %v5940_v55  ;;  %v142_v55 = vld [vmem:[#allocation2 + $0x1b0] sm:$0xff]  ;;  %v123_v56 = vld [vmem:[#allocation2 + $0x118] sm:$0xff] }
  0xb8   :  { %968 = vmatprep.subr.bf16.mxu1 %v5949_v58  ;;  %v6760_v58 = vld [vmem:[#allocation4 + $0x1a0] ss:$16 sps:$4 sm:$0xff]   ;;  %v5911_v60 = vcombine.high %v138_v54, %v142_v55  ;;  %v5910_v1 = vcombine.low %v138_v54, %v142_v55  ;;  %v5880_v54 = vcombine.low %v107_v48, %v111_v49 }
  0xb9   :  { %2670 = vmatpush1.bf16.msra.mxu0 %v6760_v58 }
  0xba   :  { %2671 = vmatprep.subr.bf16.mxu0 %v6761_v62 }
  0xbb   :  { %969 = vmatpush1.bf16.msra.mxu1 %v5948_v61  ;;  %v146_v61 = vld [vmem:[#allocation2 + $0x1d0] sm:$0xff] }
  0xbc   :  { %970 = vmatprep.subr.bf16.mxu1 %v5957_v0  ;;  %v6766_v0 = vld [vmem:[#allocation4 + $0x1c0] ss:$16 sps:$4 sm:$0xff]   ;;  %v5919_v2 = vcombine.high %v146_v61, %v150_v63  ;;  %v5918_v8 = vcombine.low %v146_v61, %v150_v63  ;;  %v135_v61 = vld [vmem:[#allocation2 + $0x178] sm:$0xff] }
  0xbd   :  { %2672 = vmatpush1.bf16.msra.mxu0 %v6766_v0  ;;  %v139_v63 = vld [vmem:[#allocation2 + $0x198] sm:$0xff] }
  0xbe   :  { %2673 = vmatprep.subr.bf16.mxu0 %v6767_v4  ;;  %v143_v0 = vld [vmem:[#allocation2 + $0x1b8] sm:$0xff] }
  0xbf   :  { %971 = vmatpush1.bf16.msra.mxu1 %v5956_v3  ;;  %v154_v3 = vld [vmem:[#allocation2 + $0x210] sm:$0xff]  ;;  %v151_v4 = vld [vmem:[#allocation2 + $0x1f8] sm:$0xff] }
  0xc0   :  { %972 = vmatprep.subr.bf16.mxu1 %v5965_v6  ;;  %v6772_v6 = vld [vmem:[#allocation4 + $0x1e0] ss:$16 sps:$4 sm:$0xff]   ;;  %v5927_v9 = vcombine.high %v154_v3, %v158_v5 }
  0xc1   :  { %2674 = vmatpush1.bf16.msra.mxu0 %v6772_v6 }
  0xc3   :  { %973 = vmatpush1.bf16.msra.mxu1 %v5964_v10  ;;  %v6775_v10 = vld [vmem:[#allocation4 + $0x204] ss:$16 sps:$4 sm:$0xff]  }
  0xc4   :  { %974 = vmatprep.subr.bf16.mxu1 %v5973_v13  ;;  %2684 = vmatprep.subr.bf16.mxu0 %v6775_v10  ;;  %v5926_v13 = vcombine.low %v154_v3, %v158_v5  ;;  %v147_v3 = vld [vmem:[#allocation2 + $0x1d8] sm:$0xff]  ;;  %v5912_v5 = vcombine.low %v139_v63, %v143_v0 }
  0xc5   :  { %v5921_v6 = vcombine.high %v147_v3, %v151_v4  ;;  %v5920_v10 = vcombine.low %v147_v3, %v151_v4  ;;  %v6778_v4 = vld [vmem:[#allocation4 + $0xec] ss:$16 sps:$4 sm:$0xff]  }
  0xc7   :  { %975 = vmatpush1.bf16.msra.mxu1 %v5972_v16  ;;  %v174_v16 = vld [vmem:[#allocation2 + $0x2b0] sm:$0xff] }
  0xc8   :  { %976 = vmatprep.subr.bf16.mxu1 %v5981_v20  ;;  %v5943_v19 = vcombine.high %v170_v15, %v174_v16  ;;  %v178_v20 = vld [vmem:[#allocation2 + $0x2d0] sm:$0xff]  ;;  %v5942_v22 = vcombine.low %v170_v15, %v174_v16  ;;  %v171_v16 = vld [vmem:[#allocation2 + $0x298] sm:$0xff] }
  0xcb   :  { %977 = vmatpush1.bf16.msra.mxu1 %v5980_v23  ;;  %v5951_v23 = vcombine.high %v178_v20, %v182_v21 }
  0xcc   :  { %987 = vmatprep.subr.bf16.mxu1 %v5863_v26  ;;  %v5950_v26 = vcombine.low %v178_v20, %v182_v21  ;;  %v179_v21 = vld [vmem:[#allocation2 + $0x2d8] sm:$0xff] }
  0xce   :  { %979 = vmatmul.mubr.bf16.vlgmr.msra.gmra.mrb[4].mxu1 %v7501_v7 }
  0xcf   :  { %988 = vmatpush1.bf16.msra.mxu1 %v5862_v29  ;;  %1019 = vmatprep.mubr.bf16.mxu1 %v7496_v18  ;;  %v198_v29 = vld [vmem:[#allocation2 + $0x370] sm:$0xff] }
  0xd0   :  { %989 = vmatprep.subr.bf16.mxu1 %v5871_v30  ;;  %v5958_v30 = vcombine.low %v186_v24, %v190_v25  ;;  %v5967_v31 = vcombine.high %v194_v28, %v198_v29  ;;  %v5966_v34 = vcombine.low %v194_v28, %v198_v29  ;;  %v187_v25 = vld [vmem:[#allocation2 + $0x318] sm:$0xff] }
  0xd1   :  { %v195_v29 = vld [vmem:[#allocation2 + $0x358] sm:$0xff] }
  0xd3   :  { %990 = vmatpush1.bf16.msra.mxu1 %v5870_v35  ;;  %v5975_v35 = vcombine.high %v202_v32, %v206_v33  ;;  %v203_v33 = vld [vmem:[#allocation2 + $0x398] sm:$0xff] }
  0xd4   :  { %991 = vmatprep.subr.bf16.mxu1 %v5879_v39  ;;  %v5983_v39 = vcombine.high %v210_v36, %v214_v37  ;;  %v211_v37 = vld [vmem:[#allocation2 + $0x3d8] sm:$0xff] }
  0xd7   :  { %992 = vmatpush1.bf16.msra.mxu1 %v5878_v41  ;;  %v95_v41 = vld [vmem:[#allocation2 + $0x38] sm:$0xff] }
  0xd8   :  { %993 = vmatprep.subr.bf16.mxu1 %v5887_v45  ;;  %v5865_v43 = vcombine.high %v91_v40, %v95_v41  ;;  %v103_v45 = vld [vmem:[#allocation2 + $0x78] sm:$0xff]  ;;  %v5864_v46 = vcombine.low %v91_v40, %v95_v41 }
  0xd9   :  { %v5872_v50 = vcombine.low %v99_v44, %v103_v45 }
  0xdb   :  { %994 = vmatpush1.bf16.msra.mxu1 %v5886_v47  ;;  %v5873_v47 = vcombine.high %v99_v44, %v103_v45  ;;  %v6741_v44 = vld [vmem:[#allocation4 + $0x2c] ss:$16 sps:$4 sm:$0xff]   ;;  %v6739_v45 = vld [vmem:[#allocation4 + $0x28] ss:$16 sps:$4 sm:$0xff]  }
  0xdc   :  { %995 = vmatprep.subr.bf16.mxu1 %v5895_v51  ;;  %v5881_v51 = vcombine.high %v107_v48, %v111_v49  ;;  %v6745_v48 = vld [vmem:[#allocation4 + $0x48] ss:$16 sps:$4 sm:$0xff]   ;;  %v6753_v49 = vld [vmem:[#allocation4 + $0x6c] ss:$16 sps:$4 sm:$0xff]  }
  0xdf   :  { %996 = vmatpush1.bf16.msra.mxu1 %v5894_v53  ;;  %v119_v53 = vld [vmem:[#allocation2 + $0xf8] sm:$0xff] }
  0xe0   :  { %997 = vmatprep.subr.bf16.mxu1 %v5903_v57  ;;  %v5889_v55 = vcombine.high %v115_v52, %v119_v53  ;;  %v127_v57 = vld [vmem:[#allocation2 + $0x138] sm:$0xff]  ;;  %v5888_v58 = vcombine.low %v115_v52, %v119_v53 }
  0xe1   :  { %v5896_v62 = vcombine.low %v123_v56, %v127_v57  ;;  %v6759_v52 = vld [vmem:[#allocation4 + $0x8c] ss:$16 sps:$4 sm:$0xff]  }
  0xe3   :  { %998 = vmatpush1.bf16.msra.mxu1 %v5902_v59  ;;  %v5897_v59 = vcombine.high %v123_v56, %v127_v57  ;;  %v6765_v56 = vld [vmem:[#allocation4 + $0xac] ss:$16 sps:$4 sm:$0xff]  }
  0xe4   :  { %999 = vmatprep.subr.bf16.mxu1 %v5911_v60  ;;  %v131_v60 = vld [vmem:[#allocation2 + $0x158] sm:$0xff] }
  0xe7   :  { %1000 = vmatpush1.bf16.msra.mxu1 %v5910_v1  ;;  %v5904_v1 = vcombine.low %v131_v60, %v135_v61 }
  0xe8   :  { %1001 = vmatprep.subr.bf16.mxu1 %v5919_v2  ;;  %v5913_v2 = vcombine.high %v139_v63, %v143_v0 }
  0xeb   :  { %1002 = vmatpush1.bf16.msra.mxu1 %v5918_v8  ;;  %v155_v8 = vld [vmem:[#allocation2 + $0x218] sm:$0xff] }
  0xec   :  { %1003 = vmatprep.subr.bf16.mxu1 %v5927_v9  ;;  %v159_v9 = vld [vmem:[#allocation2 + $0x238] sm:$0xff] }
  0xed   :  { %v5929_v11 = vcombine.high %v155_v8, %v159_v9 }
  0xef   :  { %1004 = vmatpush1.bf16.msra.mxu1 %v5926_v13  ;;  %v167_v13 = vld [vmem:[#allocation2 + $0x278] sm:$0xff] }
  0xf0   :  { %1005 = vmatprep.subr.bf16.mxu1 %v5935_v14  ;;  %v5928_v14 = vcombine.low %v155_v8, %v159_v9  ;;  %v5937_v15 = vcombine.high %v163_v12, %v167_v13  ;;  %v6773_v9 = vld [vmem:[#allocation4 + $0x200] ss:$16 sps:$4 sm:$0xff]  }
  0xf3   :  { %1006 = vmatpush1.bf16.msra.mxu1 %v5934_v17  ;;  %v175_v17 = vld [vmem:[#allocation2 + $0x2b8] sm:$0xff] }
  0xf4   :  { %1007 = vmatprep.subr.bf16.mxu1 %v5943_v19  ;;  %v5936_v19 = vcombine.low %v163_v12, %v167_v13  ;;  %v5945_v20 = vcombine.high %v171_v16, %v175_v17  ;;  %v6784_v12 = vld [vmem:[#allocation4 + $0x10c] ss:$16 sps:$4 sm:$0xff]   ;;  %v6779_v13 = vld [vmem:[#allocation4 + $0x220] ss:$16 sps:$4 sm:$0xff]  }
  0xf7   :  { %1008 = vmatpush1.bf16.msra.mxu1 %v5942_v22  ;;  %v183_v22 = vld [vmem:[#allocation2 + $0x2f8] sm:$0xff] }
  0xf8   :  { %1009 = vmatprep.subr.bf16.mxu1 %v5951_v23  ;;  %v5944_v23 = vcombine.low %v171_v16, %v175_v17  ;;  %v5953_v24 = vcombine.high %v179_v21, %v183_v22  ;;  %v6790_v16 = vld [vmem:[#allocation4 + $0x12c] ss:$16 sps:$4 sm:$0xff]   ;;  %v6785_v17 = vld [vmem:[#allocation4 + $0x240] ss:$16 sps:$4 sm:$0xff]  }
  0xfb   :  { %1010 = vmatpush1.bf16.msra.mxu1 %v5950_v26  ;;  %v191_v26 = vld [vmem:[#allocation2 + $0x338] sm:$0xff] }
  0xfc   :  { %1011 = vmatprep.subr.bf16.mxu1 %v5959_v27  ;;  %v5952_v27 = vcombine.low %v179_v21, %v183_v22  ;;  %v5961_v28 = vcombine.high %v187_v25, %v191_v26  ;;  %v6796_v21 = vld [vmem:[#allocation4 + $0x14c] ss:$16 sps:$4 sm:$0xff]   ;;  %v6791_v22 = vld [vmem:[#allocation4 + $0x260] ss:$16 sps:$4 sm:$0xff]  }
  0xff   :  { %1012 = vmatpush1.bf16.msra.mxu1 %v5958_v30  ;;  %v199_v30 = vld [vmem:[#allocation2 + $0x378] sm:$0xff] }
 0x100   :  { %1013 = vmatprep.subr.bf16.mxu1 %v5967_v31  ;;  %v5960_v31 = vcombine.low %v187_v25, %v191_v26  ;;  %v5969_v32 = vcombine.high %v195_v29, %v199_v30  ;;  %v6802_v25 = vld [vmem:[#allocation4 + $0x16c] ss:$16 sps:$4 sm:$0xff]   ;;  %v6797_v26 = vld [vmem:[#allocation4 + $0x280] ss:$16 sps:$4 sm:$0xff]  }
 0x103   :  { %1014 = vmatpush1.bf16.msra.mxu1 %v5966_v34  ;;  %v207_v34 = vld [vmem:[#allocation2 + $0x3b8] sm:$0xff] }
 0x104   :  { %1015 = vmatprep.subr.bf16.mxu1 %v5975_v35  ;;  %v5968_v35 = vcombine.low %v195_v29, %v199_v30  ;;  %v5977_v36 = vcombine.high %v203_v33, %v207_v34  ;;  %v6808_v29 = vld [vmem:[#allocation4 + $0x18c] ss:$16 sps:$4 sm:$0xff]   ;;  %v6803_v30 = vld [vmem:[#allocation4 + $0x2a0] ss:$16 sps:$4 sm:$0xff]  }
 0x107   :  { %1016 = vmatpush1.bf16.msra.mxu1 %v5974_v38  ;;  %v215_v38 = vld [vmem:[#allocation2 + $0x3f8] sm:$0xff] }
 0x108   :  { %1017 = vmatprep.subr.bf16.mxu1 %v5983_v39  ;;  %v5976_v39 = vcombine.low %v203_v33, %v207_v34  ;;  %v5985_v40 = vcombine.high %v211_v37, %v215_v38  ;;  %v5984_v41 = vcombine.low %v211_v37, %v215_v38  ;;  %v6814_v33 = vld [vmem:[#allocation4 + $0x1ac] ss:$16 sps:$4 sm:$0xff]   ;;  %v6809_v34 = vld [vmem:[#allocation4 + $0x2c0] ss:$16 sps:$4 sm:$0xff]  }
 0x109   :  { %v6820_v37 = vld [vmem:[#allocation4 + $0x1cc] ss:$16 sps:$4 sm:$0xff]   ;;  %v6815_v38 = vld [vmem:[#allocation4 + $0x2e0] ss:$16 sps:$4 sm:$0xff]  }
 0x10b   :  { %1018 = vmatpush1.bf16.msra.mxu1 %v5982_v42  ;;  %v6735_v42 = vld [vmem:[#allocation4 + $0xc] ss:$16 sps:$4 sm:$0xff]  }
 0x10c   :  { %1028 = vmatprep.subr.bf16.mxu1 %v5865_v43  ;;  %v6733_v43 = vld [vmem:[#allocation4 + $0x8] ss:$16 sps:$4 sm:$0xff]  }
 0x10e   :  { %1020 = vmatmul.mubr.bf16.vlgmr.msra.gmra.mrb[8].mxu1 %v7501_v7 }
 0x10f   :  { %1029 = vmatpush1.bf16.msra.mxu1 %v5864_v46  ;;  %1060 = vmatprep.mubr.bf16.mxu1 %v7496_v18  ;;  %v5905_v18 = vcombine.high %v131_v60, %v135_v61  ;;  %v6747_v46 = vld [vmem:[#allocation4 + $0x4c] ss:$16 sps:$4 sm:$0xff]  }
 0x110   :  { %1030 = vmatprep.subr.bf16.mxu1 %v5873_v47  ;;  %v218_v47 = vlaneseq  ;;  %v6771_v60 = vld [vmem:[#allocation4 + $0xcc] ss:$16 sps:$4 sm:$0xff]  }
 0x113   :  { %1031 = vmatpush1.bf16.msra.mxu1 %v5872_v50  ;;  %v7510_v50 = vshrl.u32 %v218_v47, 7  ;;  %v6830_v47 = vld [vmem:[#allocation4 + $0x208] ss:$16 sps:$4 sm:$0xff]  }
 0x114   :  { %1032 = vmatprep.subr.bf16.mxu1 %v5881_v51  ;;  %v6751_v51 = vld [vmem:[#allocation4 + $0x68] ss:$16 sps:$4 sm:$0xff]  }
 0x115   :  { %v7513_v53 = vsub.s32 0, %v7510_v50 }
 0x117   :  { %1033 = vmatpush1.bf16.msra.mxu1 %v5880_v54  ;;  %v7518_v54 = vld [vmem:[%s7656_s5] sm:$0xff] }
 0x118   :  { %1034 = vmatprep.subr.bf16.mxu1 %v5889_v55  ;;  %v7521_v55 = vsub.s32 1, %v7510_v50  ;;  %v221_v57 = vrot.slane %v7518_v54, %v7513_v53 }
 0x11b   :  { %1035 = vmatpush1.bf16.msra.mxu1 %v5888_v58  ;;  %v225_v58 = vrot.slane %v7518_v54, %v7521_v55 }
 0x11c   :  { %1036 = vmatprep.subr.bf16.mxu1 %v5897_v59  ;;  %v6763_v59 = vld [vmem:[#allocation4 + $0xa8] ss:$16 sps:$4 sm:$0xff]  }
 0x11f   :  { %1037 = vmatpush1.bf16.msra.mxu1 %v5896_v62 }
 0x120   :  { %1038 = vmatprep.subr.bf16.mxu1 %v5905_v18 }
 0x123   :  { %1039 = vmatpush1.bf16.msra.mxu1 %v5904_v1  ;;  %v6769_v1 = vld [vmem:[#allocation4 + $0xc8] ss:$16 sps:$4 sm:$0xff]  }
 0x124   :  { %1040 = vmatprep.subr.bf16.mxu1 %v5913_v2 }
 0x127   :  { %1041 = vmatpush1.bf16.msra.mxu1 %v5912_v5 }
 0x128   :  { %1042 = vmatprep.subr.bf16.mxu1 %v5921_v6 }
 0x12b   :  { %1043 = vmatpush1.bf16.msra.mxu1 %v5920_v10  ;;  %v6776_v10 = vld [vmem:[#allocation4 + $0xe8] ss:$16 sps:$4 sm:$0xff]  }
 0x12c   :  { %1044 = vmatprep.subr.bf16.mxu1 %v5929_v11  ;;  %v6781_v11 = vld [vmem:[#allocation4 + $0x224] ss:$16 sps:$4 sm:$0xff]  }
 0x12f   :  { %1045 = vmatpush1.bf16.msra.mxu1 %v5928_v14  ;;  %v6782_v14 = vld [vmem:[#allocation4 + $0x108] ss:$16 sps:$4 sm:$0xff]  }
 0x130   :  { %1046 = vmatprep.subr.bf16.mxu1 %v5937_v15  ;;  %v6787_v15 = vld [vmem:[#allocation4 + $0x244] ss:$16 sps:$4 sm:$0xff]  }
 0x133   :  { %1047 = vmatpush1.bf16.msra.mxu1 %v5936_v19  ;;  %v6788_v19 = vld [vmem:[#allocation4 + $0x128] ss:$16 sps:$4 sm:$0xff]  }
 0x134   :  { %1048 = vmatprep.subr.bf16.mxu1 %v5945_v20  ;;  %v6793_v20 = vld [vmem:[#allocation4 + $0x264] ss:$16 sps:$4 sm:$0xff]  }
 0x137   :  { %1049 = vmatpush1.bf16.msra.mxu1 %v5944_v23  ;;  %v6794_v23 = vld [vmem:[#allocation4 + $0x148] ss:$16 sps:$4 sm:$0xff]  }
 0x138   :  { %1050 = vmatprep.subr.bf16.mxu1 %v5953_v24  ;;  %v6799_v24 = vld [vmem:[#allocation4 + $0x284] ss:$16 sps:$4 sm:$0xff]  }
 0x13b   :  { %1051 = vmatpush1.bf16.msra.mxu1 %v5952_v27  ;;  %v6800_v27 = vld [vmem:[#allocation4 + $0x168] ss:$16 sps:$4 sm:$0xff]  }
 0x13c   :  { %1052 = vmatprep.subr.bf16.mxu1 %v5961_v28  ;;  %v6805_v28 = vld [vmem:[#allocation4 + $0x2a4] ss:$16 sps:$4 sm:$0xff]  }
 0x13f   :  { %1053 = vmatpush1.bf16.msra.mxu1 %v5960_v31  ;;  %v6806_v31 = vld [vmem:[#allocation4 + $0x188] ss:$16 sps:$4 sm:$0xff]  }
 0x140   :  { %1054 = vmatprep.subr.bf16.mxu1 %v5969_v32  ;;  %v6811_v32 = vld [vmem:[#allocation4 + $0x2c4] ss:$16 sps:$4 sm:$0xff]  }
 0x143   :  { %1055 = vmatpush1.bf16.msra.mxu1 %v5968_v35  ;;  %v6812_v35 = vld [vmem:[#allocation4 + $0x1a8] ss:$16 sps:$4 sm:$0xff]  }
 0x144   :  { %1056 = vmatprep.subr.bf16.mxu1 %v5977_v36  ;;  %v6817_v36 = vld [vmem:[#allocation4 + $0x2e4] ss:$16 sps:$4 sm:$0xff]  }
 0x147   :  { %1057 = vmatpush1.bf16.msra.mxu1 %v5976_v39  ;;  %v6818_v39 = vld [vmem:[#allocation4 + $0x1c8] ss:$16 sps:$4 sm:$0xff]  }
 0x148   :  { %1058 = vmatprep.subr.bf16.mxu1 %v5985_v40  ;;  %v6823_v40 = vld [vmem:[#allocation4 + $0x304] ss:$16 sps:$4 sm:$0xff]  }
 0x14b   :  { %1059 = vmatpush1.bf16.msra.mxu1 %v5984_v41  ;;  %v6826_v41 = vld [vmem:[#allocation4 + $0x1ec] ss:$16 sps:$4 sm:$0xff]  }
 0x14c   :  { %2807 = vmatprep.subr.bf16.mxu1 %v6735_v42  ;;  %v6821_v42 = vld [vmem:[#allocation4 + $0x300] ss:$16 sps:$4 sm:$0xff]  }
 0x14e   :  { %1061 = vmatmul.mubr.bf16.vlgmr.msra.gmra.mrb[12].mxu1 %v7501_v7  ;;  %v6757_v7 = vld [vmem:[#allocation4 + $0x88] ss:$16 sps:$4 sm:$0xff]  }
 0x14f   :  { %2808 = vmatpush1.bf16.msra.mxu1 %v6733_v43  ;;  %v6824_v43 = vld [vmem:[#allocation4 + $0x1e8] ss:$16 sps:$4 sm:$0xff]  }
 0x150   :  { %2809 = vmatprep.subr.bf16.mxu1 %v6741_v44  ;;  %v6829_v44 = vld [vmem:[#allocation4 + $0x324] ss:$16 sps:$4 sm:$0xff]  }
 0x153   :  { %2810 = vmatpush1.bf16.msra.mxu1 %v6739_v45  ;;  %v6832_v45 = vld [vmem:[#allocation4 + $0x20c] ss:$16 sps:$4 sm:$0xff]  }
 0x154   :  { %2811 = vmatprep.subr.bf16.mxu1 %v6747_v46  ;;  %v6827_v46 = vld [vmem:[#allocation4 + $0x320] ss:$16 sps:$4 sm:$0xff]  }
 0x157   :  { %2812 = vmatpush1.bf16.msra.mxu1 %v6745_v48  ;;  %v6835_v48 = vld [vmem:[#allocation4 + $0x344] ss:$16 sps:$4 sm:$0xff]  }
 0x158   :  { %2813 = vmatprep.subr.bf16.mxu1 %v6753_v49  ;;  %v6838_v49 = vld [vmem:[#allocation4 + $0x22c] ss:$16 sps:$4 sm:$0xff]  }
 0x15b   :  { %2814 = vmatpush1.bf16.msra.mxu1 %v6751_v51  ;;  %v6833_v51 = vld [vmem:[#allocation4 + $0x340] ss:$16 sps:$4 sm:$0xff]  }
 0x15c   :  { %2815 = vmatprep.subr.bf16.mxu1 %v6759_v52  ;;  %v6836_v52 = vld [vmem:[#allocation4 + $0x228] ss:$16 sps:$4 sm:$0xff]  }
 0x15f   :  { %2816 = vmatpush1.bf16.msra.mxu1 %v6757_v7  ;;  %v6841_v7 = vld [vmem:[#allocation4 + $0x364] ss:$16 sps:$4 sm:$0xff]  }
 0x160   :  { %2817 = vmatprep.subr.bf16.mxu1 %v6765_v56  ;;  %v6844_v56 = vld [vmem:[#allocation4 + $0x24c] ss:$16 sps:$4 sm:$0xff]  }
 0x161   :  { %v939_v61 = vpop.f32.mrb[0].mxu1 }
 0x162   :  { %v940_v62 = vadd.f32 %v939_v61, %v221_v57  ;;  %v941_v18 = vpop.f32.mrb[1].mxu1  ;;  %v6839_v57 = vld [vmem:[#allocation4 + $0x360] ss:$16 sps:$4 sm:$0xff]  }
 0x163   :  { %v942_v63 = vadd.f32 %v941_v18, %v225_v58  ;;  %v943_v0 = vpop.f32.mrb[2].mxu1  ;;  %2818 = vmatpush1.bf16.msra.mxu1 %v6763_v59  ;;  %v6842_v58 = vld [vmem:[#allocation4 + $0x248] ss:$16 sps:$4 sm:$0xff]   ;;  %v6847_v59 = vld [vmem:[#allocation4 + $0x384] ss:$16 sps:$4 sm:$0xff]  }
 0x164   :  { %v1069_v2 = vmax.f32 %v940_v62, 0.0  ;;  %v944_v3 = vpop.f32.mrb[3].mxu1  ;;  %2819 = vmatprep.subr.bf16.mxu1 %v6771_v60  ;;  %v6850_v60 = vld [vmem:[#allocation4 + $0x26c] ss:$16 sps:$4 sm:$0xff]   ;;  %v6845_v61 = vld [vmem:[#allocation4 + $0x380] ss:$16 sps:$4 sm:$0xff]  }
 0x165   :  { %v1070_v5 = vmax.f32 %v942_v63, 0.0  ;;  %v6848_v62 = vld [vmem:[#allocation4 + $0x268] ss:$16 sps:$4 sm:$0xff]   ;;  %v6853_v18 = vld [vmem:[#allocation4 + $0x3a4] ss:$16 sps:$4 sm:$0xff]   ;;  %v7532_v0 = vsub.s32 2, %v7510_v50 }
 0x166   :  { %v7527_v6 = vpack.c.bf16 %v1069_v2, %v1069_v2  ;;  %v6856_v63 = vld [vmem:[#allocation4 + $0x28c] ss:$16 sps:$4 sm:$0xff]   ;;  %v6854_v2 = vld [vmem:[#allocation4 + $0x288] ss:$16 sps:$4 sm:$0xff]   ;;  %v7535_v3 = vsub.s32 3, %v7510_v50 }
 0x167   :  { %2820 = vmatpush1.bf16.msra.mxu1 %v6769_v1  ;;  %v1078_v8 = vpack.c.bf16 %v1070_v5, %v1070_v5  ;;  %v6851_v1 = vld [vmem:[#allocation4 + $0x3a0] ss:$16 sps:$4 sm:$0xff]   ;;  %v6862_v5 = vld [vmem:[#allocation4 + $0x2ac] ss:$16 sps:$4 sm:$0xff]  }
 0x168   :  { %2821 = vmatprep.subr.bf16.mxu1 %v6778_v4  ;;  %v6859_v4 = vld [vmem:[#allocation4 + $0x3c4] ss:$16 sps:$4 sm:$0xff]  }
 0x169   :  { %2675 = vmatprep.mubr.bf16.mxu0 %v1078_v8  ;;  %2839 = vmatprep.mubr.bf16.mxu1 %v1078_v8  ;;  %v233_v8 = vrot.slane %v7518_v54, %v7535_v3 }
 0x16a   :  { %2676 = vmatmul.mubr.bf16.vlgmr.msra.gmra.mrb[0].mxu0 %v7527_v6 }
 0x16b   :  { %2685 = vmatpush1.bf16.msra.mxu0 %v6773_v9  ;;  %2822 = vmatpush1.bf16.msra.mxu1 %v6776_v10  ;;  %v6857_v9 = vld [vmem:[#allocation4 + $0x3c0] ss:$16 sps:$4 sm:$0xff]   ;;  %v6860_v10 = vld [vmem:[#allocation4 + $0x2a8] ss:$16 sps:$4 sm:$0xff]  }
 0x16c   :  { %2686 = vmatprep.subr.bf16.mxu0 %v6781_v11  ;;  %2823 = vmatprep.subr.bf16.mxu1 %v6784_v12  ;;  %v6865_v11 = vld [vmem:[#allocation4 + $0x3e4] ss:$16 sps:$4 sm:$0xff]   ;;  %v6868_v12 = vld [vmem:[#allocation4 + $0x2cc] ss:$16 sps:$4 sm:$0xff]  }
 0x16f   :  { %2687 = vmatpush1.bf16.msra.mxu0 %v6779_v13  ;;  %2824 = vmatpush1.bf16.msra.mxu1 %v6782_v14 }
 0x170   :  { %2688 = vmatprep.subr.bf16.mxu0 %v6787_v15  ;;  %2825 = vmatprep.subr.bf16.mxu1 %v6790_v16 }
 0x173   :  { %2689 = vmatpush1.bf16.msra.mxu0 %v6785_v17  ;;  %2826 = vmatpush1.bf16.msra.mxu1 %v6788_v19  ;;  %v6863_v19 = vld [vmem:[#allocation4 + $0x3e0] ss:$16 sps:$4 sm:$0xff]  }
 0x174   :  { %2690 = vmatprep.subr.bf16.mxu0 %v6793_v20  ;;  %2827 = vmatprep.subr.bf16.mxu1 %v6796_v21  ;;  %v6866_v20 = vld [vmem:[#allocation4 + $0x2c8] ss:$16 sps:$4 sm:$0xff]  }
 0x177   :  { %2691 = vmatpush1.bf16.msra.mxu0 %v6791_v22  ;;  %2828 = vmatpush1.bf16.msra.mxu1 %v6794_v23  ;;  %v6871_v23 = vld [vmem:[#allocation4 + $0x404] ss:$16 sps:$4 sm:$0xff]  }
 0x178   :  { %2692 = vmatprep.subr.bf16.mxu0 %v6799_v24  ;;  %2829 = vmatprep.subr.bf16.mxu1 %v6802_v25  ;;  %v6874_v24 = vld [vmem:[#allocation4 + $0x2ec] ss:$16 sps:$4 sm:$0xff]  }
 0x17b   :  { %2693 = vmatpush1.bf16.msra.mxu0 %v6797_v26  ;;  %2830 = vmatpush1.bf16.msra.mxu1 %v6800_v27 }
 0x17c   :  { %2694 = vmatprep.subr.bf16.mxu0 %v6805_v28  ;;  %2831 = vmatprep.subr.bf16.mxu1 %v6808_v29  ;;  %v6869_v28 = vld [vmem:[#allocation4 + $0x400] ss:$16 sps:$4 sm:$0xff]   ;;  %v6872_v29 = vld [vmem:[#allocation4 + $0x2e8] ss:$16 sps:$4 sm:$0xff]  }
 0x17f   :  { %2695 = vmatpush1.bf16.msra.mxu0 %v6803_v30  ;;  %2832 = vmatpush1.bf16.msra.mxu1 %v6806_v31  ;;  %v6877_v30 = vld [vmem:[#allocation4 + $0x424] ss:$16 sps:$4 sm:$0xff]   ;;  %v6880_v31 = vld [vmem:[#allocation4 + $0x30c] ss:$16 sps:$4 sm:$0xff]  }
 0x180   :  { %2696 = vmatprep.subr.bf16.mxu0 %v6811_v32  ;;  %2833 = vmatprep.subr.bf16.mxu1 %v6814_v33  ;;  %v6875_v32 = vld [vmem:[#allocation4 + $0x420] ss:$16 sps:$4 sm:$0xff]   ;;  %v6878_v33 = vld [vmem:[#allocation4 + $0x308] ss:$16 sps:$4 sm:$0xff]  }
 0x183   :  { %2697 = vmatpush1.bf16.msra.mxu0 %v6809_v34  ;;  %2834 = vmatpush1.bf16.msra.mxu1 %v6812_v35  ;;  %v6883_v34 = vld [vmem:[#allocation4 + $0x444] ss:$16 sps:$4 sm:$0xff]   ;;  %v6886_v35 = vld [vmem:[#allocation4 + $0x32c] ss:$16 sps:$4 sm:$0xff]  }
 0x184   :  { %2698 = vmatprep.subr.bf16.mxu0 %v6817_v36  ;;  %2835 = vmatprep.subr.bf16.mxu1 %v6820_v37  ;;  %v6881_v36 = vld [vmem:[#allocation4 + $0x440] ss:$16 sps:$4 sm:$0xff]   ;;  %v6884_v37 = vld [vmem:[#allocation4 + $0x328] ss:$16 sps:$4 sm:$0xff]  }
 0x187   :  { %2699 = vmatpush1.bf16.msra.mxu0 %v6815_v38  ;;  %2836 = vmatpush1.bf16.msra.mxu1 %v6818_v39  ;;  %v6889_v38 = vld [vmem:[#allocation4 + $0x464] ss:$16 sps:$4 sm:$0xff]   ;;  %v6892_v39 = vld [vmem:[#allocation4 + $0x34c] ss:$16 sps:$4 sm:$0xff]  }
 0x188   :  { %2700 = vmatprep.subr.bf16.mxu0 %v6823_v40  ;;  %2837 = vmatprep.subr.bf16.mxu1 %v6826_v41  ;;  %v6887_v40 = vld [vmem:[#allocation4 + $0x460] ss:$16 sps:$4 sm:$0xff]   ;;  %v6890_v41 = vld [vmem:[#allocation4 + $0x348] ss:$16 sps:$4 sm:$0xff]  }
 0x18b   :  { %2701 = vmatpush1.bf16.msra.mxu0 %v6821_v42  ;;  %2838 = vmatpush1.bf16.msra.mxu1 %v6824_v43  ;;  %v6895_v42 = vld [vmem:[#allocation4 + $0x484] ss:$16 sps:$4 sm:$0xff]   ;;  %v6898_v43 = vld [vmem:[#allocation4 + $0x36c] ss:$16 sps:$4 sm:$0xff]  }
 0x18c   :  { %2702 = vmatprep.subr.bf16.mxu0 %v6829_v44  ;;  %2848 = vmatprep.subr.bf16.mxu1 %v6832_v45  ;;  %v6893_v44 = vld [vmem:[#allocation4 + $0x480] ss:$16 sps:$4 sm:$0xff]   ;;  %v6896_v45 = vld [vmem:[#allocation4 + $0x368] ss:$16 sps:$4 sm:$0xff]  }
 0x18e   :  { %2840 = vmatmul.mubr.bf16.vlgmr.msra.gmra.mrb[16].mxu1 %v7527_v6  ;;  %v229_v6 = vrot.slane %v7518_v54, %v7532_v0 }
 0x18f   :  { %2703 = vmatpush1.bf16.msra.mxu0 %v6827_v46  ;;  %2849 = vmatpush1.bf16.msra.mxu1 %v6830_v47  ;;  %v6901_v46 = vld [vmem:[#allocation4 + $0x4a4] ss:$16 sps:$4 sm:$0xff]   ;;  %v6904_v47 = vld [vmem:[#allocation4 + $0x38c] ss:$16 sps:$4 sm:$0xff]  }
 0x190   :  { %2704 = vmatprep.subr.bf16.mxu0 %v6835_v48  ;;  %2850 = vmatprep.subr.bf16.mxu1 %v6838_v49  ;;  %v6899_v48 = vld [vmem:[#allocation4 + $0x4a0] ss:$16 sps:$4 sm:$0xff]   ;;  %v6902_v49 = vld [vmem:[#allocation4 + $0x388] ss:$16 sps:$4 sm:$0xff]  }
 0x193   :  { %2705 = vmatpush1.bf16.msra.mxu0 %v6833_v51  ;;  %2851 = vmatpush1.bf16.msra.mxu1 %v6836_v52  ;;  %v6907_v51 = vld [vmem:[#allocation4 + $0x4c4] ss:$16 sps:$4 sm:$0xff]   ;;  %v6910_v52 = vld [vmem:[#allocation4 + $0x3ac] ss:$16 sps:$4 sm:$0xff]  }
 0x194   :  { %2706 = vmatprep.subr.bf16.mxu0 %v6841_v7  ;;  %2852 = vmatprep.subr.bf16.mxu1 %v6844_v56  ;;  %v6905_v7 = vld [vmem:[#allocation4 + $0x4c0] ss:$16 sps:$4 sm:$0xff]   ;;  %v6908_v56 = vld [vmem:[#allocation4 + $0x3a8] ss:$16 sps:$4 sm:$0xff]  }
 0x197   :  { %2707 = vmatpush1.bf16.msra.mxu0 %v6839_v57  ;;  %2853 = vmatpush1.bf16.msra.mxu1 %v6842_v58  ;;  %v6913_v57 = vld [vmem:[#allocation4 + $0x4e4] ss:$16 sps:$4 sm:$0xff]   ;;  %v6916_v58 = vld [vmem:[#allocation4 + $0x3cc] ss:$16 sps:$4 sm:$0xff]  }
 0x198   :  { %2708 = vmatprep.subr.bf16.mxu0 %v6847_v59  ;;  %2854 = vmatprep.subr.bf16.mxu1 %v6850_v60  ;;  %v6911_v59 = vld [vmem:[#allocation4 + $0x4e0] ss:$16 sps:$4 sm:$0xff]   ;;  %v6914_v60 = vld [vmem:[#allocation4 + $0x3c8] ss:$16 sps:$4 sm:$0xff]  }
 0x19b   :  { %2709 = vmatpush1.bf16.msra.mxu0 %v6845_v61  ;;  %2855 = vmatpush1.bf16.msra.mxu1 %v6848_v62  ;;  %v6919_v61 = vld [vmem:[#allocation4 + $0x504] ss:$16 sps:$4 sm:$0xff]   ;;  %v6922_v62 = vld [vmem:[#allocation4 + $0x3ec] ss:$16 sps:$4 sm:$0xff]  }
 0x19c   :  { %2710 = vmatprep.subr.bf16.mxu0 %v6853_v18  ;;  %2856 = vmatprep.subr.bf16.mxu1 %v6856_v63  ;;  %v6917_v18 = vld [vmem:[#allocation4 + $0x500] ss:$16 sps:$4 sm:$0xff]   ;;  %v6920_v63 = vld [vmem:[#allocation4 + $0x3e8] ss:$16 sps:$4 sm:$0xff]  }
 0x19f   :  { %2711 = vmatpush1.bf16.msra.mxu0 %v6851_v1  ;;  %2857 = vmatpush1.bf16.msra.mxu1 %v6854_v2  ;;  %v6925_v1 = vld [vmem:[#allocation4 + $0x524] ss:$16 sps:$4 sm:$0xff]   ;;  %v6928_v2 = vld [vmem:[#allocation4 + $0x40c] ss:$16 sps:$4 sm:$0xff]  }
 0x1a0   :  { %2712 = vmatprep.subr.bf16.mxu0 %v6859_v4  ;;  %2858 = vmatprep.subr.bf16.mxu1 %v6862_v5  ;;  %v6923_v4 = vld [vmem:[#allocation4 + $0x520] ss:$16 sps:$4 sm:$0xff]   ;;  %v6926_v5 = vld [vmem:[#allocation4 + $0x408] ss:$16 sps:$4 sm:$0xff]  }
 0x1a1   :  { %v980_v13 = vpop.f32.mrb[4].mxu1 }
 0x1a2   :  { %v981_v14 = vadd.f32 %v980_v13, %v229_v6  ;;  %v982_v15 = vpop.f32.mrb[5].mxu1  ;;  %v6931_v6 = vld [vmem:[#allocation4 + $0x544] ss:$16 sps:$4 sm:$0xff]   ;;  %v6935_v13 = vld [vmem:[#allocation4 + $0x560] ss:$16 sps:$4 sm:$0xff]  }
 0x1a3   :  { %v983_v16 = vadd.f32 %v982_v15, %v233_v8  ;;  %v984_v17 = vpop.f32.mrb[6].mxu1  ;;  %2713 = vmatpush1.bf16.msra.mxu0 %v6857_v9  ;;  %2859 = vmatpush1.bf16.msra.mxu1 %v6860_v10  ;;  %v6934_v8 = vld [vmem:[#allocation4 + $0x42c] ss:$16 sps:$4 sm:$0xff]   ;;  %v6929_v9 = vld [vmem:[#allocation4 + $0x540] ss:$16 sps:$4 sm:$0xff]  }
 0x1a4   :  { %v1071_v21 = vmax.f32 %v981_v14, 0.0  ;;  %v985_v22 = vpop.f32.mrb[7].mxu1  ;;  %2714 = vmatprep.subr.bf16.mxu0 %v6865_v11  ;;  %2860 = vmatprep.subr.bf16.mxu1 %v6868_v12  ;;  %v6932_v10 = vld [vmem:[#allocation4 + $0x428] ss:$16 sps:$4 sm:$0xff]   ;;  %v6937_v11 = vld [vmem:[#allocation4 + $0x564] ss:$16 sps:$4 sm:$0xff]  }
 0x1a5   :  { %v1072_v25 = vmax.f32 %v983_v16, 0.0  ;;  %v6940_v12 = vld [vmem:[#allocation4 + $0x44c] ss:$16 sps:$4 sm:$0xff]   ;;  %v6938_v14 = vld [vmem:[#allocation4 + $0x448] ss:$16 sps:$4 sm:$0xff]   ;;  %v236_v22 = vsub.s32 4, %v7510_v50 }
 0x1a6   :  { %v7541_v26 = vpack.c.bf16 %v1071_v21, %v1071_v21  ;;  %v6943_v15 = vld [vmem:[#allocation4 + $0x584] ss:$16 sps:$4 sm:$0xff]   ;;  %v6946_v16 = vld [vmem:[#allocation4 + $0x46c] ss:$16 sps:$4 sm:$0xff]   ;;  %v6941_v17 = vld [vmem:[#allocation4 + $0x580] ss:$16 sps:$4 sm:$0xff]  }
 0x1a7   :  { %v1080_v27 = vpack.c.bf16 %v1072_v25, %v1072_v25  ;;  %2715 = vmatpush1.bf16.msra.mxu0 %v6863_v19  ;;  %2861 = vmatpush1.bf16.msra.mxu1 %v6866_v20  ;;  %v6944_v19 = vld [vmem:[#allocation4 + $0x468] ss:$16 sps:$4 sm:$0xff]   ;;  %v6949_v20 = vld [vmem:[#allocation4 + $0x5a4] ss:$16 sps:$4 sm:$0xff]   ;;  %v6952_v21 = vld [vmem:[#allocation4 + $0x48c] ss:$16 sps:$4 sm:$0xff]  }
 0x1a8   :  { %2725 = vmatprep.subr.bf16.mxu0 %v6871_v23  ;;  %2862 = vmatprep.subr.bf16.mxu1 %v6874_v24  ;;  %v6947_v23 = vld [vmem:[#allocation4 + $0x5a0] ss:$16 sps:$4 sm:$0xff]   ;;  %v6950_v24 = vld [vmem:[#allocation4 + $0x488] ss:$16 sps:$4 sm:$0xff]   ;;  %v240_v25 = vsub.s32 5, %v7510_v50 }
 0x1a9   :  { %2716 = vmatprep.mubr.bf16.mxu0 %v1080_v27  ;;  %2880 = vmatprep.mubr.bf16.mxu1 %v1080_v27  ;;  %v6958_v27 = vld [vmem:[#allocation4 + $0x4ac] ss:$16 sps:$4 sm:$0xff]  }
 0x1aa   :  { %2717 = vmatmul.mubr.bf16.vlgmr.msra.gmra.mrb[0].mxu0 %v7541_v26 }
 0x1ab   :  { %2726 = vmatpush1.bf16.msra.mxu0 %v6869_v28  ;;  %2863 = vmatpush1.bf16.msra.mxu1 %v6872_v29  ;;  %v237_v28 = vrot.slane %v7518_v54, %v236_v22  ;;  %v241_v29 = vrot.slane %v7518_v54, %v240_v25 }
 0x1ac   :  { %2727 = vmatprep.subr.bf16.mxu0 %v6877_v30  ;;  %2864 = vmatprep.subr.bf16.mxu1 %v6880_v31  ;;  %v6953_v30 = vld [vmem:[#allocation4 + $0x5c0] ss:$16 sps:$4 sm:$0xff]   ;;  %v6956_v31 = vld [vmem:[#allocation4 + $0x4a8] ss:$16 sps:$4 sm:$0xff]  }
 0x1af   :  { %2728 = vmatpush1.bf16.msra.mxu0 %v6875_v32  ;;  %2865 = vmatpush1.bf16.msra.mxu1 %v6878_v33  ;;  %v6961_v32 = vld [vmem:[#allocation4 + $0x5e4] ss:$16 sps:$4 sm:$0xff]   ;;  %v6964_v33 = vld [vmem:[#allocation4 + $0x4cc] ss:$16 sps:$4 sm:$0xff]  }
 0x1b0   :  { %2729 = vmatprep.subr.bf16.mxu0 %v6883_v34  ;;  %2866 = vmatprep.subr.bf16.mxu1 %v6886_v35 }
 0x1b3   :  { %2730 = vmatpush1.bf16.msra.mxu0 %v6881_v36  ;;  %2867 = vmatpush1.bf16.msra.mxu1 %v6884_v37 }
 0x1b4   :  { %2731 = vmatprep.subr.bf16.mxu0 %v6889_v38  ;;  %2868 = vmatprep.subr.bf16.mxu1 %v6892_v39  ;;  %v6959_v39 = vld [vmem:[#allocation4 + $0x5e0] ss:$16 sps:$4 sm:$0xff]  }
 0x1b7   :  { %2732 = vmatpush1.bf16.msra.mxu0 %v6887_v40  ;;  %2869 = vmatpush1.bf16.msra.mxu1 %v6890_v41  ;;  %v6962_v40 = vld [vmem:[#allocation4 + $0x4c8] ss:$16 sps:$4 sm:$0xff]  }
 0x1b8   :  { %2733 = vmatprep.subr.bf16.mxu0 %v6895_v42  ;;  %2870 = vmatprep.subr.bf16.mxu1 %v6898_v43  ;;  %v6967_v43 = vld [vmem:[#allocation4 + $0x604] ss:$16 sps:$4 sm:$0xff]  }
 0x1bb   :  { %2734 = vmatpush1.bf16.msra.mxu0 %v6893_v44  ;;  %2871 = vmatpush1.bf16.msra.mxu1 %v6896_v45  ;;  %v6970_v44 = vld [vmem:[#allocation4 + $0x4ec] ss:$16 sps:$4 sm:$0xff]  }
 0x1bc   :  { %2735 = vmatprep.subr.bf16.mxu0 %v6901_v46  ;;  %2872 = vmatprep.subr.bf16.mxu1 %v6904_v47 }
 0x1bf   :  { %2736 = vmatpush1.bf16.msra.mxu0 %v6899_v48  ;;  %2873 = vmatpush1.bf16.msra.mxu1 %v6902_v49  ;;  %v6965_v48 = vld [vmem:[#allocation4 + $0x600] ss:$16 sps:$4 sm:$0xff]   ;;  %v6968_v49 = vld [vmem:[#allocation4 + $0x4e8] ss:$16 sps:$4 sm:$0xff]  }
 0x1c0   :  { %2737 = vmatprep.subr.bf16.mxu0 %v6907_v51  ;;  %2874 = vmatprep.subr.bf16.mxu1 %v6910_v52  ;;  %v6973_v51 = vld [vmem:[#allocation4 + $0x624] ss:$16 sps:$4 sm:$0xff]   ;;  %v6976_v52 = vld [vmem:[#allocation4 + $0x50c] ss:$16 sps:$4 sm:$0xff]  }
 0x1c3   :  { %2738 = vmatpush1.bf16.msra.mxu0 %v6905_v7  ;;  %2875 = vmatpush1.bf16.msra.mxu1 %v6908_v56  ;;  %v6971_v7 = vld [vmem:[#allocation4 + $0x620] ss:$16 sps:$4 sm:$0xff]   ;;  %v6974_v56 = vld [vmem:[#allocation4 + $0x508] ss:$16 sps:$4 sm:$0xff]  }
 0x1c4   :  { %2739 = vmatprep.subr.bf16.mxu0 %v6913_v57  ;;  %2876 = vmatprep.subr.bf16.mxu1 %v6916_v58  ;;  %v6979_v57 = vld [vmem:[#allocation4 + $0x644] ss:$16 sps:$4 sm:$0xff]   ;;  %v6982_v58 = vld [vmem:[#allocation4 + $0x52c] ss:$16 sps:$4 sm:$0xff]  }
 0x1c7   :  { %2740 = vmatpush1.bf16.msra.mxu0 %v6911_v59  ;;  %2877 = vmatpush1.bf16.msra.mxu1 %v6914_v60  ;;  %v6977_v59 = vld [vmem:[#allocation4 + $0x640] ss:$16 sps:$4 sm:$0xff]   ;;  %v6980_v60 = vld [vmem:[#allocation4 + $0x528] ss:$16 sps:$4 sm:$0xff]  }
 0x1c8   :  { %2741 = vmatprep.subr.bf16.mxu0 %v6919_v61  ;;  %2878 = vmatprep.subr.bf16.mxu1 %v6922_v62  ;;  %v6985_v61 = vld [vmem:[#allocation4 + $0x664] ss:$16 sps:$4 sm:$0xff]   ;;  %v6988_v62 = vld [vmem:[#allocation4 + $0x54c] ss:$16 sps:$4 sm:$0xff]  }
 0x1cb   :  { %2742 = vmatpush1.bf16.msra.mxu0 %v6917_v18  ;;  %2879 = vmatpush1.bf16.msra.mxu1 %v6920_v63  ;;  %v6983_v18 = vld [vmem:[#allocation4 + $0x660] ss:$16 sps:$4 sm:$0xff]   ;;  %v6986_v63 = vld [vmem:[#allocation4 + $0x548] ss:$16 sps:$4 sm:$0xff]  }
 0x1cc   :  { %2743 = vmatprep.subr.bf16.mxu0 %v6925_v1  ;;  %2889 = vmatprep.subr.bf16.mxu1 %v6928_v2  ;;  %v6991_v1 = vld [vmem:[#allocation4 + $0x684] ss:$16 sps:$4 sm:$0xff]   ;;  %v6994_v2 = vld [vmem:[#allocation4 + $0x56c] ss:$16 sps:$4 sm:$0xff]  }
 0x1ce   :  { %2881 = vmatmul.mubr.bf16.vlgmr.msra.gmra.mrb[16].mxu1 %v7541_v26  ;;  %v6955_v26 = vld [vmem:[#allocation4 + $0x5c4] ss:$16 sps:$4 sm:$0xff]  }
 0x1cf   :  { %2744 = vmatpush1.bf16.msra.mxu0 %v6923_v4  ;;  %2890 = vmatpush1.bf16.msra.mxu1 %v6926_v5  ;;  %v6989_v4 = vld [vmem:[#allocation4 + $0x680] ss:$16 sps:$4 sm:$0xff]   ;;  %v6992_v5 = vld [vmem:[#allocation4 + $0x568] ss:$16 sps:$4 sm:$0xff]  }
 0x1d0   :  { %2745 = vmatprep.subr.bf16.mxu0 %v6931_v6  ;;  %2891 = vmatprep.subr.bf16.mxu1 %v6934_v8  ;;  %v6997_v6 = vld [vmem:[#allocation4 + $0x6a4] ss:$16 sps:$4 sm:$0xff]   ;;  %v7000_v8 = vld [vmem:[#allocation4 + $0x58c] ss:$16 sps:$4 sm:$0xff]  }
 0x1d3   :  { %2746 = vmatpush1.bf16.msra.mxu0 %v6929_v9  ;;  %2892 = vmatpush1.bf16.msra.mxu1 %v6932_v10  ;;  %v6995_v9 = vld [vmem:[#allocation4 + $0x6a0] ss:$16 sps:$4 sm:$0xff]   ;;  %v6998_v10 = vld [vmem:[#allocation4 + $0x588] ss:$16 sps:$4 sm:$0xff]  }
 0x1d4   :  { %2747 = vmatprep.subr.bf16.mxu0 %v6937_v11  ;;  %2893 = vmatprep.subr.bf16.mxu1 %v6940_v12  ;;  %v7003_v11 = vld [vmem:[#allocation4 + $0x6c4] ss:$16 sps:$4 sm:$0xff]   ;;  %v7006_v12 = vld [vmem:[#allocation4 + $0x5ac] ss:$16 sps:$4 sm:$0xff]  }
 0x1d7   :  { %2748 = vmatpush1.bf16.msra.mxu0 %v6935_v13  ;;  %2894 = vmatpush1.bf16.msra.mxu1 %v6938_v14  ;;  %v7001_v13 = vld [vmem:[#allocation4 + $0x6c0] ss:$16 sps:$4 sm:$0xff]   ;;  %v7004_v14 = vld [vmem:[#allocation4 + $0x5a8] ss:$16 sps:$4 sm:$0xff]  }
 0x1d8   :  { %2749 = vmatprep.subr.bf16.mxu0 %v6943_v15  ;;  %2895 = vmatprep.subr.bf16.mxu1 %v6946_v16  ;;  %v7009_v15 = vld [vmem:[#allocation4 + $0x6e4] ss:$16 sps:$4 sm:$0xff]   ;;  %v7012_v16 = vld [vmem:[#allocation4 + $0x5cc] ss:$16 sps:$4 sm:$0xff]  }
 0x1db   :  { %2750 = vmatpush1.bf16.msra.mxu0 %v6941_v17  ;;  %2896 = vmatpush1.bf16.msra.mxu1 %v6944_v19  ;;  %v7007_v17 = vld [vmem:[#allocation4 + $0x6e0] ss:$16 sps:$4 sm:$0xff]   ;;  %v7010_v19 = vld [vmem:[#allocation4 + $0x5c8] ss:$16 sps:$4 sm:$0xff]  }
 0x1dc   :  { %2751 = vmatprep.subr.bf16.mxu0 %v6949_v20  ;;  %2897 = vmatprep.subr.bf16.mxu1 %v6952_v21  ;;  %v7015_v20 = vld [vmem:[#allocation4 + $0x704] ss:$16 sps:$4 sm:$0xff]   ;;  %v7018_v21 = vld [vmem:[#allocation4 + $0x5ec] ss:$16 sps:$4 sm:$0xff]  }
 0x1df   :  { %2752 = vmatpush1.bf16.msra.mxu0 %v6947_v23  ;;  %2898 = vmatpush1.bf16.msra.mxu1 %v6950_v24  ;;  %v7013_v23 = vld [vmem:[#allocation4 + $0x700] ss:$16 sps:$4 sm:$0xff]   ;;  %v7016_v24 = vld [vmem:[#allocation4 + $0x5e8] ss:$16 sps:$4 sm:$0xff]  }
 0x1e0   :  { %2753 = vmatprep.subr.bf16.mxu0 %v6955_v26  ;;  %2899 = vmatprep.subr.bf16.mxu1 %v6958_v27  ;;  %v7021_v26 = vld [vmem:[#allocation4 + $0x724] ss:$16 sps:$4 sm:$0xff]   ;;  %v7024_v27 = vld [vmem:[#allocation4 + $0x60c] ss:$16 sps:$4 sm:$0xff]  }
 0x1e1   :  { %v1021_v34 = vpop.f32.mrb[8].mxu1 }
 0x1e2   :  { %v1022_v35 = vadd.f32 %v1021_v34, %v237_v28  ;;  %v1023_v36 = vpop.f32.mrb[9].mxu1  ;;  %v7019_v28 = vld [vmem:[#allocation4 + $0x720] ss:$16 sps:$4 sm:$0xff]   ;;  %v7033_v34 = vld [vmem:[#allocation4 + $0x764] ss:$16 sps:$4 sm:$0xff]  }
 0x1e3   :  { %v1024_v37 = vadd.f32 %v1023_v36, %v241_v29  ;;  %v1025_v38 = vpop.f32.mrb[10].mxu1  ;;  %2754 = vmatpush1.bf16.msra.mxu0 %v6953_v30  ;;  %2900 = vmatpush1.bf16.msra.mxu1 %v6956_v31  ;;  %v7022_v29 = vld [vmem:[#allocation4 + $0x608] ss:$16 sps:$4 sm:$0xff]   ;;  %v7027_v30 = vld [vmem:[#allocation4 + $0x744] ss:$16 sps:$4 sm:$0xff]  }
 0x1e4   :  { %v1073_v41 = vmax.f32 %v1022_v35, 0.0  ;;  %v1026_v42 = vpop.f32.mrb[11].mxu1  ;;  %2755 = vmatprep.subr.bf16.mxu0 %v6961_v32  ;;  %2901 = vmatprep.subr.bf16.mxu1 %v6964_v33  ;;  %v7030_v31 = vld [vmem:[#allocation4 + $0x62c] ss:$16 sps:$4 sm:$0xff]   ;;  %v7025_v32 = vld [vmem:[#allocation4 + $0x740] ss:$16 sps:$4 sm:$0xff]  }
 0x1e5   :  { %v1074_v45 = vmax.f32 %v1024_v37, 0.0  ;;  %v7028_v33 = vld [vmem:[#allocation4 + $0x628] ss:$16 sps:$4 sm:$0xff]   ;;  %v7036_v35 = vld [vmem:[#allocation4 + $0x64c] ss:$16 sps:$4 sm:$0xff]  }
 0x1e6   :  { %v7553_v46 = vpack.c.bf16 %v1073_v41, %v1073_v41  ;;  %v7031_v36 = vld [vmem:[#allocation4 + $0x760] ss:$16 sps:$4 sm:$0xff]   ;;  %v7034_v37 = vld [vmem:[#allocation4 + $0x648] ss:$16 sps:$4 sm:$0xff]   ;;  %v7039_v38 = vld [vmem:[#allocation4 + $0x784] ss:$16 sps:$4 sm:$0xff]  }
 0x1e7   :  { %v1082_v47 = vpack.c.bf16 %v1074_v45, %v1074_v45  ;;  %2756 = vmatpush1.bf16.msra.mxu0 %v6959_v39  ;;  %2902 = vmatpush1.bf16.msra.mxu1 %v6962_v40  ;;  %v7042_v39 = vld [vmem:[#allocation4 + $0x66c] ss:$16 sps:$4 sm:$0xff]   ;;  %v7037_v40 = vld [vmem:[#allocation4 + $0x780] ss:$16 sps:$4 sm:$0xff]   ;;  %v7040_v41 = vld [vmem:[#allocation4 + $0x668] ss:$16 sps:$4 sm:$0xff]  }
 0x1e8   :  { %2766 = vmatprep.subr.bf16.mxu0 %v6967_v43  ;;  %2903 = vmatprep.subr.bf16.mxu1 %v6970_v44  ;;  %v7045_v42 = vld [vmem:[#allocation4 + $0x7a4] ss:$16 sps:$4 sm:$0xff]   ;;  %v7048_v43 = vld [vmem:[#allocation4 + $0x68c] ss:$16 sps:$4 sm:$0xff]   ;;  %v244_v44 = vsub.s32 6, %v7510_v50 }
 0x1e9   :  { %2757 = vmatprep.mubr.bf16.mxu0 %v1082_v47  ;;  %2921 = vmatprep.mubr.bf16.mxu1 %v1082_v47  ;;  %v7043_v45 = vld [vmem:[#allocation4 + $0x7a0] ss:$16 sps:$4 sm:$0xff]   ;;  %v248_v47 = vsub.s32 7, %v7510_v50 }
 0x1ea   :  { %2758 = vmatmul.mubr.bf16.vlgmr.msra.gmra.mrb[0].mxu0 %v7553_v46  ;;  %v5029_v50 = vld [vmem:[%s7659_s8] sm:$0x3] }
 0x1eb   :  { %2767 = vmatpush1.bf16.msra.mxu0 %v6965_v48  ;;  %2904 = vmatpush1.bf16.msra.mxu1 %v6968_v49  ;;  %v7051_v48 = vld [vmem:[#allocation4 + $0x7c4] ss:$16 sps:$4 sm:$0xff]   ;;  %v7054_v49 = vld [vmem:[#allocation4 + $0x6ac] ss:$16 sps:$4 sm:$0xff]  }
 0x1ec   :  { %2768 = vmatprep.subr.bf16.mxu0 %v6973_v51  ;;  %2905 = vmatprep.subr.bf16.mxu1 %v6976_v52  ;;  %v245_v51 = vrot.slane %v7518_v54, %v244_v44  ;;  %v249_v52 = vrot.slane %v7518_v54, %v248_v47  ;;  %v7063_v54 = vld [vmem:[#allocation4 + $0x6ec] ss:$16 sps:$4 sm:$0xff]  }
 0x1ef   :  { %2769 = vmatpush1.bf16.msra.mxu0 %v6971_v7  ;;  %2906 = vmatpush1.bf16.msra.mxu1 %v6974_v56  ;;  %v7049_v7 = vld [vmem:[#allocation4 + $0x7c0] ss:$16 sps:$4 sm:$0xff]   ;;  %v7052_v56 = vld [vmem:[#allocation4 + $0x6a8] ss:$16 sps:$4 sm:$0xff]  }
 0x1f0   :  { %2770 = vmatprep.subr.bf16.mxu0 %v6979_v57  ;;  %2907 = vmatprep.subr.bf16.mxu1 %v6982_v58  ;;  %v7057_v57 = vld [vmem:[#allocation4 + $0x7e4] ss:$16 sps:$4 sm:$0xff]   ;;  %v7060_v58 = vld [vmem:[#allocation4 + $0x6cc] ss:$16 sps:$4 sm:$0xff]  }
 0x1f3   :  { %2771 = vmatpush1.bf16.msra.mxu0 %v6977_v59  ;;  %2908 = vmatpush1.bf16.msra.mxu1 %v6980_v60  ;;  %v2979_v60 = vld [vmem:[#allocation6] sm:$0xff] }
 0x1f4   :  { %2772 = vmatprep.subr.bf16.mxu0 %v6985_v61  ;;  %2909 = vmatprep.subr.bf16.mxu1 %v6988_v62  ;;  %v2983_v61 = vld [vmem:[#allocation6 + $0x20] sm:$0xff] }
 0x1f7   :  { %2773 = vmatpush1.bf16.msra.mxu0 %v6983_v18  ;;  %2910 = vmatpush1.bf16.msra.mxu1 %v6986_v63 }
 0x1f8   :  { %2774 = vmatprep.subr.bf16.mxu0 %v6991_v1  ;;  %2911 = vmatprep.subr.bf16.mxu1 %v6994_v2  ;;  %v7055_v2 = vld [vmem:[#allocation4 + $0x7e0] ss:$16 sps:$4 sm:$0xff]  }
 0x1fb   :  { %2775 = vmatpush1.bf16.msra.mxu0 %v6989_v4  ;;  %2912 = vmatpush1.bf16.msra.mxu1 %v6992_v5  ;;  %v7058_v4 = vld [vmem:[#allocation4 + $0x6c8] ss:$16 sps:$4 sm:$0xff]  }
 0x1fc   :  { %2776 = vmatprep.subr.bf16.mxu0 %v6997_v6  ;;  %2913 = vmatprep.subr.bf16.mxu1 %v7000_v8  ;;  %v6243_v8 = vcombine.high %v2979_v60, %v2983_v61 }
 0x1ff   :  { %2777 = vmatpush1.bf16.msra.mxu0 %v6995_v9  ;;  %2914 = vmatpush1.bf16.msra.mxu1 %v6998_v10  ;;  %v2987_v10 = vld [vmem:[#allocation6 + $0x40] sm:$0xff] }
 0x200   :  { %2778 = vmatprep.subr.bf16.mxu0 %v7003_v11  ;;  %2915 = vmatprep.subr.bf16.mxu1 %v7006_v12  ;;  %v2991_v11 = vld [vmem:[#allocation6 + $0x60] sm:$0xff] }
 0x203   :  { %2779 = vmatpush1.bf16.msra.mxu0 %v7001_v13  ;;  %2916 = vmatpush1.bf16.msra.mxu1 %v7004_v14  ;;  %v7061_v13 = vld [vmem:[#allocation4 + $0x6e8] ss:$16 sps:$4 sm:$0xff]   ;;  %v6242_v14 = vcombine.low %v2979_v60, %v2983_v61  ;;  %v7084_v60 = vld [vmem:[#allocation4 + $0x7cc] ss:$16 sps:$4 sm:$0xff]  }
 0x204   :  { %2780 = vmatprep.subr.bf16.mxu0 %v7009_v15  ;;  %2917 = vmatprep.subr.bf16.mxu1 %v7012_v16  ;;  %v7066_v16 = vld [vmem:[#allocation4 + $0x70c] ss:$16 sps:$4 sm:$0xff]  }
 0x207   :  { %2781 = vmatpush1.bf16.msra.mxu0 %v7007_v17  ;;  %2918 = vmatpush1.bf16.msra.mxu1 %v7010_v19  ;;  %v6251_v17 = vcombine.high %v2987_v10, %v2991_v11  ;;  %v2995_v19 = vld [vmem:[#allocation6 + $0x80] sm:$0xff] }
 0x208   :  { %2782 = vmatprep.subr.bf16.mxu0 %v7015_v20  ;;  %2919 = vmatprep.subr.bf16.mxu1 %v7018_v21  ;;  %v2999_v20 = vld [vmem:[#allocation6 + $0xa0] sm:$0xff]  ;;  %v7064_v21 = vld [vmem:[#allocation4 + $0x708] ss:$16 sps:$4 sm:$0xff]  }
 0x20b   :  { %2783 = vmatpush1.bf16.msra.mxu0 %v7013_v23  ;;  %2920 = vmatpush1.bf16.msra.mxu1 %v7016_v24  ;;  %v6250_v23 = vcombine.low %v2987_v10, %v2991_v11  ;;  %v7069_v24 = vld [vmem:[#allocation4 + $0x72c] ss:$16 sps:$4 sm:$0xff]  }
 0x20c   :  { %2784 = vmatprep.subr.bf16.mxu0 %v7021_v26  ;;  %2930 = vmatprep.subr.bf16.mxu1 %v7024_v27  ;;  %v6259_v26 = vcombine.high %v2995_v19, %v2999_v20  ;;  %v3003_v27 = vld [vmem:[#allocation6 + $0xc0] sm:$0xff] }
 0x20e   :  { %2922 = vmatmul.mubr.bf16.vlgmr.msra.gmra.mrb[16].mxu1 %v7553_v46  ;;  %v7046_v46 = vld [vmem:[#allocation4 + $0x688] ss:$16 sps:$4 sm:$0xff]  }
 0x20f   :  { %2785 = vmatpush1.bf16.msra.mxu0 %v7019_v28  ;;  %2931 = vmatpush1.bf16.msra.mxu1 %v7022_v29  ;;  %v3007_v28 = vld [vmem:[#allocation6 + $0xe0] sm:$0xff]  ;;  %v7067_v29 = vld [vmem:[#allocation4 + $0x728] ss:$16 sps:$4 sm:$0xff]  }
 0x210   :  { %2786 = vmatprep.subr.bf16.mxu0 %v7027_v30  ;;  %2932 = vmatprep.subr.bf16.mxu1 %v7030_v31  ;;  %v6258_v30 = vcombine.low %v2995_v19, %v2999_v20  ;;  %v7072_v31 = vld [vmem:[#allocation4 + $0x74c] ss:$16 sps:$4 sm:$0xff]  }
 0x213   :  { %2787 = vmatpush1.bf16.msra.mxu0 %v7025_v32  ;;  %2933 = vmatpush1.bf16.msra.mxu1 %v7028_v33  ;;  %v6267_v32 = vcombine.high %v3003_v27, %v3007_v28  ;;  %v3011_v33 = vld [vmem:[#allocation6 + $0x100] sm:$0xff] }
 0x214   :  { %2788 = vmatprep.subr.bf16.mxu0 %v7033_v34  ;;  %2934 = vmatprep.subr.bf16.mxu1 %v7036_v35  ;;  %v3015_v34 = vld [vmem:[#allocation6 + $0x120] sm:$0xff]  ;;  %v7070_v35 = vld [vmem:[#allocation4 + $0x748] ss:$16 sps:$4 sm:$0xff]  }
 0x217   :  { %2789 = vmatpush1.bf16.msra.mxu0 %v7031_v36  ;;  %2935 = vmatpush1.bf16.msra.mxu1 %v7034_v37  ;;  %v6266_v36 = vcombine.low %v3003_v27, %v3007_v28  ;;  %v7075_v37 = vld [vmem:[#allocation4 + $0x76c] ss:$16 sps:$4 sm:$0xff]   ;;  %v3067_v27 = vld [vmem:[#allocation6 + $0x2c0] sm:$0xff] }
 0x218   :  { %2790 = vmatprep.subr.bf16.mxu0 %v7039_v38  ;;  %2936 = vmatprep.subr.bf16.mxu1 %v7042_v39  ;;  %v6275_v38 = vcombine.high %v3011_v33, %v3015_v34  ;;  %v3019_v39 = vld [vmem:[#allocation6 + $0x140] sm:$0xff] }
 0x219   :  { %v3071_v28 = vld [vmem:[#allocation6 + $0x2e0] sm:$0xff] }
 0x21b   :  { %2791 = vmatpush1.bf16.msra.mxu0 %v7037_v40  ;;  %2937 = vmatpush1.bf16.msra.mxu1 %v7040_v41  ;;  %v3023_v40 = vld [vmem:[#allocation6 + $0x160] sm:$0xff]  ;;  %v7073_v41 = vld [vmem:[#allocation4 + $0x768] ss:$16 sps:$4 sm:$0xff]  }
 0x21c   :  { %2792 = vmatprep.subr.bf16.mxu0 %v7045_v42  ;;  %2938 = vmatprep.subr.bf16.mxu1 %v7048_v43  ;;  %v6274_v42 = vcombine.low %v3011_v33, %v3015_v34  ;;  %v7078_v43 = vld [vmem:[#allocation4 + $0x78c] ss:$16 sps:$4 sm:$0xff]   ;;  %v6331_v33 = vcombine.high %v3067_v27, %v3071_v28 }
 0x21d   :  { %v3008_v34 = vld [vmem:[#allocation6 + $0xe8] sm:$0xff] }
 0x21f   :  { %2793 = vmatpush1.bf16.msra.mxu0 %v7043_v45  ;;  %2939 = vmatpush1.bf16.msra.mxu1 %v7046_v46  ;;  %v6283_v45 = vcombine.high %v3019_v39, %v3023_v40  ;;  %v3027_v46 = vld [vmem:[#allocation6 + $0x180] sm:$0xff] }
 0x220   :  { %2794 = vmatprep.subr.bf16.mxu0 %v7051_v48  ;;  %2940 = vmatprep.subr.bf16.mxu1 %v7054_v49  ;;  %v3031_v48 = vld [vmem:[#allocation6 + $0x1a0] sm:$0xff]  ;;  %v7076_v49 = vld [vmem:[#allocation4 + $0x788] ss:$16 sps:$4 sm:$0xff]  }
 0x221   :  { %v1062_v59 = vpop.f32.mrb[12].mxu1 }
 0x222   :  { %v1063_v62 = vadd.f32 %v1062_v59, %v245_v51  ;;  %v1064_v18 = vpop.f32.mrb[13].mxu1  ;;  %v6282_v51 = vcombine.low %v3019_v39, %v3023_v40  ;;  %v6290_v59 = vcombine.low %v3027_v46, %v3031_v48  ;;  %v3012_v40 = vld [vmem:[#allocation6 + $0x108] sm:$0xff] }
 0x223   :  { %v1065_v63 = vadd.f32 %v1064_v18, %v249_v52  ;;  %v1066_v1 = vpop.f32.mrb[14].mxu1  ;;  %2795 = vmatpush1.bf16.msra.mxu0 %v7049_v7  ;;  %2941 = vmatpush1.bf16.msra.mxu1 %v7052_v56  ;;  %v7081_v52 = vld [vmem:[#allocation4 + $0x7ac] ss:$16 sps:$4 sm:$0xff]   ;;  %v6291_v7 = vcombine.high %v3027_v46, %v3031_v48  ;;  %v3035_v56 = vld [vmem:[#allocation6 + $0x1c0] sm:$0xff] }
 0x224   :  { %v1075_v5 = vmax.f32 %v1063_v62, 0.0  ;;  %v1067_v6 = vpop.f32.mrb[15].mxu1  ;;  %2796 = vmatprep.subr.bf16.mxu0 %v7057_v57  ;;  %2942 = vmatprep.subr.bf16.mxu1 %v7060_v58  ;;  %v3039_v57 = vld [vmem:[#allocation6 + $0x1e0] sm:$0xff]  ;;  %v7079_v58 = vld [vmem:[#allocation4 + $0x7a8] ss:$16 sps:$4 sm:$0xff]  }
 0x225   :  { %v1076_v9 = vmax.f32 %v1065_v63, 0.0  ;;  %v6299_v61 = vcombine.high %v3035_v56, %v3039_v57  ;;  %v3043_v62 = vld [vmem:[#allocation6 + $0x200] sm:$0xff]  ;;  %v7082_v63 = vld [vmem:[#allocation4 + $0x7c8] ss:$16 sps:$4 sm:$0xff]   ;;  %v6298_v1 = vcombine.low %v3035_v56, %v3039_v57 }
 0x226   :  { %v7565_v15 = vpack.c.bf16 %v1075_v5, %v1075_v5  ;;  %v3047_v18 = vld [vmem:[#allocation6 + $0x220] sm:$0xff]  ;;  %v2984_v6 = vld [vmem:[#allocation6 + $0x28] sm:$0xff] }
 0x227   :  { %v1084_v12 = vpack.c.bf16 %v1076_v9, %v1076_v9  ;;  %2797 = vmatpush1.bf16.msra.mxu0 %v7055_v2  ;;  %2943 = vmatpush1.bf16.msra.mxu1 %v7058_v4  ;;  %v7087_v2 = vld [vmem:[#allocation4 + $0x7ec] ss:$16 sps:$4 sm:$0xff]   ;;  %v6307_v5 = vcombine.high %v3043_v62, %v3047_v18  ;;  %v7085_v9 = vld [vmem:[#allocation4 + $0x7e8] ss:$16 sps:$4 sm:$0xff]   ;;  %v6306_v10 = vcombine.low %v3043_v62, %v3047_v18 }
 0x228   :  { %2944 = vmatprep.subr.bf16.mxu1 %v7063_v54  ;;  %4557 = vmatprep.subr.bf16.mxu0 %v6243_v8  ;;  %v2980_v4 = vld [vmem:[#allocation6 + $0x8] sm:$0xff]  ;;  %v3051_v54 = vld [vmem:[#allocation6 + $0x240] sm:$0xff] }
 0x229   :  { %2798 = vmatprep.mubr.bf16.mxu0 %v1084_v12  ;;  %2962 = vmatprep.mubr.bf16.mxu1 %v1084_v12  ;;  %v3055_v8 = vld [vmem:[#allocation6 + $0x260] sm:$0xff]  ;;  %v6245_v11 = vcombine.high %v2980_v4, %v2984_v6  ;;  %v2988_v12 = vld [vmem:[#allocation6 + $0x48] sm:$0xff]  ;;  %v6244_v19 = vcombine.low %v2980_v4, %v2984_v6 }
 0x22a   :  { %2799 = vmatmul.mubr.bf16.vlgmr.msra.gmra.mrb[0].mxu0 %v7565_v15  ;;  %v6314_v20 = vcombine.low %v3051_v54, %v3055_v8  ;;  %v3036_v62 = vld [vmem:[#allocation6 + $0x1c8] sm:$0xff] }
 0x22b   :  { %2945 = vmatpush1.bf16.msra.mxu1 %v7061_v13  ;;  %4558 = vmatpush1.bf16.msra.mxu0 %v6242_v14  ;;  %v6315_v13 = vcombine.high %v3051_v54, %v3055_v8  ;;  %v2992_v14 = vld [vmem:[#allocation6 + $0x68] sm:$0xff] }
 0x22c   :  { %2946 = vmatprep.subr.bf16.mxu1 %v7066_v16  ;;  %4559 = vmatprep.subr.bf16.mxu0 %v6251_v17  ;;  %v3059_v16 = vld [vmem:[#allocation6 + $0x280] sm:$0xff]  ;;  %v3040_v18 = vld [vmem:[#allocation6 + $0x1e8] sm:$0xff] }
 0x22d   :  { %v3063_v17 = vld [vmem:[#allocation6 + $0x2a0] sm:$0xff]  ;;  %v3048_v4 = vld [vmem:[#allocation6 + $0x228] sm:$0xff] }
 0x22e   :  { %v3052_v54 = vld [vmem:[#allocation6 + $0x248] sm:$0xff] }
 0x22f   :  { %2947 = vmatpush1.bf16.msra.mxu1 %v7064_v21  ;;  %4560 = vmatpush1.bf16.msra.mxu0 %v6250_v23  ;;  %v6253_v21 = vcombine.high %v2988_v12, %v2992_v14  ;;  %v2996_v23 = vld [vmem:[#allocation6 + $0x88] sm:$0xff] }
 0x230   :  { %2948 = vmatprep.subr.bf16.mxu1 %v7069_v24  ;;  %4561 = vmatprep.subr.bf16.mxu0 %v6259_v26  ;;  %v6323_v24 = vcombine.high %v3059_v16, %v3063_v17  ;;  %v3000_v26 = vld [vmem:[#allocation6 + $0xa8] sm:$0xff] }
 0x231   :  { %v3056_v8 = vld [vmem:[#allocation6 + $0x268] sm:$0xff] }
 0x233   :  { %2949 = vmatpush1.bf16.msra.mxu1 %v7067_v29  ;;  %4562 = vmatpush1.bf16.msra.mxu0 %v6258_v30  ;;  %v6252_v29 = vcombine.low %v2988_v12, %v2992_v14  ;;  %v6322_v30 = vcombine.low %v3059_v16, %v3063_v17  ;;  %v3064_v12 = vld [vmem:[#allocation6 + $0x2a8] sm:$0xff] }
 0x234   :  { %2950 = vmatprep.subr.bf16.mxu1 %v7072_v31  ;;  %4563 = vmatprep.subr.bf16.mxu0 %v6267_v32  ;;  %v6261_v31 = vcombine.high %v2996_v23, %v3000_v26  ;;  %v3004_v32 = vld [vmem:[#allocation6 + $0xc8] sm:$0xff] }
 0x235   :  { %v6269_v39 = vcombine.high %v3004_v32, %v3008_v34  ;;  %v3068_v16 = vld [vmem:[#allocation6 + $0x2c8] sm:$0xff] }
 0x236   :  { %v3072_v17 = vld [vmem:[#allocation6 + $0x2e8] sm:$0xff] }
 0x237   :  { %2951 = vmatpush1.bf16.msra.mxu1 %v7070_v35  ;;  %4564 = vmatpush1.bf16.msra.mxu0 %v6266_v36  ;;  %v3075_v35 = vld [vmem:[#allocation6 + $0x300] sm:$0xff] }
 0x238   :  { %2952 = vmatprep.subr.bf16.mxu1 %v7075_v37  ;;  %4565 = vmatprep.subr.bf16.mxu0 %v6275_v38  ;;  %v3079_v36 = vld [vmem:[#allocation6 + $0x320] sm:$0xff]  ;;  %v6260_v37 = vcombine.low %v2996_v23, %v3000_v26  ;;  %v6330_v38 = vcombine.low %v3067_v27, %v3071_v28  ;;  %v3080_v23 = vld [vmem:[#allocation6 + $0x328] sm:$0xff] }
 0x239   :  { %v6338_v46 = vcombine.low %v3075_v35, %v3079_v36  ;;  %v3084_v27 = vld [vmem:[#allocation6 + $0x348] sm:$0xff] }
 0x23a   :  { %v3088_v28 = vld [vmem:[#allocation6 + $0x368] sm:$0xff] }
 0x23b   :  { %2953 = vmatpush1.bf16.msra.mxu1 %v7073_v41  ;;  %4566 = vmatpush1.bf16.msra.mxu0 %v6274_v42  ;;  %v3016_v41 = vld [vmem:[#allocation6 + $0x128] sm:$0xff]  ;;  %v3083_v42 = vld [vmem:[#allocation6 + $0x340] sm:$0xff] }
 0x23c   :  { %2954 = vmatprep.subr.bf16.mxu1 %v7078_v43  ;;  %4567 = vmatprep.subr.bf16.mxu0 %v6283_v45  ;;  %v3087_v43 = vld [vmem:[#allocation6 + $0x360] sm:$0xff]  ;;  %v6268_v45 = vcombine.low %v3004_v32, %v3008_v34  ;;  %v6277_v48 = vcombine.high %v3012_v40, %v3016_v41 }
 0x23d   :  { %v6346_v56 = vcombine.low %v3083_v42, %v3087_v43 }
 0x23f   :  { %2955 = vmatpush1.bf16.msra.mxu1 %v7076_v49  ;;  %4568 = vmatpush1.bf16.msra.mxu0 %v6282_v51  ;;  %v6347_v49 = vcombine.high %v3083_v42, %v3087_v43  ;;  %v3020_v51 = vld [vmem:[#allocation6 + $0x148] sm:$0xff] }
 0x240   :  { %2956 = vmatprep.subr.bf16.mxu1 %v7081_v52  ;;  %4569 = vmatprep.subr.bf16.mxu0 %v6291_v7  ;;  %v3024_v52 = vld [vmem:[#allocation6 + $0x168] sm:$0xff]  ;;  %v6276_v7 = vcombine.low %v3012_v40, %v3016_v41 }
 0x241   :  { %v6285_v57 = vcombine.high %v3020_v51, %v3024_v52  ;;  %v3100_v42 = vld [vmem:[#allocation6 + $0x3c8] sm:$0xff] }
 0x242   :  { %v3104_v43 = vld [vmem:[#allocation6 + $0x3e8] sm:$0xff] }
 0x243   :  { %2957 = vmatpush1.bf16.msra.mxu1 %v7079_v58  ;;  %4570 = vmatpush1.bf16.msra.mxu0 %v6290_v59  ;;  %v3028_v58 = vld [vmem:[#allocation6 + $0x188] sm:$0xff] }
 0x244   :  { %2958 = vmatprep.subr.bf16.mxu1 %v7084_v60  ;;  %4571 = vmatprep.subr.bf16.mxu0 %v6299_v61  ;;  %v3032_v59 = vld [vmem:[#allocation6 + $0x1a8] sm:$0xff]  ;;  %v6284_v60 = vcombine.low %v3020_v51, %v3024_v52 }
 0x245   :  { %v6293_v61 = vcombine.high %v3028_v58, %v3032_v59  ;;  %v3112_v52 = vld [vmem:[#allocation6 + $0x428] sm:$0xff] }
 0x247   :  { %2959 = vmatpush1.bf16.msra.mxu1 %v7082_v63  ;;  %4572 = vmatpush1.bf16.msra.mxu0 %v6298_v1  ;;  %v6292_v63 = vcombine.low %v3028_v58, %v3032_v59  ;;  %v6301_v1 = vcombine.high %v3036_v62, %v3040_v18  ;;  %v6364_v58 = vcombine.low %v3100_v42, %v3104_v43 }
 0x248   :  { %2960 = vmatprep.subr.bf16.mxu1 %v7087_v2  ;;  %4573 = vmatprep.subr.bf16.mxu0 %v6307_v5  ;;  %v3044_v2 = vld [vmem:[#allocation6 + $0x208] sm:$0xff]  ;;  %v6300_v5 = vcombine.low %v3036_v62, %v3040_v18 }
 0x249   :  { %v6309_v6 = vcombine.high %v3044_v2, %v3048_v4 }
 0x24b   :  { %2961 = vmatpush1.bf16.msra.mxu1 %v7085_v9  ;;  %4574 = vmatpush1.bf16.msra.mxu0 %v6306_v10  ;;  %v6308_v9 = vcombine.low %v3044_v2, %v3048_v4  ;;  %v6317_v10 = vcombine.high %v3052_v54, %v3056_v8 }
 0x24c   :  { %4639 = vmatprep.subr.bf16.mxu1 %v6245_v11  ;;  %4575 = vmatprep.subr.bf16.mxu0 %v6315_v13  ;;  %v3060_v11 = vld [vmem:[#allocation6 + $0x288] sm:$0xff]  ;;  %v6316_v13 = vcombine.low %v3052_v54, %v3056_v8  ;;  %v3115_v54 = vld [vmem:[#allocation6 + $0x440] sm:$0xff] }
 0x24d   :  { %v6325_v14 = vcombine.high %v3060_v11, %v3064_v12 }
 0x24e   :  { %2963 = vmatmul.mubr.bf16.vlgmr.msra.gmra.mrb[16].mxu1 %v7565_v15  ;;  %v6339_v15 = vcombine.high %v3075_v35, %v3079_v36  ;;  %v3092_v35 = vld [vmem:[#allocation6 + $0x388] sm:$0xff] }
 0x24f   :  { %4640 = vmatpush1.bf16.msra.mxu1 %v6244_v19  ;;  %4576 = vmatpush1.bf16.msra.mxu0 %v6314_v20  ;;  %v6324_v19 = vcombine.low %v3060_v11, %v3064_v12  ;;  %v6333_v20 = vcombine.high %v3068_v16, %v3072_v17  ;;  %v3096_v36 = vld [vmem:[#allocation6 + $0x3a8] sm:$0xff] }
 0x250   :  { %4641 = vmatprep.subr.bf16.mxu1 %v6253_v21  ;;  %4577 = vmatprep.subr.bf16.mxu0 %v6323_v24  ;;  %v3076_v21 = vld [vmem:[#allocation6 + $0x308] sm:$0xff]  ;;  %v6332_v24 = vcombine.low %v3068_v16, %v3072_v17  ;;  %v3123_v17 = vld [vmem:[#allocation6 + $0x480] sm:$0xff] }
 0x251   :  { %v6341_v26 = vcombine.high %v3076_v21, %v3080_v23  ;;  %v3120_v11 = vld [vmem:[#allocation6 + $0x468] sm:$0xff] }
 0x253   :  { %4642 = vmatpush1.bf16.msra.mxu1 %v6252_v29  ;;  %4578 = vmatpush1.bf16.msra.mxu0 %v6322_v30  ;;  %v3091_v29 = vld [vmem:[#allocation6 + $0x380] sm:$0xff] }
 0x254   :  { %4643 = vmatprep.subr.bf16.mxu1 %v6261_v31  ;;  %4579 = vmatprep.subr.bf16.mxu0 %v6331_v33  ;;  %v3095_v30 = vld [vmem:[#allocation6 + $0x3a0] sm:$0xff]  ;;  %v6340_v31 = vcombine.low %v3076_v21, %v3080_v23  ;;  %v6349_v33 = vcombine.high %v3084_v27, %v3088_v28  ;;  %v3128_v21 = vld [vmem:[#allocation6 + $0x4a8] sm:$0xff] }
 0x255   :  { %v6355_v32 = vcombine.high %v3091_v29, %v3095_v30  ;;  %v6354_v34 = vcombine.low %v3091_v29, %v3095_v30  ;;  %v3135_v29 = vld [vmem:[#allocation6 + $0x4e0] sm:$0xff]  ;;  %v3132_v30 = vld [vmem:[#allocation6 + $0x4c8] sm:$0xff] }
 0x257   :  { %4644 = vmatpush1.bf16.msra.mxu1 %v6260_v37  ;;  %4580 = vmatpush1.bf16.msra.mxu0 %v6330_v38  ;;  %v3099_v37 = vld [vmem:[#allocation6 + $0x3c0] sm:$0xff] }
 0x258   :  { %4645 = vmatprep.subr.bf16.mxu1 %v6269_v39  ;;  %4581 = vmatprep.subr.bf16.mxu0 %v6339_v15  ;;  %v3103_v38 = vld [vmem:[#allocation6 + $0x3e0] sm:$0xff]  ;;  %v6348_v39 = vcombine.low %v3084_v27, %v3088_v28  ;;  %v6357_v15 = vcombine.high %v3092_v35, %v3096_v36 }
 0x259   :  { %v6363_v40 = vcombine.high %v3099_v37, %v3103_v38  ;;  %v6362_v41 = vcombine.low %v3099_v37, %v3103_v38  ;;  %v3131_v28 = vld [vmem:[#allocation6 + $0x4c0] sm:$0xff]  ;;  %v3140_v38 = vld [vmem:[#allocation6 + $0x508] sm:$0xff] }
 0x25a   :  { %v3143_v37 = vld [vmem:[#allocation6 + $0x520] sm:$0xff] }
 0x25b   :  { %4646 = vmatpush1.bf16.msra.mxu1 %v6268_v45  ;;  %4582 = vmatpush1.bf16.msra.mxu0 %v6338_v46  ;;  %v3107_v45 = vld [vmem:[#allocation6 + $0x400] sm:$0xff] }
 0x25c   :  { %4647 = vmatprep.subr.bf16.mxu1 %v6277_v48  ;;  %4583 = vmatprep.subr.bf16.mxu0 %v6347_v49  ;;  %v3111_v46 = vld [vmem:[#allocation6 + $0x420] sm:$0xff]  ;;  %v3108_v48 = vld [vmem:[#allocation6 + $0x408] sm:$0xff]  ;;  %v6356_v49 = vcombine.low %v3092_v35, %v3096_v36 }
 0x25d   :  { %v6371_v51 = vcombine.high %v3107_v45, %v3111_v46  ;;  %v6373_v59 = vcombine.high %v3108_v48, %v3112_v52  ;;  %v3139_v36 = vld [vmem:[#allocation6 + $0x500] sm:$0xff] }
 0x25f   :  { %4648 = vmatpush1.bf16.msra.mxu1 %v6276_v7  ;;  %4584 = vmatpush1.bf16.msra.mxu0 %v6346_v56  ;;  %v6365_v7 = vcombine.high %v3100_v42, %v3104_v43  ;;  %v6370_v56 = vcombine.low %v3107_v45, %v3111_v46  ;;  %v3147_v43 = vld [vmem:[#allocation6 + $0x540] sm:$0xff]  ;;  %v3148_v46 = vld [vmem:[#allocation6 + $0x548] sm:$0xff] }
 0x260   :  { %4649 = vmatprep.subr.bf16.mxu1 %v6285_v57  ;;  %4585 = vmatprep.subr.bf16.mxu0 %v6355_v32  ;;  %v6372_v57 = vcombine.low %v3108_v48, %v3112_v52  ;;  %v3151_v45 = vld [vmem:[#allocation6 + $0x560] sm:$0xff]  ;;  %v3152_v48 = vld [vmem:[#allocation6 + $0x568] sm:$0xff] }
 0x261   :  { %v6411_v52 = vcombine.high %v3147_v43, %v3151_v45 }
 0x263   :  { %4650 = vmatpush1.bf16.msra.mxu1 %v6284_v60  ;;  %4586 = vmatpush1.bf16.msra.mxu0 %v6354_v34  ;;  %v7572_v60 = vld [vmem:[%s7657_s6] sm:$0xf]  ;;  %v6395_v34 = vcombine.high %v3131_v28, %v3135_v29 }
 0x264   :  { %4651 = vmatprep.subr.bf16.mxu1 %v6293_v61  ;;  %4587 = vmatprep.subr.bf16.mxu0 %v6363_v40  ;;  %v1346_v61 = vrot.slane %v7572_v60, %v7513_v53  ;;  %v1350_v62 = vrot.slane %v7572_v60, %v7521_v55  ;;  %v6394_v40 = vcombine.low %v3131_v28, %v3135_v29  ;;  %v3180_v28 = vld [vmem:[#allocation6 + $0x648] sm:$0xff] }
 0x265   :  { %v3184_v29 = vld [vmem:[#allocation6 + $0x668] sm:$0xff] }
 0x267   :  { %4652 = vmatpush1.bf16.msra.mxu1 %v6292_v63  ;;  %4588 = vmatpush1.bf16.msra.mxu0 %v6362_v41  ;;  %v6403_v41 = vcombine.high %v3139_v36, %v3143_v37 }
 0x268   :  { %4653 = vmatprep.subr.bf16.mxu1 %v6301_v1  ;;  %4598 = vmatprep.subr.bf16.mxu0 %v6371_v51 }
 0x26b   :  { %4654 = vmatpush1.bf16.msra.mxu1 %v6300_v5 }
 0x26c   :  { %4655 = vmatprep.subr.bf16.mxu1 %v6309_v6 }
 0x26f   :  { %4656 = vmatpush1.bf16.msra.mxu1 %v6308_v9  ;;  %v3119_v9 = vld [vmem:[#allocation6 + $0x460] sm:$0xff] }
 0x270   :  { %4657 = vmatprep.subr.bf16.mxu1 %v6317_v10  ;;  %v3116_v10 = vld [vmem:[#allocation6 + $0x448] sm:$0xff]  ;;  %v6378_v23 = vcombine.low %v3115_v54, %v3119_v9 }
 0x271   :  { %v6381_v16 = vcombine.high %v3116_v10, %v3120_v11 }
 0x273   :  { %4658 = vmatpush1.bf16.msra.mxu1 %v6316_v13 }
 0x274   :  { %4659 = vmatprep.subr.bf16.mxu1 %v6325_v14  ;;  %v6379_v14 = vcombine.high %v3115_v54, %v3119_v9 }
 0x277   :  { %4660 = vmatpush1.bf16.msra.mxu1 %v6324_v19  ;;  %v3127_v19 = vld [vmem:[#allocation6 + $0x4a0] sm:$0xff] }
 0x278   :  { %4661 = vmatprep.subr.bf16.mxu1 %v6333_v20  ;;  %v3124_v20 = vld [vmem:[#allocation6 + $0x488] sm:$0xff]  ;;  %v6386_v32 = vcombine.low %v3123_v17, %v3127_v19 }
 0x279   :  { %v6389_v27 = vcombine.high %v3124_v20, %v3128_v21 }
 0x27b   :  { %4662 = vmatpush1.bf16.msra.mxu1 %v6332_v24  ;;  %v6380_v24 = vcombine.low %v3116_v10, %v3120_v11  ;;  %v3171_v10 = vld [vmem:[#allocation6 + $0x600] sm:$0xff] }
 0x27c   :  { %4663 = vmatprep.subr.bf16.mxu1 %v6341_v26  ;;  %v6387_v26 = vcombine.high %v3123_v17, %v3127_v19  ;;  %v3175_v11 = vld [vmem:[#allocation6 + $0x620] sm:$0xff] }
 0x27f   :  { %4664 = vmatpush1.bf16.msra.mxu1 %v6340_v31  ;;  %v3136_v31 = vld [vmem:[#allocation6 + $0x4e8] sm:$0xff] }
 0x280   :  { %4665 = vmatprep.subr.bf16.mxu1 %v6349_v33  ;;  %v6388_v33 = vcombine.low %v3124_v20, %v3128_v21  ;;  %v6397_v35 = vcombine.high %v3132_v30, %v3136_v31  ;;  %v1358_v20 = vrot.slane %v7572_v60, %v7535_v3  ;;  %v6435_v21 = vcombine.high %v3171_v10, %v3175_v11 }
 0x283   :  { %4666 = vmatpush1.bf16.msra.mxu1 %v6348_v39  ;;  %v3144_v39 = vld [vmem:[#allocation6 + $0x528] sm:$0xff] }
 0x284   :  { %4667 = vmatprep.subr.bf16.mxu1 %v6357_v15  ;;  %v6396_v15 = vcombine.low %v3132_v30, %v3136_v31  ;;  %v6405_v42 = vcombine.high %v3140_v38, %v3144_v39  ;;  %v6404_v51 = vcombine.low %v3140_v38, %v3144_v39  ;;  %v3187_v38 = vld [vmem:[#allocation6 + $0x680] sm:$0xff] }
 0x287   :  { %4668 = vmatpush1.bf16.msra.mxu1 %v6356_v49  ;;  %v6402_v49 = vcombine.low %v3139_v36, %v3143_v37  ;;  %v6445_v37 = vcombine.high %v3180_v28, %v3184_v29 }
 0x288   :  { %4669 = vmatprep.subr.bf16.mxu1 %v6365_v7  ;;  %v6413_v7 = vcombine.high %v3148_v46, %v3152_v48 }
 0x28b   :  { %4670 = vmatpush1.bf16.msra.mxu1 %v6364_v58  ;;  %v3156_v58 = vld [vmem:[#allocation6 + $0x588] sm:$0xff] }
 0x28c   :  { %4680 = vmatprep.subr.bf16.mxu1 %v6373_v59  ;;  %v3160_v59 = vld [vmem:[#allocation6 + $0x5a8] sm:$0xff] }
 0x28d   :  { %v6420_v54 = vcombine.low %v3156_v58, %v3160_v59 }
 0x2fd   :  { %v2800_v18 = vpop.f32.mrb[0].mxu0 }
 0x2fe   :  { %v6626_v63 = vadd.f32 %v2800_v18, %v1346_v61  ;;  %v2802_v1 = vpop.f32.mrb[1].mxu0  ;;  %v6410_v61 = vcombine.low %v3147_v43, %v3151_v45  ;;  %v6444_v45 = vcombine.low %v3180_v28, %v3184_v29 }
 0x2ff   :  { %v6627_v2 = vadd.f32 %v2802_v1, %v1350_v62  ;;  %v2804_v4 = vpop.f32.mrb[2].mxu0  ;;  %v6412_v62 = vcombine.low %v3148_v46, %v3152_v48  ;;  %v3163_v1 = vld [vmem:[#allocation6 + $0x5c0] sm:$0xff] }
 0x300   :  { %v2971_v5 = vmax.f32 %v6626_v63, 0.0  ;;  %v2805_v6 = vpop.f32.mrb[3].mxu0  ;;  %v6421_v63 = vcombine.high %v3156_v58, %v3160_v59  ;;  %v3164_v4 = vld [vmem:[#allocation6 + $0x5c8] sm:$0xff] }
 0x301   :  { %v2972_v8 = vmax.f32 %v6627_v2, 0.0  ;;  %v3167_v2 = vld [vmem:[#allocation6 + $0x5e0] sm:$0xff] }
 0x302   :  { %v7580_v13 = vpack.c.bf16 %v2971_v5, %v2971_v5  ;;  %v3168_v5 = vld [vmem:[#allocation6 + $0x5e8] sm:$0xff]  ;;  %v6426_v17 = vcombine.low %v3163_v1, %v3167_v2 }
 0x303   :  { %v7578_v12 = vpack.c.bf16 %v2972_v8, %v2972_v8  ;;  %v6427_v8 = vcombine.high %v3163_v1, %v3167_v2  ;;  %v6429_v9 = vcombine.high %v3164_v4, %v3168_v5  ;;  %v6428_v19 = vcombine.low %v3164_v4, %v3168_v5 }
 0x305   :  { %4589 = vmatprep.mubr.bf16.mxu0 %v7578_v12  ;;  %4671 = vmatprep.mubr.bf16.mxu1 %v7578_v12 }
 0x306   :  { %4590 = vmatmul.mubr.bf16.vlgmr.msra.gmra.mrb[4].mxu0 %v7580_v13  ;;  %4672 = vmatmul.mubr.bf16.vlgmr.msra.gmra.mrb[20].mxu1 %v7580_v13 }
 0x307   :  { %4599 = vmatpush1.bf16.msra.mxu0 %v6370_v56  ;;  %4681 = vmatpush1.bf16.msra.mxu1 %v6372_v57  ;;  %v3155_v56 = vld [vmem:[#allocation6 + $0x580] sm:$0xff] }
 0x308   :  { %4600 = vmatprep.subr.bf16.mxu0 %v6379_v14  ;;  %4682 = vmatprep.subr.bf16.mxu1 %v6381_v16  ;;  %v3159_v57 = vld [vmem:[#allocation6 + $0x5a0] sm:$0xff]  ;;  %v3172_v14 = vld [vmem:[#allocation6 + $0x608] sm:$0xff] }
 0x309   :  { %v6419_v18 = vcombine.high %v3155_v56, %v3159_v57  ;;  %v6418_v6 = vcombine.low %v3155_v56, %v3159_v57  ;;  %v3176_v16 = vld [vmem:[#allocation6 + $0x628] sm:$0xff] }
 0x30b   :  { %4601 = vmatpush1.bf16.msra.mxu0 %v6378_v23  ;;  %4683 = vmatpush1.bf16.msra.mxu1 %v6380_v24  ;;  %v6437_v23 = vcombine.high %v3172_v14, %v3176_v16  ;;  %v3179_v24 = vld [vmem:[#allocation6 + $0x640] sm:$0xff] }
 0x30c   :  { %4602 = vmatprep.subr.bf16.mxu0 %v6387_v26  ;;  %4684 = vmatprep.subr.bf16.mxu1 %v6389_v27  ;;  %v3183_v27 = vld [vmem:[#allocation6 + $0x660] sm:$0xff] }
 0x30d   :  { %v6443_v36 = vcombine.high %v3179_v24, %v3183_v27  ;;  %v6442_v43 = vcombine.low %v3179_v24, %v3183_v27  ;;  %v1354_v27 = vrot.slane %v7572_v60, %v7532_v0  ;;  %v2985_v60 = vld [vmem:[#allocation6 + $0x30] sm:$0xff] }
 0x30f   :  { %4603 = vmatpush1.bf16.msra.mxu0 %v6386_v32  ;;  %4685 = vmatpush1.bf16.msra.mxu1 %v6388_v33  ;;  %v6434_v33 = vcombine.low %v3171_v10, %v3175_v11 }
 0x310   :  { %4604 = vmatprep.subr.bf16.mxu0 %v6395_v34  ;;  %4686 = vmatprep.subr.bf16.mxu1 %v6397_v35  ;;  %v6436_v34 = vcombine.low %v3172_v14, %v3176_v16 }
 0x313   :  { %4605 = vmatpush1.bf16.msra.mxu0 %v6394_v40  ;;  %4687 = vmatpush1.bf16.msra.mxu1 %v6396_v15  ;;  %v3191_v40 = vld [vmem:[#allocation6 + $0x6a0] sm:$0xff]  ;;  %v3188_v15 = vld [vmem:[#allocation6 + $0x688] sm:$0xff] }
 0x314   :  { %4606 = vmatprep.subr.bf16.mxu0 %v6403_v41  ;;  %4688 = vmatprep.subr.bf16.mxu1 %v6405_v42  ;;  %v3192_v41 = vld [vmem:[#allocation6 + $0x6a8] sm:$0xff]  ;;  %v6451_v46 = vcombine.high %v3187_v38, %v3191_v40  ;;  %v6450_v56 = vcombine.low %v3187_v38, %v3191_v40  ;;  %v2982_v40 = vld [vmem:[#allocation6 + $0x18] sm:$0xff] }
 0x315   :  { %v6453_v48 = vcombine.high %v3188_v15, %v3192_v41  ;;  %v6452_v57 = vcombine.low %v3188_v15, %v3192_v41  ;;  %v2986_v15 = vld [vmem:[#allocation6 + $0x38] sm:$0xff] }
 0x317   :  { %4607 = vmatpush1.bf16.msra.mxu0 %v6402_v49  ;;  %4689 = vmatpush1.bf16.msra.mxu1 %v6404_v51  ;;  %v3195_v49 = vld [vmem:[#allocation6 + $0x6c0] sm:$0xff] }
 0x318   :  { %4608 = vmatprep.subr.bf16.mxu0 %v6411_v52  ;;  %4690 = vmatprep.subr.bf16.mxu1 %v6413_v7  ;;  %v3199_v51 = vld [vmem:[#allocation6 + $0x6e0] sm:$0xff]  ;;  %v3196_v52 = vld [vmem:[#allocation6 + $0x6c8] sm:$0xff] }
 0x319   :  { %v3200_v7 = vld [vmem:[#allocation6 + $0x6e8] sm:$0xff]  ;;  %v6459_v58 = vcombine.high %v3195_v49, %v3199_v51  ;;  %v6458_v1 = vcombine.low %v3195_v49, %v3199_v51  ;;  %v2989_v49 = vld [vmem:[#allocation6 + $0x50] sm:$0xff] }
 0x31a   :  { %v6461_v59 = vcombine.high %v3196_v52, %v3200_v7  ;;  %v6460_v2 = vcombine.low %v3196_v52, %v3200_v7  ;;  %v2993_v51 = vld [vmem:[#allocation6 + $0x70] sm:$0xff]  ;;  %v2994_v52 = vld [vmem:[#allocation6 + $0x78] sm:$0xff] }
 0x31b   :  { %4609 = vmatpush1.bf16.msra.mxu0 %v6410_v61  ;;  %4691 = vmatpush1.bf16.msra.mxu1 %v6412_v62  ;;  %v3203_v61 = vld [vmem:[#allocation6 + $0x700] sm:$0xff] }
 0x31c   :  { %4610 = vmatprep.subr.bf16.mxu0 %v6419_v18  ;;  %4692 = vmatprep.subr.bf16.mxu1 %v6421_v63  ;;  %v3207_v62 = vld [vmem:[#allocation6 + $0x720] sm:$0xff]  ;;  %v3204_v18 = vld [vmem:[#allocation6 + $0x708] sm:$0xff] }
 0x31d   :  { %v3208_v63 = vld [vmem:[#allocation6 + $0x728] sm:$0xff]  ;;  %v6467_v4 = vcombine.high %v3203_v61, %v3207_v62  ;;  %v6466_v10 = vcombine.low %v3203_v61, %v3207_v62  ;;  %v2997_v61 = vld [vmem:[#allocation6 + $0x90] sm:$0xff] }
 0x31e   :  { %v6469_v5 = vcombine.high %v3204_v18, %v3208_v63  ;;  %v6468_v11 = vcombine.low %v3204_v18, %v3208_v63  ;;  %v3001_v62 = vld [vmem:[#allocation6 + $0xb0] sm:$0xff]  ;;  %v2998_v18 = vld [vmem:[#allocation6 + $0x98] sm:$0xff] }
 0x31f   :  { %4611 = vmatpush1.bf16.msra.mxu0 %v6418_v6  ;;  %4693 = vmatpush1.bf16.msra.mxu1 %v6420_v54  ;;  %v3211_v6 = vld [vmem:[#allocation6 + $0x740] sm:$0xff]  ;;  %v3002_v63 = vld [vmem:[#allocation6 + $0xb8] sm:$0xff] }
 0x320   :  { %4612 = vmatprep.subr.bf16.mxu0 %v6427_v8  ;;  %4694 = vmatprep.subr.bf16.mxu1 %v6429_v9  ;;  %v3215_v54 = vld [vmem:[#allocation6 + $0x760] sm:$0xff]  ;;  %v3212_v8 = vld [vmem:[#allocation6 + $0x748] sm:$0xff] }
 0x321   :  { %v7588_v26 = vpop.f32.mrb[16].mxu1  ;;  %v3216_v9 = vld [vmem:[#allocation6 + $0x768] sm:$0xff]  ;;  %v6475_v14 = vcombine.high %v3211_v6, %v3215_v54 }
 0x322   :  { %v2966_v30 = vpop.f32.mrb[17].mxu1  ;;  %v6477_v16 = vcombine.high %v3212_v8, %v3216_v9  ;;  %v6476_v24 = vcombine.low %v3212_v8, %v3216_v9  ;;  %v3006_v8 = vld [vmem:[#allocation6 + $0xd8] sm:$0xff] }
 0x323   :  { %v6629_v31 = vadd.f32 %v2966_v30, %v1358_v20  ;;  %4613 = vmatpush1.bf16.msra.mxu0 %v6426_v17  ;;  %4695 = vmatpush1.bf16.msra.mxu1 %v6428_v19  ;;  %v2968_v32 = vpop.f32.mrb[18].mxu1  ;;  %v3219_v17 = vld [vmem:[#allocation6 + $0x780] sm:$0xff]  ;;  %v3220_v20 = vld [vmem:[#allocation6 + $0x788] sm:$0xff]  ;;  %v3010_v9 = vld [vmem:[#allocation6 + $0xf8] sm:$0xff] }
 0x324   :  { %v2969_v35 = vpop.f32.mrb[19].mxu1  ;;  %4614 = vmatprep.subr.bf16.mxu0 %v6435_v21  ;;  %4696 = vmatprep.subr.bf16.mxu1 %v6437_v23  ;;  %v3223_v19 = vld [vmem:[#allocation6 + $0x7a0] sm:$0xff]  ;;  %v3224_v21 = vld [vmem:[#allocation6 + $0x7a8] sm:$0xff]  ;;  %v6474_v23 = vcombine.low %v3211_v6, %v3215_v54  ;;  %v3005_v6 = vld [vmem:[#allocation6 + $0xd0] sm:$0xff] }
 0x325   :  { %v2974_v39 = vmax.f32 %v6629_v31, 0.0  ;;  %v6483_v28 = vcombine.high %v3219_v17, %v3223_v19  ;;  %v6485_v29 = vcombine.high %v3220_v20, %v3224_v21  ;;  %v3227_v30 = vld [vmem:[#allocation6 + $0x7c0] sm:$0xff]  ;;  %v3228_v32 = vld [vmem:[#allocation6 + $0x7c8] sm:$0xff]  ;;  %v6484_v35 = vcombine.low %v3220_v20, %v3224_v21  ;;  %v3009_v54 = vld [vmem:[#allocation6 + $0xf0] sm:$0xff] }
 0x326   :  { %v3231_v31 = vld [vmem:[#allocation6 + $0x7e0] sm:$0xff]  ;;  %v3018_v20 = vld [vmem:[#allocation6 + $0x138] sm:$0xff]  ;;  %v6270_v21 = vcombine.low %v3005_v6, %v3009_v54 }
 0x327   :  { %v7590_v42 = vpack.c.bf16 %v2974_v39, %v2974_v39  ;;  %4615 = vmatpush1.bf16.msra.mxu0 %v6434_v33  ;;  %4697 = vmatpush1.bf16.msra.mxu1 %v6436_v34  ;;  %v3232_v33 = vld [vmem:[#allocation6 + $0x7e8] sm:$0xff]  ;;  %v6482_v34 = vcombine.low %v3219_v17, %v3223_v19  ;;  %v2981_v39 = vld [vmem:[#allocation6 + $0x10] sm:$0xff]  ;;  %v6490_v41 = vcombine.low %v3227_v30, %v3231_v31 }
 0x328   :  { %4616 = vmatprep.subr.bf16.mxu0 %v6443_v36  ;;  %4698 = vmatprep.subr.bf16.mxu1 %v6445_v37  ;;  %v6628_v36 = vadd.f32 %v7588_v26, %v1354_v27  ;;  %v6491_v37 = vcombine.high %v3227_v30, %v3231_v31  ;;  %v6493_v38 = vcombine.high %v3228_v32, %v3232_v33  ;;  %v2990_v26 = vld [vmem:[#allocation6 + $0x58] sm:$0xff]  ;;  %v3013_v17 = vld [vmem:[#allocation6 + $0x110] sm:$0xff] }
 0x329   :  { %4630 = vmatprep.mubr.bf16.mxu0 %v7590_v42  ;;  %4712 = vmatprep.mubr.bf16.mxu1 %v7590_v42  ;;  %v6246_v7 = vcombine.low %v2981_v39, %v2985_v60  ;;  %v3017_v19 = vld [vmem:[#allocation6 + $0x130] sm:$0xff]  ;;  %v3022_v30 = vld [vmem:[#allocation6 + $0x158] sm:$0xff] }
 0x32a   :  { %v3026_v31 = vld [vmem:[#allocation6 + $0x178] sm:$0xff] }
 0x32b   :  { %4617 = vmatpush1.bf16.msra.mxu0 %v6442_v43  ;;  %4699 = vmatpush1.bf16.msra.mxu1 %v6444_v45  ;;  %v6492_v43 = vcombine.low %v3228_v32, %v3232_v33  ;;  %v2973_v45 = vmax.f32 %v6628_v36, 0.0  ;;  %v6278_v32 = vcombine.low %v3013_v17, %v3017_v19  ;;  %v3029_v36 = vld [vmem:[#allocation6 + $0x190] sm:$0xff] }
 0x32c   :  { %4618 = vmatprep.subr.bf16.mxu0 %v6451_v46  ;;  %4700 = vmatprep.subr.bf16.mxu1 %v6453_v48  ;;  %v6247_v46 = vcombine.high %v2981_v39, %v2985_v60  ;;  %v6249_v48 = vcombine.high %v2982_v40, %v2986_v15  ;;  %v3034_v39 = vld [vmem:[#allocation6 + $0x1b8] sm:$0xff] }
 0x32f   :  { %4619 = vmatpush1.bf16.msra.mxu0 %v6450_v56  ;;  %4701 = vmatpush1.bf16.msra.mxu1 %v6452_v57  ;;  %v7597_v56 = vpack.c.bf16 %v2973_v45, %v2973_v45  ;;  %v6248_v57 = vcombine.low %v2982_v40, %v2986_v15  ;;  %v6288_v40 = vcombine.low %v3022_v30, %v3026_v31  ;;  %v3041_v45 = vld [vmem:[#allocation6 + $0x1f0] sm:$0xff] }
 0x330   :  { %4620 = vmatprep.subr.bf16.mxu0 %v6459_v58  ;;  %4702 = vmatprep.subr.bf16.mxu1 %v6461_v59  ;;  %v6255_v58 = vcombine.high %v2989_v49, %v2993_v51  ;;  %v6257_v59 = vcombine.high %v2990_v26, %v2994_v52 }
 0x333   :  { %4621 = vmatpush1.bf16.msra.mxu0 %v6458_v1  ;;  %4703 = vmatpush1.bf16.msra.mxu1 %v6460_v2  ;;  %v6254_v1 = vcombine.low %v2989_v49, %v2993_v51  ;;  %v6256_v2 = vcombine.low %v2990_v26, %v2994_v52 }
 0x334   :  { %4622 = vmatprep.subr.bf16.mxu0 %v6467_v4  ;;  %4704 = vmatprep.subr.bf16.mxu1 %v6469_v5  ;;  %v6263_v4 = vcombine.high %v2997_v61, %v3001_v62  ;;  %v6265_v5 = vcombine.high %v2998_v18, %v3002_v63 }
 0x337   :  { %4623 = vmatpush1.bf16.msra.mxu0 %v6466_v10  ;;  %4705 = vmatpush1.bf16.msra.mxu1 %v6468_v11  ;;  %v6262_v10 = vcombine.low %v2997_v61, %v3001_v62  ;;  %v6264_v11 = vcombine.low %v2998_v18, %v3002_v63 }
 0x338   :  { %4624 = vmatprep.subr.bf16.mxu0 %v6475_v14  ;;  %4706 = vmatprep.subr.bf16.mxu1 %v6477_v16  ;;  %v6271_v14 = vcombine.high %v3005_v6, %v3009_v54  ;;  %v6273_v16 = vcombine.high %v3006_v8, %v3010_v9 }
 0x33b   :  { %4625 = vmatpush1.bf16.msra.mxu0 %v6474_v23  ;;  %4707 = vmatpush1.bf16.msra.mxu1 %v6476_v24  ;;  %v6272_v23 = vcombine.low %v3006_v8, %v3010_v9  ;;  %v6279_v24 = vcombine.high %v3013_v17, %v3017_v19 }
 0x33c   :  { %4626 = vmatprep.subr.bf16.mxu0 %v6483_v28  ;;  %4708 = vmatprep.subr.bf16.mxu1 %v6485_v29  ;;  %v3021_v28 = vld [vmem:[#allocation6 + $0x150] sm:$0xff] }
 0x33d   :  { %v3025_v29 = vld [vmem:[#allocation6 + $0x170] sm:$0xff] }
 0x33e   :  { %v6286_v60 = vcombine.low %v3021_v28, %v3025_v29 }
 0x33f   :  { %4627 = vmatpush1.bf16.msra.mxu0 %v6482_v34  ;;  %4709 = vmatpush1.bf16.msra.mxu1 %v6484_v35  ;;  %v6287_v34 = vcombine.high %v3021_v28, %v3025_v29  ;;  %v6289_v35 = vcombine.high %v3022_v30, %v3026_v31 }
 0x340   :  { %4628 = vmatprep.subr.bf16.mxu0 %v6491_v37  ;;  %4710 = vmatprep.subr.bf16.mxu1 %v6493_v38  ;;  %v3033_v37 = vld [vmem:[#allocation6 + $0x1b0] sm:$0xff]  ;;  %v3030_v38 = vld [vmem:[#allocation6 + $0x198] sm:$0xff] }
 0x341   :  { %v6295_v15 = vcombine.high %v3029_v36, %v3033_v37  ;;  %v6294_v49 = vcombine.low %v3029_v36, %v3033_v37  ;;  %v6296_v51 = vcombine.low %v3030_v38, %v3034_v39 }
 0x343   :  { %4629 = vmatpush1.bf16.msra.mxu0 %v6490_v41  ;;  %4711 = vmatpush1.bf16.msra.mxu1 %v6492_v43  ;;  %v6297_v41 = vcombine.high %v3030_v38, %v3034_v39  ;;  %v3037_v43 = vld [vmem:[#allocation6 + $0x1d0] sm:$0xff] }
 0x344   :  { %4721 = vmatprep.subr.bf16.mxu0 %v6247_v46  ;;  %4803 = vmatprep.subr.bf16.mxu1 %v6249_v48  ;;  %v3038_v46 = vld [vmem:[#allocation6 + $0x1d8] sm:$0xff]  ;;  %v6303_v26 = vcombine.high %v3037_v43, %v3041_v45  ;;  %v6302_v61 = vcombine.low %v3037_v43, %v3041_v45 }
 0x345   :  { %v3042_v48 = vld [vmem:[#allocation6 + $0x1f8] sm:$0xff] }
 0x346   :  { %4631 = vmatmul.mubr.bf16.vlgmr.msra.gmra.mrb[4].mxu0 %v7597_v56  ;;  %4713 = vmatmul.mubr.bf16.vlgmr.msra.gmra.mrb[20].mxu1 %v7597_v56  ;;  %v6305_v52 = vcombine.high %v3038_v46, %v3042_v48  ;;  %v6304_v62 = vcombine.low %v3038_v46, %v3042_v48 }
 0x347   :  { %4722 = vmatpush1.bf16.msra.mxu0 %v6246_v7  ;;  %4753 = vmatprep.mubr.bf16.mxu0 %v7578_v12  ;;  %v3045_v7 = vld [vmem:[#allocation6 + $0x210] sm:$0xff] }
 0x348   :  { %4804 = vmatpush1.bf16.msra.mxu1 %v6248_v57  ;;  %4835 = vmatprep.mubr.bf16.mxu1 %v7578_v12  ;;  %v3014_v12 = vld [vmem:[#allocation6 + $0x118] sm:$0xff]  ;;  %v3049_v57 = vld [vmem:[#allocation6 + $0x230] sm:$0xff] }
 0x349   :  { %4723 = vmatprep.subr.bf16.mxu0 %v6255_v58  ;;  %4805 = vmatprep.subr.bf16.mxu1 %v6257_v59  ;;  %v6281_v27 = vcombine.high %v3014_v12, %v3018_v20  ;;  %v6280_v33 = vcombine.low %v3014_v12, %v3018_v20  ;;  %v3046_v58 = vld [vmem:[#allocation6 + $0x218] sm:$0xff]  ;;  %v6311_v18 = vcombine.high %v3045_v7, %v3049_v57 }
 0x34a   :  { %v3050_v59 = vld [vmem:[#allocation6 + $0x238] sm:$0xff]  ;;  %v6310_v6 = vcombine.low %v3045_v7, %v3049_v57 }
 0x34b   :  { %4724 = vmatpush1.bf16.msra.mxu0 %v6254_v1  ;;  %v6313_v63 = vcombine.high %v3046_v58, %v3050_v59  ;;  %v3053_v1 = vld [vmem:[#allocation6 + $0x250] sm:$0xff]  ;;  %v6312_v54 = vcombine.low %v3046_v58, %v3050_v59 }
 0x34c   :  { %4806 = vmatpush1.bf16.msra.mxu1 %v6256_v2  ;;  %4725 = vmatprep.subr.bf16.mxu0 %v6263_v4  ;;  %v3057_v2 = vld [vmem:[#allocation6 + $0x270] sm:$0xff]  ;;  %v3054_v4 = vld [vmem:[#allocation6 + $0x258] sm:$0xff] }
 0x34d   :  { %4807 = vmatprep.subr.bf16.mxu1 %v6265_v5  ;;  %v3058_v5 = vld [vmem:[#allocation6 + $0x278] sm:$0xff]  ;;  %v6319_v8 = vcombine.high %v3053_v1, %v3057_v2  ;;  %v6318_v17 = vcombine.low %v3053_v1, %v3057_v2 }
 0x34e   :  { %v6321_v9 = vcombine.high %v3054_v4, %v3058_v5  ;;  %v6320_v19 = vcombine.low %v3054_v4, %v3058_v5 }
 0x34f   :  { %4726 = vmatpush1.bf16.msra.mxu0 %v6262_v10  ;;  %v3061_v10 = vld [vmem:[#allocation6 + $0x290] sm:$0xff] }
 0x350   :  { %4808 = vmatpush1.bf16.msra.mxu1 %v6264_v11  ;;  %4727 = vmatprep.subr.bf16.mxu0 %v6271_v14  ;;  %v3065_v11 = vld [vmem:[#allocation6 + $0x2b0] sm:$0xff]  ;;  %v3062_v14 = vld [vmem:[#allocation6 + $0x298] sm:$0xff] }
 0x351   :  { %4809 = vmatprep.subr.bf16.mxu1 %v6273_v16  ;;  %v3066_v16 = vld [vmem:[#allocation6 + $0x2b8] sm:$0xff]  ;;  %v6327_v12 = vcombine.high %v3061_v10, %v3065_v11  ;;  %v6326_v28 = vcombine.low %v3061_v10, %v3065_v11 }
 0x352   :  { %v6329_v20 = vcombine.high %v3062_v14, %v3066_v16  ;;  %v6328_v29 = vcombine.low %v3062_v14, %v3066_v16 }
 0x353   :  { %4728 = vmatpush1.bf16.msra.mxu0 %v6270_v21  ;;  %v3069_v21 = vld [vmem:[#allocation6 + $0x2d0] sm:$0xff] }
 0x354   :  { %4810 = vmatpush1.bf16.msra.mxu1 %v6272_v23  ;;  %4729 = vmatprep.subr.bf16.mxu0 %v6279_v24  ;;  %v3073_v23 = vld [vmem:[#allocation6 + $0x2f0] sm:$0xff]  ;;  %v3070_v24 = vld [vmem:[#allocation6 + $0x2d8] sm:$0xff] }
 0x355   :  { %4811 = vmatprep.subr.bf16.mxu1 %v6281_v27  ;;  %v3074_v27 = vld [vmem:[#allocation6 + $0x2f8] sm:$0xff]  ;;  %v6335_v30 = vcombine.high %v3069_v21, %v3073_v23  ;;  %v6334_v36 = vcombine.low %v3069_v21, %v3073_v23 }
 0x356   :  { %v6337_v31 = vcombine.high %v3070_v24, %v3074_v27  ;;  %v6336_v37 = vcombine.low %v3070_v24, %v3074_v27  ;;  %v3122_v21 = vld [vmem:[#allocation6 + $0x478] sm:$0xff]  ;;  %v3125_v27 = vld [vmem:[#allocation6 + $0x490] sm:$0xff] }
 0x357   :  { %4730 = vmatpush1.bf16.msra.mxu0 %v6278_v32  ;;  %v3077_v32 = vld [vmem:[#allocation6 + $0x310] sm:$0xff] }
 0x358   :  { %4812 = vmatpush1.bf16.msra.mxu1 %v6280_v33  ;;  %4731 = vmatprep.subr.bf16.mxu0 %v6287_v34  ;;  %v3081_v33 = vld [vmem:[#allocation6 + $0x330] sm:$0xff]  ;;  %v3078_v34 = vld [vmem:[#allocation6 + $0x318] sm:$0xff] }
 0x359   :  { %4813 = vmatprep.subr.bf16.mxu1 %v6289_v35  ;;  %v3082_v35 = vld [vmem:[#allocation6 + $0x338] sm:$0xff]  ;;  %v6343_v38 = vcombine.high %v3077_v32, %v3081_v33  ;;  %v6342_v43 = vcombine.low %v3077_v32, %v3081_v33 }
 0x35a   :  { %v6345_v39 = vcombine.high %v3078_v34, %v3082_v35  ;;  %v6344_v45 = vcombine.low %v3078_v34, %v3082_v35 }
 0x35b   :  { %4732 = vmatpush1.bf16.msra.mxu0 %v6286_v60  ;;  %v3085_v60 = vld [vmem:[#allocation6 + $0x350] sm:$0xff] }
 0x35c   :  { %4814 = vmatpush1.bf16.msra.mxu1 %v6288_v40  ;;  %4733 = vmatprep.subr.bf16.mxu0 %v6295_v15  ;;  %v3089_v40 = vld [vmem:[#allocation6 + $0x370] sm:$0xff]  ;;  %v3086_v15 = vld [vmem:[#allocation6 + $0x358] sm:$0xff] }
 0x35d   :  { %4815 = vmatprep.subr.bf16.mxu1 %v6297_v41  ;;  %v3090_v41 = vld [vmem:[#allocation6 + $0x378] sm:$0xff]  ;;  %v6351_v46 = vcombine.high %v3085_v60, %v3089_v40  ;;  %v6350_v7 = vcombine.low %v3085_v60, %v3089_v40 }
 0x35e   :  { %v6353_v48 = vcombine.high %v3086_v15, %v3090_v41  ;;  %v6352_v57 = vcombine.low %v3086_v15, %v3090_v41  ;;  %v3141_v41 = vld [vmem:[#allocation6 + $0x510] sm:$0xff] }
 0x35f   :  { %4734 = vmatpush1.bf16.msra.mxu0 %v6294_v49  ;;  %v3093_v49 = vld [vmem:[#allocation6 + $0x390] sm:$0xff] }
 0x360   :  { %4816 = vmatpush1.bf16.msra.mxu1 %v6296_v51  ;;  %4735 = vmatprep.subr.bf16.mxu0 %v6303_v26  ;;  %v3097_v51 = vld [vmem:[#allocation6 + $0x3b0] sm:$0xff]  ;;  %v3094_v26 = vld [vmem:[#allocation6 + $0x398] sm:$0xff] }
 0x361   :  { %4817 = vmatprep.subr.bf16.mxu1 %v6305_v52  ;;  %v3098_v52 = vld [vmem:[#allocation6 + $0x3b8] sm:$0xff]  ;;  %v6359_v58 = vcombine.high %v3093_v49, %v3097_v51  ;;  %v6358_v1 = vcombine.low %v3093_v49, %v3097_v51 }
 0x362   :  { %v6361_v59 = vcombine.high %v3094_v26, %v3098_v52  ;;  %v6360_v2 = vcombine.low %v3094_v26, %v3098_v52  ;;  %v3149_v26 = vld [vmem:[#allocation6 + $0x550] sm:$0xff] }
 0x363   :  { %4736 = vmatpush1.bf16.msra.mxu0 %v6302_v61  ;;  %v3101_v61 = vld [vmem:[#allocation6 + $0x3d0] sm:$0xff] }
 0x364   :  { %4818 = vmatpush1.bf16.msra.mxu1 %v6304_v62  ;;  %4737 = vmatprep.subr.bf16.mxu0 %v6311_v18  ;;  %v3105_v62 = vld [vmem:[#allocation6 + $0x3f0] sm:$0xff]  ;;  %v3102_v18 = vld [vmem:[#allocation6 + $0x3d8] sm:$0xff] }
 0x365   :  { %4819 = vmatprep.subr.bf16.mxu1 %v6313_v63  ;;  %v3106_v63 = vld [vmem:[#allocation6 + $0x3f8] sm:$0xff]  ;;  %v6367_v4 = vcombine.high %v3101_v61, %v3105_v62  ;;  %v6366_v10 = vcombine.low %v3101_v61, %v3105_v62  ;;  %v3153_v52 = vld [vmem:[#allocation6 + $0x570] sm:$0xff] }
 0x366   :  { %v6369_v5 = vcombine.high %v3102_v18, %v3106_v63  ;;  %v6368_v11 = vcombine.low %v3102_v18, %v3106_v63  ;;  %v6415_v61 = vcombine.high %v3149_v26, %v3153_v52  ;;  %v3157_v18 = vld [vmem:[#allocation6 + $0x590] sm:$0xff] }
 0x367   :  { %4738 = vmatpush1.bf16.msra.mxu0 %v6310_v6  ;;  %v3109_v6 = vld [vmem:[#allocation6 + $0x410] sm:$0xff] }
 0x368   :  { %4820 = vmatpush1.bf16.msra.mxu1 %v6312_v54  ;;  %4739 = vmatprep.subr.bf16.mxu0 %v6319_v8  ;;  %v3113_v54 = vld [vmem:[#allocation6 + $0x430] sm:$0xff]  ;;  %v3110_v8 = vld [vmem:[#allocation6 + $0x418] sm:$0xff] }
 0x369   :  { %4821 = vmatprep.subr.bf16.mxu1 %v6321_v9  ;;  %v3114_v9 = vld [vmem:[#allocation6 + $0x438] sm:$0xff]  ;;  %v6375_v14 = vcombine.high %v3109_v6, %v3113_v54  ;;  %v3161_v63 = vld [vmem:[#allocation6 + $0x5b0] sm:$0xff] }
 0x36a   :  { %v6377_v16 = vcombine.high %v3110_v8, %v3114_v9  ;;  %v6376_v23 = vcombine.low %v3110_v8, %v3114_v9  ;;  %v3165_v8 = vld [vmem:[#allocation6 + $0x5d0] sm:$0xff] }
 0x36b   :  { %4740 = vmatpush1.bf16.msra.mxu0 %v6318_v17  ;;  %v3117_v17 = vld [vmem:[#allocation6 + $0x450] sm:$0xff] }
 0x36c   :  { %4822 = vmatpush1.bf16.msra.mxu1 %v6320_v19  ;;  %4741 = vmatprep.subr.bf16.mxu0 %v6327_v12  ;;  %v3121_v19 = vld [vmem:[#allocation6 + $0x470] sm:$0xff]  ;;  %v6374_v12 = vcombine.low %v3109_v6, %v3113_v54  ;;  %v6423_v6 = vcombine.high %v3157_v18, %v3161_v63 }
 0x36d   :  { %4823 = vmatprep.subr.bf16.mxu1 %v6329_v20  ;;  %v3118_v20 = vld [vmem:[#allocation6 + $0x458] sm:$0xff]  ;;  %v6383_v24 = vcombine.high %v3117_v17, %v3121_v19  ;;  %v6382_v32 = vcombine.low %v3117_v17, %v3121_v19  ;;  %v3169_v9 = vld [vmem:[#allocation6 + $0x5f0] sm:$0xff] }
 0x36e   :  { %v6384_v33 = vcombine.low %v3118_v20, %v3122_v21  ;;  %v6431_v17 = vcombine.high %v3165_v8, %v3169_v9 }
 0x36f   :  { %4742 = vmatpush1.bf16.msra.mxu0 %v6326_v28  ;;  %v3129_v28 = vld [vmem:[#allocation6 + $0x4b0] sm:$0xff] }
 0x370   :  { %4824 = vmatpush1.bf16.msra.mxu1 %v6328_v29  ;;  %4743 = vmatprep.subr.bf16.mxu0 %v6335_v30  ;;  %v6385_v29 = vcombine.high %v3118_v20, %v3122_v21  ;;  %v3126_v30 = vld [vmem:[#allocation6 + $0x498] sm:$0xff]  ;;  %v6391_v34 = vcombine.high %v3125_v27, %v3129_v28  ;;  %v6390_v60 = vcombine.low %v3125_v27, %v3129_v28  ;;  %v3177_v20 = vld [vmem:[#allocation6 + $0x630] sm:$0xff] }
 0x371   :  { %4825 = vmatprep.subr.bf16.mxu1 %v6337_v31  ;;  %v3130_v31 = vld [vmem:[#allocation6 + $0x4b8] sm:$0xff] }
 0x372   :  { %v6393_v35 = vcombine.high %v3126_v30, %v3130_v31  ;;  %v3174_v21 = vld [vmem:[#allocation6 + $0x618] sm:$0xff] }
 0x373   :  { %4744 = vmatpush1.bf16.msra.mxu0 %v6334_v36  ;;  %v3133_v36 = vld [vmem:[#allocation6 + $0x4d0] sm:$0xff] }
 0x374   :  { %4826 = vmatpush1.bf16.msra.mxu1 %v6336_v37  ;;  %4745 = vmatprep.subr.bf16.mxu0 %v6343_v38  ;;  %v3137_v37 = vld [vmem:[#allocation6 + $0x4f0] sm:$0xff]  ;;  %v3134_v38 = vld [vmem:[#allocation6 + $0x4d8] sm:$0xff] }
 0x375   :  { %4827 = vmatprep.subr.bf16.mxu1 %v6345_v39  ;;  %v3138_v39 = vld [vmem:[#allocation6 + $0x4f8] sm:$0xff]  ;;  %v6399_v40 = vcombine.high %v3133_v36, %v3137_v37 }
 0x376   :  { %v6401_v15 = vcombine.high %v3134_v38, %v3138_v39 }
 0x377   :  { %4746 = vmatpush1.bf16.msra.mxu0 %v6342_v43  ;;  %v3145_v43 = vld [vmem:[#allocation6 + $0x530] sm:$0xff] }
 0x378   :  { %4828 = vmatpush1.bf16.msra.mxu1 %v6344_v45  ;;  %4747 = vmatprep.subr.bf16.mxu0 %v6351_v46  ;;  %v3142_v45 = vld [vmem:[#allocation6 + $0x518] sm:$0xff]  ;;  %v6407_v49 = vcombine.high %v3141_v41, %v3145_v43 }
 0x379   :  { %4829 = vmatprep.subr.bf16.mxu1 %v6353_v48  ;;  %v3146_v46 = vld [vmem:[#allocation6 + $0x538] sm:$0xff]  ;;  %v6400_v48 = vcombine.low %v3134_v38, %v3138_v39  ;;  %v3189_v38 = vld [vmem:[#allocation6 + $0x690] sm:$0xff] }
 0x37a   :  { %v6409_v51 = vcombine.high %v3142_v45, %v3146_v46  ;;  %v3193_v39 = vld [vmem:[#allocation6 + $0x6b0] sm:$0xff] }
 0x37b   :  { %4748 = vmatpush1.bf16.msra.mxu0 %v6350_v7  ;;  %v3150_v7 = vld [vmem:[#allocation6 + $0x558] sm:$0xff] }
 0x37c   :  { %4830 = vmatpush1.bf16.msra.mxu1 %v6352_v57  ;;  %4749 = vmatprep.subr.bf16.mxu0 %v6359_v58  ;;  %v3154_v57 = vld [vmem:[#allocation6 + $0x578] sm:$0xff]  ;;  %v6406_v58 = vcombine.low %v3141_v41, %v3145_v43  ;;  %v6455_v41 = vcombine.high %v3189_v38, %v3193_v39 }
 0x37d   :  { %4831 = vmatprep.subr.bf16.mxu1 %v6361_v59  ;;  %v6408_v59 = vcombine.low %v3142_v45, %v3146_v46  ;;  %v6417_v62 = vcombine.high %v3150_v7, %v3154_v57  ;;  %v3197_v45 = vld [vmem:[#allocation6 + $0x6d0] sm:$0xff] }
 0x37e   :  { %v3201_v46 = vld [vmem:[#allocation6 + $0x6f0] sm:$0xff] }
 0x37f   :  { %4750 = vmatpush1.bf16.msra.mxu0 %v6358_v1  ;;  %v3158_v1 = vld [vmem:[#allocation6 + $0x598] sm:$0xff] }
 0x380   :  { %4832 = vmatpush1.bf16.msra.mxu1 %v6360_v2  ;;  %4751 = vmatprep.subr.bf16.mxu0 %v6367_v4  ;;  %v3162_v2 = vld [vmem:[#allocation6 + $0x5b8] sm:$0xff]  ;;  %v6414_v4 = vcombine.low %v3149_v26, %v3153_v52  ;;  %v6463_v26 = vcombine.high %v3197_v45, %v3201_v46 }
 0x381   :  { %4833 = vmatprep.subr.bf16.mxu1 %v6369_v5  ;;  %v6416_v5 = vcombine.low %v3150_v7, %v3154_v57  ;;  %v6425_v54 = vcombine.high %v3158_v1, %v3162_v2  ;;  %v3205_v7 = vld [vmem:[#allocation6 + $0x710] sm:$0xff] }
 0x382   :  { %v3209_v57 = vld [vmem:[#allocation6 + $0x730] sm:$0xff] }
 0x383   :  { %4752 = vmatpush1.bf16.msra.mxu0 %v6366_v10  ;;  %v3166_v10 = vld [vmem:[#allocation6 + $0x5d8] sm:$0xff] }
 0x384   :  { %4834 = vmatpush1.bf16.msra.mxu1 %v6368_v11  ;;  %4762 = vmatprep.subr.bf16.mxu0 %v6375_v14  ;;  %v3170_v11 = vld [vmem:[#allocation6 + $0x5f8] sm:$0xff]  ;;  %v6422_v14 = vcombine.low %v3157_v18, %v3161_v63  ;;  %v6471_v18 = vcombine.high %v3205_v7, %v3209_v57 }
 0x385   :  { %4844 = vmatprep.subr.bf16.mxu1 %v6377_v16  ;;  %v6424_v16 = vcombine.low %v3158_v1, %v3162_v2  ;;  %v6433_v19 = vcombine.high %v3166_v10, %v3170_v11  ;;  %v6432_v27 = vcombine.low %v3166_v10, %v3170_v11  ;;  %v3213_v1 = vld [vmem:[#allocation6 + $0x750] sm:$0xff] }
 0x386   :  { %4754 = vmatmul.mubr.bf16.vlgmr.msra.gmra.mrb[8].mxu0 %v7580_v13  ;;  %v3217_v2 = vld [vmem:[#allocation6 + $0x770] sm:$0xff] }
 0x387   :  { %4836 = vmatmul.mubr.bf16.vlgmr.msra.gmra.mrb[24].mxu1 %v7580_v13  ;;  %4763 = vmatpush1.bf16.msra.mxu0 %v6374_v12  ;;  %v6392_v13 = vcombine.low %v3126_v30, %v3130_v31  ;;  %v3173_v12 = vld [vmem:[#allocation6 + $0x610] sm:$0xff] }
 0x388   :  { %4794 = vmatprep.mubr.bf16.mxu0 %v7590_v42  ;;  %4845 = vmatpush1.bf16.msra.mxu1 %v6376_v23  ;;  %v3178_v23 = vld [vmem:[#allocation6 + $0x638] sm:$0xff]  ;;  %v6439_v28 = vcombine.high %v3173_v12, %v3177_v20  ;;  %v3181_v30 = vld [vmem:[#allocation6 + $0x650] sm:$0xff] }
 0x389   :  { %4876 = vmatprep.mubr.bf16.mxu1 %v7590_v42  ;;  %4764 = vmatprep.subr.bf16.mxu0 %v6383_v24  ;;  %v6398_v42 = vcombine.low %v3133_v36, %v3137_v37  ;;  %v6430_v24 = vcombine.low %v3165_v8, %v3169_v9  ;;  %v3185_v31 = vld [vmem:[#allocation6 + $0x670] sm:$0xff]  ;;  %v6479_v8 = vcombine.high %v3213_v1, %v3217_v2 }
 0x38a   :  { %4846 = vmatprep.subr.bf16.mxu1 %v6385_v29  ;;  %v6441_v29 = vcombine.high %v3174_v21, %v3178_v23  ;;  %v6447_v36 = vcombine.high %v3181_v30, %v3185_v31  ;;  %v3221_v10 = vld [vmem:[#allocation6 + $0x790] sm:$0xff] }
 0x38b   :  { %4765 = vmatpush1.bf16.msra.mxu0 %v6382_v32  ;;  %v3182_v32 = vld [vmem:[#allocation6 + $0x658] sm:$0xff]  ;;  %v3225_v11 = vld [vmem:[#allocation6 + $0x7b0] sm:$0xff] }
 0x38c   :  { %4847 = vmatpush1.bf16.msra.mxu1 %v6384_v33  ;;  %4766 = vmatprep.subr.bf16.mxu0 %v6391_v34  ;;  %v3186_v33 = vld [vmem:[#allocation6 + $0x678] sm:$0xff]  ;;  %v6438_v34 = vcombine.low %v3173_v12, %v3177_v20  ;;  %v6487_v12 = vcombine.high %v3221_v10, %v3225_v11 }
 0x38d   :  { %4848 = vmatprep.subr.bf16.mxu1 %v6393_v35  ;;  %v6440_v35 = vcombine.low %v3174_v21, %v3178_v23  ;;  %v6449_v37 = vcombine.high %v3182_v32, %v3186_v33  ;;  %v3229_v21 = vld [vmem:[#allocation6 + $0x7d0] sm:$0xff] }
 0x38e   :  { %v3233_v23 = vld [vmem:[#allocation6 + $0x7f0] sm:$0xff] }
 0x38f   :  { %4767 = vmatpush1.bf16.msra.mxu0 %v6390_v60  ;;  %v3190_v60 = vld [vmem:[#allocation6 + $0x698] sm:$0xff] }
 0x390   :  { %4849 = vmatpush1.bf16.msra.mxu1 %v6392_v13  ;;  %4768 = vmatprep.subr.bf16.mxu0 %v6399_v40  ;;  %v3194_v13 = vld [vmem:[#allocation6 + $0x6b8] sm:$0xff]  ;;  %v6446_v40 = vcombine.low %v3181_v30, %v3185_v31  ;;  %v6495_v30 = vcombine.high %v3229_v21, %v3233_v23 }
 0x391   :  { %4850 = vmatprep.subr.bf16.mxu1 %v6401_v15  ;;  %v6448_v15 = vcombine.low %v3182_v32, %v3186_v33  ;;  %v6457_v43 = vcombine.high %v3190_v60, %v3194_v13  ;;  %v6494_v32 = vcombine.low %v3229_v21, %v3233_v23 }
 0x393   :  { %4769 = vmatpush1.bf16.msra.mxu0 %v6398_v42  ;;  %v3198_v42 = vld [vmem:[#allocation6 + $0x6d8] sm:$0xff] }
 0x394   :  { %4851 = vmatpush1.bf16.msra.mxu1 %v6400_v48  ;;  %4770 = vmatprep.subr.bf16.mxu0 %v6407_v49  ;;  %v3202_v48 = vld [vmem:[#allocation6 + $0x6f8] sm:$0xff]  ;;  %v6454_v49 = vcombine.low %v3189_v38, %v3193_v39  ;;  %v7096_v38 = vld [vmem:[#allocation7 + $0x24] ss:$8 sps:$4 sm:$0xff]   ;;  %v7094_v39 = vld [vmem:[#allocation7 + $0x20] ss:$8 sps:$4 sm:$0xff]  }
 0x395   :  { %4852 = vmatprep.subr.bf16.mxu1 %v6409_v51  ;;  %v6456_v51 = vcombine.low %v3190_v60, %v3194_v13  ;;  %v6465_v52 = vcombine.high %v3198_v42, %v3202_v48  ;;  %v7099_v60 = vld [vmem:[#allocation7 + $0x34] ss:$8 sps:$4 sm:$0xff]   ;;  %v7097_v13 = vld [vmem:[#allocation7 + $0x30] ss:$8 sps:$4 sm:$0xff]  }
 0x397   :  { %4771 = vmatpush1.bf16.msra.mxu0 %v6406_v58  ;;  %v3206_v58 = vld [vmem:[#allocation6 + $0x718] sm:$0xff] }
 0x398   :  { %4853 = vmatpush1.bf16.msra.mxu1 %v6408_v59  ;;  %4772 = vmatprep.subr.bf16.mxu0 %v6415_v61  ;;  %v3210_v59 = vld [vmem:[#allocation6 + $0x738] sm:$0xff]  ;;  %v6462_v61 = vcombine.low %v3197_v45, %v3201_v46  ;;  %v7106_v45 = vld [vmem:[#allocation7 + $0x60] ss:$8 sps:$4 sm:$0xff]  }
 0x399   :  { %4854 = vmatprep.subr.bf16.mxu1 %v6417_v62  ;;  %v6464_v62 = vcombine.low %v3198_v42, %v3202_v48  ;;  %v6473_v63 = vcombine.high %v3206_v58, %v3210_v59  ;;  %v7111_v46 = vld [vmem:[#allocation7 + $0x74] ss:$8 sps:$4 sm:$0xff]   ;;  %v7109_v42 = vld [vmem:[#allocation7 + $0x70] ss:$8 sps:$4 sm:$0xff]   ;;  %v7114_v48 = vld [vmem:[#allocation7 + $0x84] ss:$8 sps:$4 sm:$0xff]  }
 0x39b   :  { %4773 = vmatpush1.bf16.msra.mxu0 %v6414_v4  ;;  %v3214_v4 = vld [vmem:[#allocation6 + $0x758] sm:$0xff] }
 0x39c   :  { %4855 = vmatpush1.bf16.msra.mxu1 %v6416_v5  ;;  %4774 = vmatprep.subr.bf16.mxu0 %v6423_v6  ;;  %v3218_v5 = vld [vmem:[#allocation6 + $0x778] sm:$0xff]  ;;  %v6470_v6 = vcombine.low %v3205_v7, %v3209_v57  ;;  %v7118_v7 = vld [vmem:[#allocation7 + $0xa0] ss:$8 sps:$4 sm:$0xff]  }
 0x39d   :  { %4856 = vmatprep.subr.bf16.mxu1 %v6425_v54  ;;  %v6472_v54 = vcombine.low %v3206_v58, %v3210_v59  ;;  %v6481_v9 = vcombine.high %v3214_v4, %v3218_v5  ;;  %v7123_v57 = vld [vmem:[#allocation7 + $0xb4] ss:$8 sps:$4 sm:$0xff]   ;;  %v7121_v58 = vld [vmem:[#allocation7 + $0xb0] ss:$8 sps:$4 sm:$0xff]   ;;  %v7126_v59 = vld [vmem:[#allocation7 + $0xc4] ss:$8 sps:$4 sm:$0xff]  }
 0x39f   :  { %4775 = vmatpush1.bf16.msra.mxu0 %v6422_v14  ;;  %v3222_v14 = vld [vmem:[#allocation6 + $0x798] sm:$0xff] }
 0x3a0   :  { %4857 = vmatpush1.bf16.msra.mxu1 %v6424_v16  ;;  %4776 = vmatprep.subr.bf16.mxu0 %v6431_v17  ;;  %v3226_v16 = vld [vmem:[#allocation6 + $0x7b8] sm:$0xff]  ;;  %v6478_v17 = vcombine.low %v3213_v1, %v3217_v2  ;;  %v7130_v1 = vld [vmem:[#allocation7 + $0xe0] ss:$8 sps:$4 sm:$0xff]  }
 0x3a1   :  { %4858 = vmatprep.subr.bf16.mxu1 %v6433_v19  ;;  %v6480_v19 = vcombine.low %v3214_v4, %v3218_v5  ;;  %v6489_v20 = vcombine.high %v3222_v14, %v3226_v16  ;;  %v7135_v2 = vld [vmem:[#allocation7 + $0xf4] ss:$8 sps:$4 sm:$0xff]   ;;  %v7133_v4 = vld [vmem:[#allocation7 + $0xf0] ss:$8 sps:$4 sm:$0xff]   ;;  %v7138_v5 = vld [vmem:[#allocation7 + $0x104] ss:$8 sps:$4 sm:$0xff]  }
 0x3a3   :  { %4777 = vmatpush1.bf16.msra.mxu0 %v6430_v24  ;;  %v3230_v24 = vld [vmem:[#allocation6 + $0x7d8] sm:$0xff] }
 0x3a4   :  { %4859 = vmatpush1.bf16.msra.mxu1 %v6432_v27  ;;  %4778 = vmatprep.subr.bf16.mxu0 %v6439_v28  ;;  %v3234_v27 = vld [vmem:[#allocation6 + $0x7f8] sm:$0xff]  ;;  %v6486_v28 = vcombine.low %v3221_v10, %v3225_v11 }
 0x3a5   :  { %4860 = vmatprep.subr.bf16.mxu1 %v6441_v29  ;;  %v6488_v29 = vcombine.low %v3222_v14, %v3226_v16  ;;  %v6497_v31 = vcombine.high %v3230_v24, %v3234_v27  ;;  %v6496_v33 = vcombine.low %v3230_v24, %v3234_v27 }
 0x3a7   :  { %4779 = vmatpush1.bf16.msra.mxu0 %v6438_v34  ;;  %v7090_v34 = vld [vmem:[#allocation7 + $0x4] ss:$8 sps:$4 sm:$0xff]  }
 0x3a8   :  { %4861 = vmatpush1.bf16.msra.mxu1 %v6440_v35  ;;  %4780 = vmatprep.subr.bf16.mxu0 %v6447_v36  ;;  %v7088_v35 = vld [vmem:[#allocation7] ss:$8 sps:$4 sm:$0xff]   ;;  %v7093_v36 = vld [vmem:[#allocation7 + $0x14] ss:$8 sps:$4 sm:$0xff]  }
 0x3a9   :  { %4862 = vmatprep.subr.bf16.mxu1 %v6449_v37  ;;  %v7091_v37 = vld [vmem:[#allocation7 + $0x10] ss:$8 sps:$4 sm:$0xff]  }
 0x3ab   :  { %4781 = vmatpush1.bf16.msra.mxu0 %v6446_v40  ;;  %v7102_v40 = vld [vmem:[#allocation7 + $0x44] ss:$8 sps:$4 sm:$0xff]  }
 0x3ac   :  { %4863 = vmatpush1.bf16.msra.mxu1 %v6448_v15  ;;  %4782 = vmatprep.subr.bf16.mxu0 %v6455_v41  ;;  %v7100_v15 = vld [vmem:[#allocation7 + $0x40] ss:$8 sps:$4 sm:$0xff]   ;;  %v7105_v41 = vld [vmem:[#allocation7 + $0x54] ss:$8 sps:$4 sm:$0xff]  }
 0x3ad   :  { %4864 = vmatprep.subr.bf16.mxu1 %v6457_v43  ;;  %v7103_v43 = vld [vmem:[#allocation7 + $0x50] ss:$8 sps:$4 sm:$0xff]  }
 0x3af   :  { %4783 = vmatpush1.bf16.msra.mxu0 %v6454_v49  ;;  %v7112_v49 = vld [vmem:[#allocation7 + $0x80] ss:$8 sps:$4 sm:$0xff]  }
 0x3b0   :  { %4865 = vmatpush1.bf16.msra.mxu1 %v6456_v51  ;;  %4784 = vmatprep.subr.bf16.mxu0 %v6463_v26  ;;  %v7117_v51 = vld [vmem:[#allocation7 + $0x94] ss:$8 sps:$4 sm:$0xff]   ;;  %v7115_v26 = vld [vmem:[#allocation7 + $0x90] ss:$8 sps:$4 sm:$0xff]  }
 0x3b1   :  { %4866 = vmatprep.subr.bf16.mxu1 %v6465_v52  ;;  %v7120_v52 = vld [vmem:[#allocation7 + $0xa4] ss:$8 sps:$4 sm:$0xff]  }
 0x3b3   :  { %4785 = vmatpush1.bf16.msra.mxu0 %v6462_v61  ;;  %v7124_v61 = vld [vmem:[#allocation7 + $0xc0] ss:$8 sps:$4 sm:$0xff]  }
 0x3b4   :  { %4867 = vmatpush1.bf16.msra.mxu1 %v6464_v62  ;;  %4786 = vmatprep.subr.bf16.mxu0 %v6471_v18  ;;  %v7129_v62 = vld [vmem:[#allocation7 + $0xd4] ss:$8 sps:$4 sm:$0xff]   ;;  %v7127_v18 = vld [vmem:[#allocation7 + $0xd0] ss:$8 sps:$4 sm:$0xff]  }
 0x3b5   :  { %4868 = vmatprep.subr.bf16.mxu1 %v6473_v63  ;;  %v7132_v63 = vld [vmem:[#allocation7 + $0xe4] ss:$8 sps:$4 sm:$0xff]  }
 0x3b7   :  { %4787 = vmatpush1.bf16.msra.mxu0 %v6470_v6  ;;  %v7612_v6 = vld [vmem:[%s7658_s7] sm:$0xff] }
 0x3b8   :  { %4869 = vmatpush1.bf16.msra.mxu1 %v6472_v54  ;;  %4788 = vmatprep.subr.bf16.mxu0 %v6479_v8  ;;  %v3240_v54 = vrot.slane %v7612_v6, %v7513_v53  ;;  %v3244_v8 = vrot.slane %v7612_v6, %v7521_v55 }
 0x3b9   :  { %4870 = vmatprep.subr.bf16.mxu1 %v6481_v9  ;;  %v3252_v9 = vrot.slane %v7612_v6, %v7535_v3 }
 0x3bb   :  { %4789 = vmatpush1.bf16.msra.mxu0 %v6478_v17 }
 0x3bc   :  { %4871 = vmatpush1.bf16.msra.mxu1 %v6480_v19  ;;  %4790 = vmatprep.subr.bf16.mxu0 %v6487_v12 }
 0x3bd   :  { %4872 = vmatprep.subr.bf16.mxu1 %v6489_v20 }
 0x3bf   :  { %4791 = vmatpush1.bf16.msra.mxu0 %v6486_v28 }
 0x3c0   :  { %4873 = vmatpush1.bf16.msra.mxu1 %v6488_v29  ;;  %4792 = vmatprep.subr.bf16.mxu0 %v6495_v30 }
 0x3c1   :  { %4874 = vmatprep.subr.bf16.mxu1 %v6497_v31  ;;  %v7136_v31 = vld [vmem:[#allocation7 + $0x100] ss:$8 sps:$4 sm:$0xff]  }
 0x3c3   :  { %4793 = vmatpush1.bf16.msra.mxu0 %v6494_v32 }
 0x3c4   :  { %4875 = vmatpush1.bf16.msra.mxu1 %v6496_v33  ;;  %5681 = vmatprep.subr.bf16.mxu0 %v7090_v34  ;;  %v7141_v33 = vld [vmem:[#allocation7 + $0x114] ss:$8 sps:$4 sm:$0xff]   ;;  %v7139_v34 = vld [vmem:[#allocation7 + $0x110] ss:$8 sps:$4 sm:$0xff]  }
 0x3c6   :  { %4795 = vmatmul.mubr.bf16.vlgmr.msra.gmra.mrb[8].mxu0 %v7597_v56 }
 0x3c7   :  { %4877 = vmatmul.mubr.bf16.vlgmr.msra.gmra.mrb[24].mxu1 %v7597_v56  ;;  %5682 = vmatpush1.bf16.msra.mxu0 %v7088_v35  ;;  %v7108_v56 = vld [vmem:[#allocation7 + $0x64] ss:$8 sps:$4 sm:$0xff]  }
 0x3c8   :  { %5683 = vmatprep.subr.bf16.mxu0 %v7093_v36  ;;  %v7144_v35 = vld [vmem:[#allocation7 + $0x124] ss:$8 sps:$4 sm:$0xff]   ;;  %v7142_v36 = vld [vmem:[#allocation7 + $0x120] ss:$8 sps:$4 sm:$0xff]  }
 0x3cb   :  { %5684 = vmatpush1.bf16.msra.mxu0 %v7091_v37  ;;  %v7147_v37 = vld [vmem:[#allocation7 + $0x134] ss:$8 sps:$4 sm:$0xff]  }
 0x3cc   :  { %5685 = vmatprep.subr.bf16.mxu0 %v7096_v38  ;;  %v7145_v38 = vld [vmem:[#allocation7 + $0x130] ss:$8 sps:$4 sm:$0xff]  }
 0x3cf   :  { %5686 = vmatpush1.bf16.msra.mxu0 %v7094_v39  ;;  %v7150_v39 = vld [vmem:[#allocation7 + $0x144] ss:$8 sps:$4 sm:$0xff]  }
 0x3d0   :  { %5687 = vmatprep.subr.bf16.mxu0 %v7099_v60  ;;  %v7148_v60 = vld [vmem:[#allocation7 + $0x140] ss:$8 sps:$4 sm:$0xff]  }
 0x3d3   :  { %5688 = vmatpush1.bf16.msra.mxu0 %v7097_v13  ;;  %v7153_v13 = vld [vmem:[#allocation7 + $0x154] ss:$8 sps:$4 sm:$0xff]  }
 0x3d4   :  { %5689 = vmatprep.subr.bf16.mxu0 %v7102_v40  ;;  %v7151_v40 = vld [vmem:[#allocation7 + $0x150] ss:$8 sps:$4 sm:$0xff]  }
 0x3d7   :  { %5690 = vmatpush1.bf16.msra.mxu0 %v7100_v15  ;;  %v7156_v15 = vld [vmem:[#allocation7 + $0x164] ss:$8 sps:$4 sm:$0xff]  }
 0x3d8   :  { %5691 = vmatprep.subr.bf16.mxu0 %v7105_v41  ;;  %v7154_v41 = vld [vmem:[#allocation7 + $0x160] ss:$8 sps:$4 sm:$0xff]  }
 0x3db   :  { %5692 = vmatpush1.bf16.msra.mxu0 %v7103_v43  ;;  %v7159_v43 = vld [vmem:[#allocation7 + $0x174] ss:$8 sps:$4 sm:$0xff]  }
 0x3dc   :  { %5693 = vmatprep.subr.bf16.mxu0 %v7108_v56  ;;  %v7157_v56 = vld [vmem:[#allocation7 + $0x170] ss:$8 sps:$4 sm:$0xff]  }
 0x3df   :  { %5694 = vmatpush1.bf16.msra.mxu0 %v7106_v45  ;;  %v7162_v45 = vld [vmem:[#allocation7 + $0x184] ss:$8 sps:$4 sm:$0xff]  }
 0x3e0   :  { %5695 = vmatprep.subr.bf16.mxu0 %v7111_v46  ;;  %v7160_v46 = vld [vmem:[#allocation7 + $0x180] ss:$8 sps:$4 sm:$0xff]  }
 0x3e3   :  { %5696 = vmatpush1.bf16.msra.mxu0 %v7109_v42  ;;  %v7165_v42 = vld [vmem:[#allocation7 + $0x194] ss:$8 sps:$4 sm:$0xff]  }
 0x3e4   :  { %5697 = vmatprep.subr.bf16.mxu0 %v7114_v48  ;;  %v7163_v48 = vld [vmem:[#allocation7 + $0x190] ss:$8 sps:$4 sm:$0xff]  }
 0x3e7   :  { %5698 = vmatpush1.bf16.msra.mxu0 %v7112_v49  ;;  %v7168_v49 = vld [vmem:[#allocation7 + $0x1a4] ss:$8 sps:$4 sm:$0xff]  }
 0x3e8   :  { %5699 = vmatprep.subr.bf16.mxu0 %v7117_v51  ;;  %v7166_v51 = vld [vmem:[#allocation7 + $0x1a0] ss:$8 sps:$4 sm:$0xff]  }
 0x3eb   :  { %5700 = vmatpush1.bf16.msra.mxu0 %v7115_v26  ;;  %v7171_v26 = vld [vmem:[#allocation7 + $0x1b4] ss:$8 sps:$4 sm:$0xff]  }
 0x3ec   :  { %5701 = vmatprep.subr.bf16.mxu0 %v7120_v52  ;;  %v7169_v52 = vld [vmem:[#allocation7 + $0x1b0] ss:$8 sps:$4 sm:$0xff]  }
 0x3ef   :  { %5702 = vmatpush1.bf16.msra.mxu0 %v7118_v7  ;;  %v7174_v7 = vld [vmem:[#allocation7 + $0x1c4] ss:$8 sps:$4 sm:$0xff]  }
 0x3f0   :  { %5703 = vmatprep.subr.bf16.mxu0 %v7123_v57  ;;  %v7172_v57 = vld [vmem:[#allocation7 + $0x1c0] ss:$8 sps:$4 sm:$0xff]  }
 0x3f3   :  { %5704 = vmatpush1.bf16.msra.mxu0 %v7121_v58  ;;  %v7177_v58 = vld [vmem:[#allocation7 + $0x1d4] ss:$8 sps:$4 sm:$0xff]  }
 0x3f4   :  { %5705 = vmatprep.subr.bf16.mxu0 %v7126_v59  ;;  %v7175_v59 = vld [vmem:[#allocation7 + $0x1d0] ss:$8 sps:$4 sm:$0xff]  }
 0x3f7   :  { %5706 = vmatpush1.bf16.msra.mxu0 %v7124_v61  ;;  %v3248_v61 = vrot.slane %v7612_v6, %v7532_v0  ;;  %v7187_v0 = vld [vmem:[#allocation7 + $0x210] ss:$8 sps:$4 sm:$0xff]  }
 0x3f8   :  { %5707 = vmatprep.subr.bf16.mxu0 %v7129_v62  ;;  %v7180_v62 = vld [vmem:[#allocation7 + $0x1e4] ss:$8 sps:$4 sm:$0xff]  }
 0x3fb   :  { %5708 = vmatpush1.bf16.msra.mxu0 %v7127_v18  ;;  %v7178_v18 = vld [vmem:[#allocation7 + $0x1e0] ss:$8 sps:$4 sm:$0xff]  }
 0x3fc   :  { %5709 = vmatprep.subr.bf16.mxu0 %v7132_v63 }
 0x3ff   :  { %5710 = vmatpush1.bf16.msra.mxu0 %v7130_v1  ;;  %v7183_v1 = vld [vmem:[#allocation7 + $0x1f4] ss:$8 sps:$4 sm:$0xff]  }
 0x400   :  { %5711 = vmatprep.subr.bf16.mxu0 %v7135_v2  ;;  %v7181_v2 = vld [vmem:[#allocation7 + $0x1f0] ss:$8 sps:$4 sm:$0xff]  }
 0x403   :  { %5712 = vmatpush1.bf16.msra.mxu0 %v7133_v4 }
 0x404   :  { %5722 = vmatprep.subr.bf16.mxu0 %v7138_v5  ;;  %v7186_v5 = vld [vmem:[#allocation7 + $0x204] ss:$8 sps:$4 sm:$0xff]  }
 0x419   :  { %v4632_v10 = vpop.f32.mrb[4].mxu0  ;;  %v7620_v11 = vpop.f32.mrb[20].mxu1 }
 0x41a   :  { %v6630_v14 = vadd.f32 %v4632_v10, %v3240_v54  ;;  %v4634_v16 = vpop.f32.mrb[5].mxu0  ;;  %v4716_v17 = vpop.f32.mrb[21].mxu1  ;;  %v6632_v63 = vadd.f32 %v7620_v11, %v3248_v61  ;;  %v7184_v54 = vld [vmem:[#allocation7 + $0x200] ss:$8 sps:$4 sm:$0xff]   ;;  %v7192_v10 = vld [vmem:[#allocation7 + $0x224] ss:$8 sps:$4 sm:$0xff]  }
 0x41b   :  { %v6631_v19 = vadd.f32 %v4634_v16, %v3244_v8  ;;  %v6633_v12 = vadd.f32 %v4716_v17, %v3252_v9  ;;  %v4636_v20 = vpop.f32.mrb[6].mxu0  ;;  %v4718_v21 = vpop.f32.mrb[22].mxu1  ;;  %v7189_v9 = vld [vmem:[#allocation7 + $0x214] ss:$8 sps:$4 sm:$0xff]   ;;  %v7193_v16 = vld [vmem:[#allocation7 + $0x230] ss:$8 sps:$4 sm:$0xff]  }
 0x41c   :  { %v4885_v23 = vmax.f32 %v6630_v14, 0.0  ;;  %v4637_v24 = vpop.f32.mrb[7].mxu0  ;;  %v4719_v27 = vpop.f32.mrb[23].mxu1  ;;  %v4887_v4 = vmax.f32 %v6632_v63, 0.0  ;;  %v7190_v14 = vld [vmem:[#allocation7 + $0x220] ss:$8 sps:$4 sm:$0xff]  }
 0x41d   :  { %v4886_v28 = vmax.f32 %v6631_v19, 0.0  ;;  %v4888_v29 = vmax.f32 %v6633_v12, 0.0  ;;  %v7195_v11 = vld [vmem:[#allocation7 + $0x234] ss:$8 sps:$4 sm:$0xff]   ;;  %v7198_v17 = vld [vmem:[#allocation7 + $0x244] ss:$8 sps:$4 sm:$0xff]  }
 0x41e   :  { %v4893_v32 = vpack.c.bf16 %v4885_v23, %v4885_v23  ;;  %v4895_v8 = vpack.c.bf16 %v4887_v4, %v4887_v4  ;;  %v7196_v19 = vld [vmem:[#allocation7 + $0x240] ss:$8 sps:$4 sm:$0xff]   ;;  %v7201_v12 = vld [vmem:[#allocation7 + $0x254] ss:$8 sps:$4 sm:$0xff]   ;;  %v7199_v20 = vld [vmem:[#allocation7 + $0x250] ss:$8 sps:$4 sm:$0xff]  }
 0x41f   :  { %v4894_v30 = vpack.c.bf16 %v4886_v28, %v4886_v28  ;;  %v4896_v3 = vpack.c.bf16 %v4888_v29, %v4888_v29  ;;  %v7204_v21 = vld [vmem:[#allocation7 + $0x264] ss:$8 sps:$4 sm:$0xff]   ;;  %v7202_v23 = vld [vmem:[#allocation7 + $0x260] ss:$8 sps:$4 sm:$0xff]   ;;  %v7207_v24 = vld [vmem:[#allocation7 + $0x274] ss:$8 sps:$4 sm:$0xff]  }
 0x420   :  { %v7205_v27 = vld [vmem:[#allocation7 + $0x270] ss:$8 sps:$4 sm:$0xff]   ;;  %v7210_v28 = vld [vmem:[#allocation7 + $0x284] ss:$8 sps:$4 sm:$0xff]   ;;  %v7208_v29 = vld [vmem:[#allocation7 + $0x280] ss:$8 sps:$4 sm:$0xff]  }
 0x421   :  { %5713 = vmatprep.mubr.bf16.mxu0 %v4894_v30  ;;  %v7213_v30 = vld [vmem:[#allocation7 + $0x294] ss:$8 sps:$4 sm:$0xff]   ;;  %v7232_v61 = vld [vmem:[#allocation7 + $0x300] ss:$8 sps:$4 sm:$0xff]  }
 0x422   :  { %5714 = vmatmul.mubr.bf16.vlgmr.msra.gmra.mrb[12].mxu0 %v4893_v32  ;;  %v7216_v32 = vld [vmem:[#allocation7 + $0x2a4] ss:$8 sps:$4 sm:$0xff]   ;;  %v7238_v4 = vld [vmem:[#allocation7 + $0x320] ss:$8 sps:$4 sm:$0xff]  }
 0x423   :  { %5723 = vmatpush1.bf16.msra.mxu0 %v7136_v31  ;;  %5754 = vmatprep.mubr.bf16.mxu0 %v4896_v3  ;;  %v7211_v31 = vld [vmem:[#allocation7 + $0x290] ss:$8 sps:$4 sm:$0xff]   ;;  %v7219_v3 = vld [vmem:[#allocation7 + $0x2b4] ss:$8 sps:$4 sm:$0xff]  }
 0x424   :  { %5724 = vmatprep.subr.bf16.mxu0 %v7141_v33  ;;  %v7214_v33 = vld [vmem:[#allocation7 + $0x2a0] ss:$8 sps:$4 sm:$0xff]  }
 0x427   :  { %5725 = vmatpush1.bf16.msra.mxu0 %v7139_v34  ;;  %v7217_v34 = vld [vmem:[#allocation7 + $0x2b0] ss:$8 sps:$4 sm:$0xff]  }
 0x428   :  { %5726 = vmatprep.subr.bf16.mxu0 %v7144_v35  ;;  %v7222_v35 = vld [vmem:[#allocation7 + $0x2c4] ss:$8 sps:$4 sm:$0xff]  }
 0x42b   :  { %5727 = vmatpush1.bf16.msra.mxu0 %v7142_v36  ;;  %v7220_v36 = vld [vmem:[#allocation7 + $0x2c0] ss:$8 sps:$4 sm:$0xff]  }
 0x42c   :  { %5728 = vmatprep.subr.bf16.mxu0 %v7147_v37  ;;  %v7225_v37 = vld [vmem:[#allocation7 + $0x2d4] ss:$8 sps:$4 sm:$0xff]  }
 0x42f   :  { %5729 = vmatpush1.bf16.msra.mxu0 %v7145_v38  ;;  %v7223_v38 = vld [vmem:[#allocation7 + $0x2d0] ss:$8 sps:$4 sm:$0xff]  }
 0x430   :  { %5730 = vmatprep.subr.bf16.mxu0 %v7150_v39  ;;  %v7228_v39 = vld [vmem:[#allocation7 + $0x2e4] ss:$8 sps:$4 sm:$0xff]  }
 0x433   :  { %5731 = vmatpush1.bf16.msra.mxu0 %v7148_v60  ;;  %v3256_v60 = vrot.slane %v7612_v6, %v236_v22 }
 0x434   :  { %5732 = vmatprep.subr.bf16.mxu0 %v7153_v13  ;;  %v7226_v13 = vld [vmem:[#allocation7 + $0x2e0] ss:$8 sps:$4 sm:$0xff]  }
 0x437   :  { %5733 = vmatpush1.bf16.msra.mxu0 %v7151_v40  ;;  %v3260_v40 = vrot.slane %v7612_v6, %v240_v25 }
 0x438   :  { %5734 = vmatprep.subr.bf16.mxu0 %v7156_v15  ;;  %v3268_v15 = vrot.slane %v7612_v6, %v248_v47 }
 0x43b   :  { %5735 = vmatpush1.bf16.msra.mxu0 %v7154_v41  ;;  %v7231_v41 = vld [vmem:[#allocation7 + $0x2f4] ss:$8 sps:$4 sm:$0xff]  }
 0x43c   :  { %5736 = vmatprep.subr.bf16.mxu0 %v7159_v43 }
 0x43f   :  { %5737 = vmatpush1.bf16.msra.mxu0 %v7157_v56 }
 0x440   :  { %5738 = vmatprep.subr.bf16.mxu0 %v7162_v45 }
 0x443   :  { %5739 = vmatpush1.bf16.msra.mxu0 %v7160_v46 }
 0x444   :  { %5740 = vmatprep.subr.bf16.mxu0 %v7165_v42 }
 0x447   :  { %5741 = vmatpush1.bf16.msra.mxu0 %v7163_v48 }
 0x448   :  { %5742 = vmatprep.subr.bf16.mxu0 %v7168_v49  ;;  %v7229_v49 = vld [vmem:[#allocation7 + $0x2f0] ss:$8 sps:$4 sm:$0xff]  }
 0x44b   :  { %5743 = vmatpush1.bf16.msra.mxu0 %v7166_v51 }
 0x44c   :  { %5744 = vmatprep.subr.bf16.mxu0 %v7171_v26 }
 0x44f   :  { %5745 = vmatpush1.bf16.msra.mxu0 %v7169_v52 }
 0x450   :  { %5746 = vmatprep.subr.bf16.mxu0 %v7174_v7  ;;  %v7234_v7 = vld [vmem:[#allocation7 + $0x304] ss:$8 sps:$4 sm:$0xff]  }
 0x453   :  { %5747 = vmatpush1.bf16.msra.mxu0 %v7172_v57 }
 0x454   :  { %5748 = vmatprep.subr.bf16.mxu0 %v7177_v58 }
 0x457   :  { %5749 = vmatpush1.bf16.msra.mxu0 %v7175_v59 }
 0x458   :  { %5750 = vmatprep.subr.bf16.mxu0 %v7180_v62 }
 0x45b   :  { %5751 = vmatpush1.bf16.msra.mxu0 %v7178_v18  ;;  %v7237_v18 = vld [vmem:[#allocation7 + $0x314] ss:$8 sps:$4 sm:$0xff]  }
 0x45c   :  { %5752 = vmatprep.subr.bf16.mxu0 %v7183_v1  ;;  %v7235_v1 = vld [vmem:[#allocation7 + $0x310] ss:$8 sps:$4 sm:$0xff]  }
 0x45f   :  { %5753 = vmatpush1.bf16.msra.mxu0 %v7181_v2  ;;  %v7240_v2 = vld [vmem:[#allocation7 + $0x324] ss:$8 sps:$4 sm:$0xff]  }
 0x460   :  { %5763 = vmatprep.subr.bf16.mxu0 %v7186_v5  ;;  %v7243_v5 = vld [vmem:[#allocation7 + $0x334] ss:$8 sps:$4 sm:$0xff]  }
 0x462   :  { %5755 = vmatmul.mubr.bf16.vlgmr.msra.gmra.mrb[12].mxu0 %v4895_v8  ;;  %v7246_v8 = vld [vmem:[#allocation7 + $0x344] ss:$8 sps:$4 sm:$0xff]  }
 0x463   :  { %5764 = vmatpush1.bf16.msra.mxu0 %v7184_v54  ;;  %v7241_v54 = vld [vmem:[#allocation7 + $0x330] ss:$8 sps:$4 sm:$0xff]  }
 0x464   :  { %5765 = vmatprep.subr.bf16.mxu0 %v7189_v9  ;;  %v7244_v9 = vld [vmem:[#allocation7 + $0x340] ss:$8 sps:$4 sm:$0xff]  }
 0x467   :  { %5766 = vmatpush1.bf16.msra.mxu0 %v7187_v0  ;;  %v7249_v0 = vld [vmem:[#allocation7 + $0x354] ss:$8 sps:$4 sm:$0xff]  }
 0x468   :  { %5767 = vmatprep.subr.bf16.mxu0 %v7192_v10  ;;  %v7247_v10 = vld [vmem:[#allocation7 + $0x350] ss:$8 sps:$4 sm:$0xff]  }
 0x46b   :  { %5768 = vmatpush1.bf16.msra.mxu0 %v7190_v14  ;;  %v7252_v14 = vld [vmem:[#allocation7 + $0x364] ss:$8 sps:$4 sm:$0xff]  }
 0x46c   :  { %5769 = vmatprep.subr.bf16.mxu0 %v7195_v11  ;;  %v7250_v11 = vld [vmem:[#allocation7 + $0x360] ss:$8 sps:$4 sm:$0xff]  }
 0x46f   :  { %5770 = vmatpush1.bf16.msra.mxu0 %v7193_v16  ;;  %v7255_v16 = vld [vmem:[#allocation7 + $0x374] ss:$8 sps:$4 sm:$0xff]  }
 0x470   :  { %5771 = vmatprep.subr.bf16.mxu0 %v7198_v17  ;;  %v7253_v17 = vld [vmem:[#allocation7 + $0x370] ss:$8 sps:$4 sm:$0xff]  }
 0x473   :  { %5772 = vmatpush1.bf16.msra.mxu0 %v7196_v19  ;;  %v7258_v19 = vld [vmem:[#allocation7 + $0x384] ss:$8 sps:$4 sm:$0xff]  }
 0x474   :  { %5773 = vmatprep.subr.bf16.mxu0 %v7201_v12  ;;  %v7256_v12 = vld [vmem:[#allocation7 + $0x380] ss:$8 sps:$4 sm:$0xff]  }
 0x477   :  { %5774 = vmatpush1.bf16.msra.mxu0 %v7199_v20  ;;  %v7261_v20 = vld [vmem:[#allocation7 + $0x394] ss:$8 sps:$4 sm:$0xff]  }
 0x478   :  { %5775 = vmatprep.subr.bf16.mxu0 %v7204_v21  ;;  %v7259_v21 = vld [vmem:[#allocation7 + $0x390] ss:$8 sps:$4 sm:$0xff]  }
 0x47b   :  { %5776 = vmatpush1.bf16.msra.mxu0 %v7202_v23  ;;  %v7264_v23 = vld [vmem:[#allocation7 + $0x3a4] ss:$8 sps:$4 sm:$0xff]  }
 0x47c   :  { %5777 = vmatprep.subr.bf16.mxu0 %v7207_v24  ;;  %v7262_v24 = vld [vmem:[#allocation7 + $0x3a0] ss:$8 sps:$4 sm:$0xff]  }
 0x47f   :  { %5778 = vmatpush1.bf16.msra.mxu0 %v7205_v27  ;;  %v7267_v27 = vld [vmem:[#allocation7 + $0x3b4] ss:$8 sps:$4 sm:$0xff]  }
 0x480   :  { %5779 = vmatprep.subr.bf16.mxu0 %v7210_v28  ;;  %v7265_v28 = vld [vmem:[#allocation7 + $0x3b0] ss:$8 sps:$4 sm:$0xff]  }
 0x483   :  { %5780 = vmatpush1.bf16.msra.mxu0 %v7208_v29  ;;  %v7270_v29 = vld [vmem:[#allocation7 + $0x3c4] ss:$8 sps:$4 sm:$0xff]  }
 0x484   :  { %5781 = vmatprep.subr.bf16.mxu0 %v7213_v30  ;;  %v7268_v30 = vld [vmem:[#allocation7 + $0x3c0] ss:$8 sps:$4 sm:$0xff]  }
 0x487   :  { %5782 = vmatpush1.bf16.msra.mxu0 %v7211_v31  ;;  %v7273_v31 = vld [vmem:[#allocation7 + $0x3d4] ss:$8 sps:$4 sm:$0xff]  }
 0x488   :  { %5783 = vmatprep.subr.bf16.mxu0 %v7216_v32  ;;  %v7271_v32 = vld [vmem:[#allocation7 + $0x3d0] ss:$8 sps:$4 sm:$0xff]  }
 0x48b   :  { %5784 = vmatpush1.bf16.msra.mxu0 %v7214_v33  ;;  %v3264_v33 = vrot.slane %v7612_v6, %v244_v44  ;;  %v5034_v44 = vrot.slane %v5029_v50, %v7513_v53  ;;  %v5038_v6 = vrot.slane %v5029_v50, %v7521_v55 }
 0x48c   :  { %5785 = vmatprep.subr.bf16.mxu0 %v7219_v3  ;;  %v7276_v3 = vld [vmem:[#allocation7 + $0x3e4] ss:$8 sps:$4 sm:$0xff]  }
 0x48f   :  { %5786 = vmatpush1.bf16.msra.mxu0 %v7217_v34  ;;  %v7274_v34 = vld [vmem:[#allocation7 + $0x3e0] ss:$8 sps:$4 sm:$0xff]  }
 0x490   :  { %5787 = vmatprep.subr.bf16.mxu0 %v7222_v35 }
 0x493   :  { %5788 = vmatpush1.bf16.msra.mxu0 %v7220_v36  ;;  %v7279_v36 = vld [vmem:[#allocation7 + $0x3f4] ss:$8 sps:$4 sm:$0xff]  }
 0x494   :  { %5789 = vmatprep.subr.bf16.mxu0 %v7225_v37  ;;  %v7277_v37 = vld [vmem:[#allocation7 + $0x3f0] ss:$8 sps:$4 sm:$0xff]  }
 0x497   :  { %5790 = vmatpush1.bf16.msra.mxu0 %v7223_v38 }
 0x498   :  { %5791 = vmatprep.subr.bf16.mxu0 %v7228_v39 }
 0x499   :  { %v4796_v43 = vpop.f32.mrb[8].mxu0 }
 0x49a   :  { %v6634_v56 = vadd.f32 %v4796_v43, %v3256_v60  ;;  %v7634_v45 = vpop.f32.mrb[24].mxu1  ;;  %v4798_v46 = vpop.f32.mrb[9].mxu0 }
 0x49b   :  { %v6635_v42 = vadd.f32 %v4798_v46, %v3260_v40  ;;  %v4880_v48 = vpop.f32.mrb[25].mxu1  ;;  %5792 = vmatpush1.bf16.msra.mxu0 %v7226_v13  ;;  %v4800_v22 = vpop.f32.mrb[10].mxu0  ;;  %v6636_v35 = vadd.f32 %v7634_v45, %v3264_v33 }
 0x49c   :  { %v4889_v51 = vmax.f32 %v6634_v56, 0.0  ;;  %v6637_v26 = vadd.f32 %v4880_v48, %v3268_v15  ;;  %v4882_v52 = vpop.f32.mrb[26].mxu1  ;;  %v4801_v25 = vpop.f32.mrb[11].mxu0  ;;  %5793 = vmatprep.subr.bf16.mxu0 %v7231_v41 }
 0x49d   :  { %v4890_v57 = vmax.f32 %v6635_v42, 0.0  ;;  %v4883_v58 = vpop.f32.mrb[27].mxu1  ;;  %v4891_v38 = vmax.f32 %v6636_v35, 0.0 }
 0x49e   :  { %v4892_v47 = vmax.f32 %v6637_v26, 0.0  ;;  %v4897_v62 = vpack.c.bf16 %v4889_v51, %v4889_v51 }
 0x49f   :  { %v4898_v59 = vpack.c.bf16 %v4890_v57, %v4890_v57  ;;  %5794 = vmatpush1.bf16.msra.mxu0 %v7229_v49  ;;  %v4899_v39 = vpack.c.bf16 %v4891_v38, %v4891_v38 }
 0x4a0   :  { %5804 = vmatprep.subr.bf16.mxu0 %v7234_v7  ;;  %v4900_v63 = vpack.c.bf16 %v4892_v47, %v4892_v47 }
 0x4a1   :  { %5795 = vmatprep.mubr.bf16.mxu0 %v4898_v59 }
 0x4a2   :  { %5796 = vmatmul.mubr.bf16.vlgmr.msra.gmra.mrb[12].mxu0 %v4897_v62 }
 0x4a3   :  { %5805 = vmatpush1.bf16.msra.mxu0 %v7232_v61  ;;  %5836 = vmatprep.mubr.bf16.mxu0 %v4900_v63 }
 0x4a4   :  { %5806 = vmatprep.subr.bf16.mxu0 %v7237_v18 }
 0x4a7   :  { %5807 = vmatpush1.bf16.msra.mxu0 %v7235_v1 }
 0x4a8   :  { %5808 = vmatprep.subr.bf16.mxu0 %v7240_v2 }
 0x4ab   :  { %5809 = vmatpush1.bf16.msra.mxu0 %v7238_v4 }
 0x4ac   :  { %5810 = vmatprep.subr.bf16.mxu0 %v7243_v5 }
 0x4af   :  { %5811 = vmatpush1.bf16.msra.mxu0 %v7241_v54 }
 0x4b0   :  { %5812 = vmatprep.subr.bf16.mxu0 %v7246_v8 }
 0x4b3   :  { %5813 = vmatpush1.bf16.msra.mxu0 %v7244_v9 }
 0x4b4   :  { %5814 = vmatprep.subr.bf16.mxu0 %v7249_v0 }
 0x4b7   :  { %5815 = vmatpush1.bf16.msra.mxu0 %v7247_v10 }
 0x4b8   :  { %5816 = vmatprep.subr.bf16.mxu0 %v7252_v14 }
 0x4bb   :  { %5817 = vmatpush1.bf16.msra.mxu0 %v7250_v11 }
 0x4bc   :  { %5818 = vmatprep.subr.bf16.mxu0 %v7255_v16 }
 0x4bf   :  { %5819 = vmatpush1.bf16.msra.mxu0 %v7253_v17 }
 0x4c0   :  { %5820 = vmatprep.subr.bf16.mxu0 %v7258_v19 }
 0x4c3   :  { %5821 = vmatpush1.bf16.msra.mxu0 %v7256_v12 }
 0x4c4   :  { %5822 = vmatprep.subr.bf16.mxu0 %v7261_v20 }
 0x4c7   :  { %5823 = vmatpush1.bf16.msra.mxu0 %v7259_v21 }
 0x4c8   :  { %5824 = vmatprep.subr.bf16.mxu0 %v7264_v23 }
 0x4cb   :  { %5825 = vmatpush1.bf16.msra.mxu0 %v7262_v24 }
 0x4cc   :  { %5826 = vmatprep.subr.bf16.mxu0 %v7267_v27 }
 0x4cf   :  { %5827 = vmatpush1.bf16.msra.mxu0 %v7265_v28 }
 0x4d0   :  { %5828 = vmatprep.subr.bf16.mxu0 %v7270_v29 }
 0x4d3   :  { %5829 = vmatpush1.bf16.msra.mxu0 %v7268_v30 }
 0x4d4   :  { %5830 = vmatprep.subr.bf16.mxu0 %v7273_v31 }
 0x4d7   :  { %5831 = vmatpush1.bf16.msra.mxu0 %v7271_v32 }
 0x4d8   :  { %5832 = vmatprep.subr.bf16.mxu0 %v7276_v3 }
 0x4db   :  { %5833 = vmatpush1.bf16.msra.mxu0 %v7274_v34 }
 0x4dc   :  { %5834 = vmatprep.subr.bf16.mxu0 %v7279_v36 }
 0x4df   :  { %5835 = vmatpush1.bf16.msra.mxu0 %v7277_v37 }
 0x4e2   :  { %5837 = vmatmul.mubr.bf16.vlgmr.msra.gmra.mrb[12].mxu0 %v4899_v39 }
 0x5b5   :  { %v5838_v60 = vpop.f32.mrb[12].mxu0 }
 0x5b6   :  { %v6638_v13 = vadd.f32 %v5838_v60, %v5034_v44  ;;  %v5840_v40 = vpop.f32.mrb[13].mxu0 }
 0x5b7   :  { %v6639_v15 = vadd.f32 %v5840_v40, %v5038_v6  ;;  %v5842_v41 = vpop.f32.mrb[14].mxu0 }
 0x5b8   :  { %v5845_v43 = vmax.f32 %v6638_v13, 0.0  ;;  %v5843_v56 = vpop.f32.mrb[15].mxu0 }
 0x5b9   :  { %v5846_v45 = vmax.f32 %v6639_v15, 0.0 }
 0x5ba   :  { %5847 = vst [vmem:[%s7660_s9] sm:$0xff] %v5845_v43 }
 0x5bb   :  { %5848 = vst [vmem:[%s7660_s9 + $0x8] sm:$0xff] %v5846_v45 }
 0x5bc   :  { %5853 = vsyncpa [#allocation3], 1 }
 0x5bd   :  { %5854 = vsyncpa [#allocation5], 1 }
 0x5be   :  { %5855 = vsyncpa [#allocation8], 1 }

</bundles_post_ra>
